<compile_context>
chip_gen: v5e
topology: v5e:2x2
jax: 0.10.0
libtpu: 0.0.40
codegen_flags: <defaults>
</compile_context>

<pallas_src>
import jax
import jax.numpy as jnp
from jax.experimental import pallas as pl
from jax.experimental.pallas import tpu as pltpu

# Logical sizes (PyTorch module) and lane-padded internal sizes.
D_IN, D_H, D_Z = 784, 400, 20
D_H_P, D_Z_P = 512, 128                  # hidden / latent padded to lane multiples
MAX_BLOCK_B = 512                        # max batch rows per grid step


def _vae_kernel(x_ref, eps_ref,
                w1_ref, b1_ref,
                w2x_ref, b2x_ref,
                w3_ref, b3_ref,
                w4_ref, b4_ref,
                recon_ref, muvar_ref):
    # ---- encode: h1 = relu(x @ W1 + b1) ----
    x = x_ref[...].astype(jnp.bfloat16)                               # (Bb, 784)
    h1 = jnp.dot(x, w1_ref[...], preferred_element_type=jnp.float32)
    h1 = jnp.maximum(h1 + b1_ref[...], 0.0)                           # (Bb, 512)

    # ---- fused fc21/fc22: mu in lanes [0,128), logvar in lanes [128,256) ----
    muvar = jnp.dot(h1.astype(jnp.bfloat16), w2x_ref[...],
                    preferred_element_type=jnp.float32) + b2x_ref[...]
    mu = muvar[:, :D_Z_P]                                             # (Bb, 128)
    logvar = muvar[:, D_Z_P:]                                         # (Bb, 128)

    # ---- reparameterize: z = mu + eps * exp(0.5 * logvar) ----
    # padded lanes: eps, mu and logvar are all 0 there, so z stays 0 as well.
    z = mu + eps_ref[...] * jnp.exp(0.5 * logvar)                     # (Bb, 128)

    # ---- decode: h3 = relu(z @ W3 + b3); recon = sigmoid(h3 @ W4 + b4) ----
    h3 = jnp.dot(z.astype(jnp.bfloat16), w3_ref[...],
                 preferred_element_type=jnp.float32)
    h3 = jnp.maximum(h3 + b3_ref[...], 0.0)                           # (Bb, 512)

    logits = jnp.dot(h3.astype(jnp.bfloat16), w4_ref[...],
                     preferred_element_type=jnp.float32) + b4_ref[...]
    recon_ref[...] = jax.nn.sigmoid(logits)                           # EUP logistic
    muvar_ref[...] = muvar


def _round_up(n, m):
    return ((n + m - 1) // m) * m


def _choose_block(B):
    """Batch rows per grid step: sublane-dense for bf16 (mult of 16); >=2 grid
    steps when B > 32 (dual-TC sharding + pipeline overlap); capped at 512."""
    if B <= 32:
        return _round_up(B, 16)
    return min(MAX_BLOCK_B, _round_up(pl.cdiv(B, 2), 16))


def pack_params(params):
    """Zero-pad weights/biases on the hidden/latent dims only (K/N of the input
    and output layers stay 784), fuse fc21/fc22, cast matmul weights to bf16
    (biases stay f32). Weights are (in_features, out_features)."""
    w1, b1, w21, b21, w22, b22, w3, b3, w4, b4 = params

    w1_p = jnp.zeros((D_IN, D_H_P), jnp.float32).at[:, :D_H].set(w1)
    b1_p = jnp.zeros((1, D_H_P), jnp.float32).at[:, :D_H].set(b1)

    # fused encoder head: mu weights in cols [0,20), logvar in cols [128,148)
    w2x_p = (jnp.zeros((D_H_P, 2 * D_Z_P), jnp.float32)
             .at[:D_H, :D_Z].set(w21)
             .at[:D_H, D_Z_P:D_Z_P + D_Z].set(w22))
    b2x_p = (jnp.zeros((1, 2 * D_Z_P), jnp.float32)
             .at[:, :D_Z].set(b21)
             .at[:, D_Z_P:D_Z_P + D_Z].set(b22))

    w3_p = jnp.zeros((D_Z_P, D_H_P), jnp.float32).at[:D_Z, :D_H].set(w3)
    b3_p = jnp.zeros((1, D_H_P), jnp.float32).at[:, :D_H].set(b3)

    w4_p = jnp.zeros((D_H_P, D_IN), jnp.float32).at[:D_H, :].set(w4)
    b4_p = b4.astype(jnp.float32)                                     # (1, 784)

    bf = jnp.bfloat16
    return (w1_p.astype(bf), b1_p, w2x_p.astype(bf), b2x_p,
            w3_p.astype(bf), b3_p, w4_p.astype(bf), b4_p)


@jax.jit
def vae_forward(x, eps, packed):
    """x: (B, 1, 28, 28) f32, eps: (B, 20) f32. Returns (x, recon, mu, logvar)."""
    B = x.shape[0]
    block_b = _choose_block(B)
    b_pad = _round_up(B, block_b)
    grid = (b_pad // block_b,)

    # Only the batch dim is padded; feature dim stays 784 (no pad/crop passes).
    x_flat = x.reshape(B, D_IN).astype(jnp.float32)
    if b_pad != B:
        x_flat = jnp.pad(x_flat, ((0, b_pad - B), (0, 0)))
    # eps is tiny: lane-pad 20 -> 128 (and batch-pad) so it lines up with mu.
    eps_p = jnp.pad(eps.astype(jnp.float32),
                    ((0, b_pad - B), (0, D_Z_P - D_Z)))

    w1_p, b1_p, w2x_p, b2x_p, w3_p, b3_p, w4_p, b4_p = packed

    def act_spec(n):                       # tiled over the batch grid axis
        return pl.BlockSpec((block_b, n), lambda i: (i, 0))

    def resident_spec(arr):                # same block every step -> stays in VMEM
        return pl.BlockSpec(arr.shape, lambda i: (0, 0))

    recon_p, muvar_p = pl.pallas_call(
        _vae_kernel,
        out_shape=(
            jax.ShapeDtypeStruct((b_pad, D_IN), jnp.float32),
            jax.ShapeDtypeStruct((b_pad, 2 * D_Z_P), jnp.float32),
        ),
        grid=grid,
        in_specs=[
            act_spec(D_IN),                # x  (last dim == full dim -> legal)
            act_spec(D_Z_P),               # eps
            resident_spec(w1_p), resident_spec(b1_p),
            resident_spec(w2x_p), resident_spec(b2x_p),
            resident_spec(w3_p), resident_spec(b3_p),
            resident_spec(w4_p), resident_spec(b4_p),
        ],
        out_specs=(act_spec(D_IN), act_spec(2 * D_Z_P)),
        compiler_params=pltpu.CompilerParams(
            dimension_semantics=("parallel",),
            vmem_limit_bytes=32 * 1024 * 1024,   # actual need at block 512
        ),
    )(x_flat, eps_p, w1_p, b1_p, w2x_p, b2x_p, w3_p, b3_p, w4_p, b4_p)

    recon = recon_p[:B].reshape(B, 1, 28, 28)
    mu = muvar_p[:B, :D_Z]
    logvar = muvar_p[:B, D_Z_P:D_Z_P + D_Z]
    return x, recon, mu, logvar


def init_params(key):
    """Deterministic init mimicking PyTorch Linear default (uniform +-1/sqrt(fan_in)).
    Weights stored as (in_features, out_features)."""
    def linear(key, fan_in, fan_out):
        kw, kb = jax.random.split(key)
        bound = 1.0 / jnp.sqrt(fan_in)
        w = jax.random.uniform(kw, (fan_in, fan_out), jnp.float32, -bound, bound)
        b = jax.random.uniform(kb, (1, fan_out), jnp.float32, -bound, bound)
        return w, b

    keys = jax.random.split(key, 5)
    w1, b1 = linear(keys[0], 784, 400)     # fc1
    w21, b21 = linear(keys[1], 400, 20)    # fc21 (mu)
    w22, b22 = linear(keys[2], 400, 20)    # fc22 (logvar)
    w3, b3 = linear(keys[3], 20, 400)      # fc3
    w4, b4 = linear(keys[4], 400, 784)     # fc4
    return (w1, b1, w21, b21, w22, b22, w3, b3, w4, b4)


def vae_reference(x, eps, params):
    """Pure-JAX f32 reference of the PyTorch forward (for correctness check)."""
    w1, b1, w21, b21, w22, b22, w3, b3, w4, b4 = params
    B = x.shape[0]
    xf = x.reshape(B, D_IN)
    h1 = jax.nn.relu(xf @ w1 + b1)
    mu = h1 @ w21 + b21
    logvar = h1 @ w22 + b22
    z = mu + eps * jnp.exp(0.5 * logvar)
    h3 = jax.nn.relu(z @ w3 + b3)
    recon = jax.nn.sigmoid(h3 @ w4 + b4).reshape(B, 1, 28, 28)
    return recon, mu, logvar


if __name__ == "__main__":
    key = jax.random.PRNGKey(0)
    k_param, k_x, k_eps = jax.random.split(key, 3)

    B = 4
    x = jax.random.normal(k_x, (B, 1, 28, 28), jnp.float32)
    eps = jax.random.normal(k_eps, (B, D_Z), jnp.float32)   # reparameterization noise
    params = init_params(k_param)
    packed = pack_params(params)

    x_out, recon, mu, logvar = vae_forward(x, eps, packed)
    jax.block_until_ready((x_out, recon, mu, logvar))

    assert x_out.shape == (B, 1, 28, 28)
    assert recon.shape == (B, 1, 28, 28)
    assert mu.shape == (B, D_Z)
    assert logvar.shape == (B, D_Z)
    assert bool(jnp.all(jnp.isfinite(recon)))
    assert bool(jnp.all((recon >= 0.0) & (recon <= 1.0)))

    # Compare against pure-JAX f32 reference; bf16 MXU inputs -> loose tolerance.
    recon_ref, mu_ref, logvar_ref = vae_reference(x, eps, params)
    assert float(jnp.max(jnp.abs(recon - recon_ref))) < 0.1
    assert float(jnp.max(jnp.abs(mu - mu_ref))) < 0.1
    assert float(jnp.max(jnp.abs(logvar - logvar_ref))) < 0.1

    print("KERNEL_OK")
</pallas_src>

<mosaic_0001>
module attributes {stable_mosaic.version = 11 : i64} {
  func.func @_vae_kernel(%arg0: i32, %arg1: memref<16x784xf32, #tpu.memory_space<vmem>>, %arg2: memref<16x128xf32, #tpu.memory_space<vmem>>, %arg3: memref<784x512xbf16, #tpu.memory_space<vmem>>, %arg4: memref<1x512xf32, #tpu.memory_space<vmem>>, %arg5: memref<512x256xbf16, #tpu.memory_space<vmem>>, %arg6: memref<1x256xf32, #tpu.memory_space<vmem>>, %arg7: memref<128x512xbf16, #tpu.memory_space<vmem>>, %arg8: memref<1x512xf32, #tpu.memory_space<vmem>>, %arg9: memref<512x784xbf16, #tpu.memory_space<vmem>>, %arg10: memref<1x784xf32, #tpu.memory_space<vmem>>, %arg11: memref<16x784xf32, #tpu.memory_space<vmem>>, %arg12: memref<16x256xf32, #tpu.memory_space<vmem>>) attributes {dimension_semantics = [#tpu.dimension_semantics<parallel>], iteration_bounds = array<i64: 1>, scalar_prefetch = 0 : i64, scratch_operands = 0 : i64, tpu.core_type = #tpu.core_type<tc>, window_params = [{transform_indices = @transform_0, window_bounds = array<i64: 16, 784>}, {transform_indices = @transform_1, window_bounds = array<i64: 16, 128>}, {pipeline_mode = #tpu.pipeline_mode<synchronous>, transform_indices = @transform_2, window_bounds = array<i64: 784, 512>}, {pipeline_mode = #tpu.pipeline_mode<synchronous>, transform_indices = @transform_3, window_bounds = array<i64: 1, 512>}, {pipeline_mode = #tpu.pipeline_mode<synchronous>, transform_indices = @transform_4, window_bounds = array<i64: 512, 256>}, {pipeline_mode = #tpu.pipeline_mode<synchronous>, transform_indices = @transform_5, window_bounds = array<i64: 1, 256>}, {pipeline_mode = #tpu.pipeline_mode<synchronous>, transform_indices = @transform_6, window_bounds = array<i64: 128, 512>}, {pipeline_mode = #tpu.pipeline_mode<synchronous>, transform_indices = @transform_7, window_bounds = array<i64: 1, 512>}, {pipeline_mode = #tpu.pipeline_mode<synchronous>, transform_indices = @transform_8, window_bounds = array<i64: 512, 784>}, {pipeline_mode = #tpu.pipeline_mode<synchronous>, transform_indices = @transform_9, window_bounds = array<i64: 1, 784>}, {transform_indices = @transform_10, window_bounds = array<i64: 16, 784>}, {transform_indices = @transform_11, window_bounds = array<i64: 16, 256>}]} {
    %c0 = arith.constant 0 : index
    %c0_0 = arith.constant 0 : index
    %0 = vector.load %arg1[%c0, %c0_0] : memref<16x784xf32, #tpu.memory_space<vmem>>, vector<16x784xf32>
    %1 = arith.truncf %0 : vector<16x784xf32> to vector<16x784xbf16>
    %c0_1 = arith.constant 0 : index
    %c0_2 = arith.constant 0 : index
    %2 = vector.load %arg3[%c0_1, %c0_2] : memref<784x512xbf16, #tpu.memory_space<vmem>>, vector<784x512xbf16>
    %cst = arith.constant dense<0.000000e+00> : vector<16x512xf32>
    %3 = tpu.matmul %1, %2, %cst {dimension_numbers = #tpu.dot_dimension_numbers<[1], [0], [0], [1], [0, 0, 1, 1], [], []>} : vector<16x784xbf16>, vector<784x512xbf16>, vector<16x512xf32> -> vector<16x512xf32>
    %c0_3 = arith.constant 0 : index
    %c0_4 = arith.constant 0 : index
    %4 = vector.load %arg4[%c0_3, %c0_4] : memref<1x512xf32, #tpu.memory_space<vmem>>, vector<1x512xf32>
    %5 = vector.broadcast %4 : vector<1x512xf32> to vector<16x512xf32>
    %6 = arith.addf %3, %5 : vector<16x512xf32>
    %cst_5 = arith.constant 0.000000e+00 : f32
    %7 = vector.broadcast %cst_5 : f32 to vector<16x512xf32>
    %8 = arith.maximumf %6, %7 : vector<16x512xf32>
    %9 = arith.truncf %8 : vector<16x512xf32> to vector<16x512xbf16>
    %c0_6 = arith.constant 0 : index
    %c0_7 = arith.constant 0 : index
    %10 = vector.load %arg5[%c0_6, %c0_7] : memref<512x256xbf16, #tpu.memory_space<vmem>>, vector<512x256xbf16>
    %cst_8 = arith.constant dense<0.000000e+00> : vector<16x256xf32>
    %11 = tpu.matmul %9, %10, %cst_8 {dimension_numbers = #tpu.dot_dimension_numbers<[1], [0], [0], [1], [0, 0, 1, 1], [], []>} : vector<16x512xbf16>, vector<512x256xbf16>, vector<16x256xf32> -> vector<16x256xf32>
    %c0_9 = arith.constant 0 : index
    %c0_10 = arith.constant 0 : index
    %12 = vector.load %arg6[%c0_9, %c0_10] : memref<1x256xf32, #tpu.memory_space<vmem>>, vector<1x256xf32>
    %13 = vector.broadcast %12 : vector<1x256xf32> to vector<16x256xf32>
    %14 = arith.addf %11, %13 : vector<16x256xf32>
    %15 = vector.extract_strided_slice %14 {offsets = [0, 0], sizes = [16, 128], strides = [1, 1]} : vector<16x256xf32> to vector<16x128xf32>
    %16 = vector.extract_strided_slice %14 {offsets = [0, 128], sizes = [16, 128], strides = [1, 1]} : vector<16x256xf32> to vector<16x128xf32>
    %c0_11 = arith.constant 0 : index
    %c0_12 = arith.constant 0 : index
    %17 = vector.load %arg2[%c0_11, %c0_12] : memref<16x128xf32, #tpu.memory_space<vmem>>, vector<16x128xf32>
    %cst_13 = arith.constant 5.000000e-01 : f32
    %18 = vector.broadcast %cst_13 : f32 to vector<16x128xf32>
    %19 = arith.mulf %18, %16 : vector<16x128xf32>
    %20 = math.exp %19 : vector<16x128xf32>
    %21 = arith.mulf %17, %20 : vector<16x128xf32>
    %22 = arith.addf %15, %21 : vector<16x128xf32>
    %23 = arith.truncf %22 : vector<16x128xf32> to vector<16x128xbf16>
    %c0_14 = arith.constant 0 : index
    %c0_15 = arith.constant 0 : index
    %24 = vector.load %arg7[%c0_14, %c0_15] : memref<128x512xbf16, #tpu.memory_space<vmem>>, vector<128x512xbf16>
    %cst_16 = arith.constant dense<0.000000e+00> : vector<16x512xf32>
    %25 = tpu.matmul %23, %24, %cst_16 {dimension_numbers = #tpu.dot_dimension_numbers<[1], [0], [0], [1], [0, 0, 1, 1], [], []>} : vector<16x128xbf16>, vector<128x512xbf16>, vector<16x512xf32> -> vector<16x512xf32>
    %c0_17 = arith.constant 0 : index
    %c0_18 = arith.constant 0 : index
    %26 = vector.load %arg8[%c0_17, %c0_18] : memref<1x512xf32, #tpu.memory_space<vmem>>, vector<1x512xf32>
    %27 = vector.broadcast %26 : vector<1x512xf32> to vector<16x512xf32>
    %28 = arith.addf %25, %27 : vector<16x512xf32>
    %cst_19 = arith.constant 0.000000e+00 : f32
    %29 = vector.broadcast %cst_19 : f32 to vector<16x512xf32>
    %30 = arith.maximumf %28, %29 : vector<16x512xf32>
    %31 = arith.truncf %30 : vector<16x512xf32> to vector<16x512xbf16>
    %c0_20 = arith.constant 0 : index
    %c0_21 = arith.constant 0 : index
    %32 = vector.load %arg9[%c0_20, %c0_21] : memref<512x784xbf16, #tpu.memory_space<vmem>>, vector<512x784xbf16>
    %cst_22 = arith.constant dense<0.000000e+00> : vector<16x784xf32>
    %33 = tpu.matmul %31, %32, %cst_22 {dimension_numbers = #tpu.dot_dimension_numbers<[1], [0], [0], [1], [0, 0, 1, 1], [], []>} : vector<16x512xbf16>, vector<512x784xbf16>, vector<16x784xf32> -> vector<16x784xf32>
    %c0_23 = arith.constant 0 : index
    %c0_24 = arith.constant 0 : index
    %34 = vector.load %arg10[%c0_23, %c0_24] : memref<1x784xf32, #tpu.memory_space<vmem>>, vector<1x784xf32>
    %35 = vector.broadcast %34 : vector<1x784xf32> to vector<16x784xf32>
    %36 = arith.addf %33, %35 : vector<16x784xf32>
    %37 = arith.negf %36 : vector<16x784xf32>
    %38 = math.exp %37 : vector<16x784xf32>
    %cst_25 = arith.constant 1.000000e+00 : f32
    %39 = vector.broadcast %cst_25 : f32 to vector<16x784xf32>
    %40 = arith.addf %39, %38 : vector<16x784xf32>
    %41 = arith.divf %39, %40 : vector<16x784xf32>
    %c0_26 = arith.constant 0 : index
    %c0_27 = arith.constant 0 : index
    %42 = vector.load %arg11[%c0_26, %c0_27] : memref<16x784xf32, #tpu.memory_space<vmem>>, vector<16x784xf32>
    tpu.vector_store %arg11[%c0_26, %c0_27], %41 {strides = array<i32>} : memref<16x784xf32, #tpu.memory_space<vmem>>, vector<16x784xf32>,
    %c0_28 = arith.constant 0 : index
    %c0_29 = arith.constant 0 : index
    %43 = vector.load %arg12[%c0_28, %c0_29] : memref<16x256xf32, #tpu.memory_space<vmem>>, vector<16x256xf32>
    tpu.vector_store %arg12[%c0_28, %c0_29], %14 {strides = array<i32>} : memref<16x256xf32, #tpu.memory_space<vmem>>, vector<16x256xf32>,
    return
  }
  func.func @transform_0(%arg0: i32) -> (i32, i32) {
    %c0_i32 = arith.constant 0 : i32
    %c0_i32_0 = arith.constant 0 : i32
    return %arg0, %c0_i32 : i32, i32
  }
  func.func @transform_1(%arg0: i32) -> (i32, i32) {
    %c0_i32 = arith.constant 0 : i32
    %c0_i32_0 = arith.constant 0 : i32
    return %arg0, %c0_i32 : i32, i32
  }
  func.func @transform_2(%arg0: i32) -> (i32, i32) {
    %c0_i32 = arith.constant 0 : i32
    %c0_i32_0 = arith.constant 0 : i32
    %c0_i32_1 = arith.constant 0 : i32
    return %c0_i32, %c0_i32_0 : i32, i32
  }
  func.func @transform_3(%arg0: i32) -> (i32, i32) {
    %c0_i32 = arith.constant 0 : i32
    %c0_i32_0 = arith.constant 0 : i32
    %c0_i32_1 = arith.constant 0 : i32
    return %c0_i32, %c0_i32_0 : i32, i32
  }
  func.func @transform_4(%arg0: i32) -> (i32, i32) {
    %c0_i32 = arith.constant 0 : i32
    %c0_i32_0 = arith.constant 0 : i32
    %c0_i32_1 = arith.constant 0 : i32
    return %c0_i32, %c0_i32_0 : i32, i32
  }
  func.func @transform_5(%arg0: i32) -> (i32, i32) {
    %c0_i32 = arith.constant 0 : i32
    %c0_i32_0 = arith.constant 0 : i32
    %c0_i32_1 = arith.constant 0 : i32
    return %c0_i32, %c0_i32_0 : i32, i32
  }
  func.func @transform_6(%arg0: i32) -> (i32, i32) {
    %c0_i32 = arith.constant 0 : i32
    %c0_i32_0 = arith.constant 0 : i32
    %c0_i32_1 = arith.constant 0 : i32
    return %c0_i32, %c0_i32_0 : i32, i32
  }
  func.func @transform_7(%arg0: i32) -> (i32, i32) {
    %c0_i32 = arith.constant 0 : i32
    %c0_i32_0 = arith.constant 0 : i32
    %c0_i32_1 = arith.constant 0 : i32
    return %c0_i32, %c0_i32_0 : i32, i32
  }
  func.func @transform_8(%arg0: i32) -> (i32, i32) {
    %c0_i32 = arith.constant 0 : i32
    %c0_i32_0 = arith.constant 0 : i32
    %c0_i32_1 = arith.constant 0 : i32
    return %c0_i32, %c0_i32_0 : i32, i32
  }
  func.func @transform_9(%arg0: i32) -> (i32, i32) {
    %c0_i32 = arith.constant 0 : i32
    %c0_i32_0 = arith.constant 0 : i32
    %c0_i32_1 = arith.constant 0 : i32
    return %c0_i32, %c0_i32_0 : i32, i32
  }
  func.func @transform_10(%arg0: i32) -> (i32, i32) {
    %c0_i32 = arith.constant 0 : i32
    %c0_i32_0 = arith.constant 0 : i32
    return %arg0, %c0_i32 : i32, i32
  }
  func.func @transform_11(%arg0: i32) -> (i32, i32) {
    %c0_i32 = arith.constant 0 : i32
    %c0_i32_0 = arith.constant 0 : i32
    return %arg0, %c0_i32 : i32, i32
  }
}

</mosaic_0001>

<bundles_post_ra>
// kernel: vae_forward.1
= control target key start
LH: loop header
LB: loop body
LE: loop exit
PB: predicated region body
PF: predicated region fallthrough
CT: control target
= control target key end

     0   :  { %vm1245_vm0 = vcmask 130048   ;;  %s10602_s2 = inlined_call_operand.vmem [shape: bf16[784,512], index: 2, kind: input, shape index: {}]   ;;  %s10603_s0 = inlined_call_operand.vmem [shape: f32[16,784], index: 0, kind: input, shape index: {}]   ;;  %s10604_s4 = inlined_call_operand.vmem [shape: bf16[512,256], index: 4, kind: input, shape index: {}]   ;;  %s10605_s3 = inlined_call_operand.vmem [shape: f32[1,512], index: 3, kind: input, shape index: {}]   ;;  %s10606_s6 = inlined_call_operand.vmem [shape: bf16[128,512], index: 6, kind: input, shape index: {}]   ;;  %s10607_s5 = inlined_call_operand.vmem [shape: f32[1,256], index: 5, kind: input, shape index: {}]   ;;  %s10608_s11 = inlined_call_operand.vmem [shape: f32[16,256], index: 11, kind: output, shape index: {1}]   ;;  %s10609_s8 = inlined_call_operand.vmem [shape: bf16[512,784], index: 8, kind: input, shape index: {}]   ;;  %s10610_s1 = inlined_call_operand.vmem [shape: f32[16,128], index: 1, kind: input, shape index: {}]   ;;  %s10611_s7 = inlined_call_operand.vmem [shape: f32[1,512], index: 7, kind: input, shape index: {}]   ;;  %s10612_s9 = inlined_call_operand.vmem [shape: f32[1,784], index: 9, kind: input, shape index: {}]   ;;  %s10613_s10 = inlined_call_operand.vmem [shape: f32[16,784], index: 10, kind: output, shape index: {0}]  }
   0x1   :  { %v4660_v0 = vld [vmem:[%s10602_s2 + $0xe0] sm:$0xf]  ;;  %v6658_v1 = vld [vmem:[%s10602_s2 + $0xec] sm:$0xf0] }
   0x2   :  { %v4788_v2 = vld [vmem:[%s10602_s2 + $0x1e0] sm:$0xf]  ;;  %v4661_v3 = vor.u32 %v6658_v1, %v4660_v0  ;;  %v6690_v4 = vld [vmem:[%s10602_s2 + $0x1ec] sm:$0xf0] }
   0x3   :  { %v4916_v5 = vld [vmem:[%s10602_s2 + $0x2e0] sm:$0xf]  ;;  %v6722_v6 = vld [vmem:[%s10602_s2 + $0x2ec] sm:$0xf0]  ;;  %v4789_v7 = vor.u32 %v6690_v4, %v4788_v2 }
   0x4   :  { %v4917_v8 = vor.u32 %v6722_v6, %v4916_v5  ;;  %v5044_v9 = vld [vmem:[%s10602_s2 + $0x3e0] sm:$0xf]  ;;  %v6754_v10 = vld [vmem:[%s10602_s2 + $0x3ec] sm:$0xf0]  ;;  %1249 = vmatpush.bf16.msra.mxu0 %v4661_v3 }
   0x5   :  { %v4644_v11 = vld [vmem:[%s10602_s2 + $0xc0] sm:$0xf]  ;;  %v5045_v12 = vor.u32 %v6754_v10, %v5044_v9  ;;  %v6654_v13 = vld [vmem:[%s10602_s2 + $0xcc] sm:$0xf0]  ;;  %1263 = vmatpush.bf16.msra.mxu1 %v4789_v7 }
   0x6   :  { %v4772_v14 = vld [vmem:[%s10602_s2 + $0x1c0] sm:$0xf]  ;;  %v6686_v15 = vld [vmem:[%s10602_s2 + $0x1cc] sm:$0xf0]  ;;  %1277 = vmatpush.bf16.msra.mxu2 %v4917_v8  ;;  %v4645_v16 = vor.u32 %v6654_v13, %v4644_v11 }
   0x7   :  { %v4773_v17 = vor.u32 %v6686_v15, %v4772_v14  ;;  %v4900_v18 = vld [vmem:[%s10602_s2 + $0x2c0] sm:$0xf]  ;;  %v6718_v19 = vld [vmem:[%s10602_s2 + $0x2cc] sm:$0xf0]  ;;  %1291 = vmatpush.bf16.msra.mxu3 %v5045_v12 }
   0x8   :  { %v5028_v20 = vld [vmem:[%s10602_s2 + $0x3c0] sm:$0xf]  ;;  %v4901_v21 = vor.u32 %v6718_v19, %v4900_v18  ;;  %v6750_v22 = vld [vmem:[%s10602_s2 + $0x3cc] sm:$0xf0]  ;;  %1250 = vmatpush.bf16.msra.mxu0 %v4645_v16 }
   0x9   :  { %v4628_v23 = vld [vmem:[%s10602_s2 + $0xa0] sm:$0xf]  ;;  %v6650_v24 = vld [vmem:[%s10602_s2 + $0xac] sm:$0xf0]  ;;  %v5029_v25 = vor.u32 %v6750_v22, %v5028_v20  ;;  %1264 = vmatpush.bf16.msra.mxu1 %v4773_v17 }
   0xa   :  { %v4756_v26 = vld [vmem:[%s10602_s2 + $0x1a0] sm:$0xf]  ;;  %v6682_v27 = vld [vmem:[%s10602_s2 + $0x1ac] sm:$0xf0]  ;;  %v4629_v29 = vor.u32 %v6650_v24, %v4628_v23  ;;  %1278 = vmatpush.bf16.msra.mxu2 %v4901_v21 }
   0xb   :  { %v4884_v28 = vld [vmem:[%s10602_s2 + $0x2a0] sm:$0xf]  ;;  %v6714_v30 = vld [vmem:[%s10602_s2 + $0x2ac] sm:$0xf0]  ;;  %v4757_v33 = vor.u32 %v6682_v27, %v4756_v26  ;;  %1292 = vmatpush.bf16.msra.mxu3 %v5029_v25 }
   0xc   :  { %v5012_v31 = vld [vmem:[%s10602_s2 + $0x3a0] sm:$0xf]  ;;  %v6746_v32 = vld [vmem:[%s10602_s2 + $0x3ac] sm:$0xf0]  ;;  %v4885_v34 = vor.u32 %v6714_v30, %v4884_v28  ;;  %1251 = vmatpush.bf16.msra.mxu0 %v4629_v29 }
   0xd   :  { %v4612_v35 = vld [vmem:[%s10602_s2 + $0x80] sm:$0xf]  ;;  %v6646_v36 = vld [vmem:[%s10602_s2 + $0x8c] sm:$0xf0]  ;;  %v5013_v38 = vor.u32 %v6746_v32, %v5012_v31  ;;  %1265 = vmatpush.bf16.msra.mxu1 %v4757_v33  ;;  %v6656_v32 = vld [vmem:[%s10602_s2 + $0xe4] sm:$0xf] }
   0xe   :  { %v4740_v37 = vld [vmem:[%s10602_s2 + $0x180] sm:$0xf]  ;;  %v6678_v39 = vld [vmem:[%s10602_s2 + $0x18c] sm:$0xf0]  ;;  %v4613_v44 = vor.u32 %v6646_v36, %v4612_v35  ;;  %1279 = vmatpush.bf16.msra.mxu2 %v4885_v34  ;;  %v4662_v33 = vld [vmem:[%s10602_s2 + $0xf0] sm:$0xf0] }
   0xf   :  { %v4868_v40 = vld [vmem:[%s10602_s2 + $0x280] sm:$0xf]  ;;  %v6710_v41 = vld [vmem:[%s10602_s2 + $0x28c] sm:$0xf0]  ;;  %v4741_v45 = vor.u32 %v6678_v39, %v4740_v37  ;;  %1293 = vmatpush.bf16.msra.mxu3 %v5013_v38  ;;  %v47_v36 = vld [vmem:[%s10603_s0 + $0x48] sm:$0xff] }
  0x10   :  { %v4996_v42 = vld [vmem:[%s10602_s2 + $0x380] sm:$0xf]  ;;  %v6742_v43 = vld [vmem:[%s10602_s2 + $0x38c] sm:$0xf0]  ;;  %v4869_v46 = vor.u32 %v6710_v41, %v4868_v40  ;;  %1252 = vmatpush.bf16.msra.mxu0 %v4613_v44  ;;  %v6688_v41 = vld [vmem:[%s10602_s2 + $0x1e4] sm:$0xf] }
  0x11   :  { %v4596_v47 = vld [vmem:[%s10602_s2 + $0x60] sm:$0xf]  ;;  %v6642_v48 = vld [vmem:[%s10602_s2 + $0x6c] sm:$0xf0]  ;;  %v4997_v50 = vor.u32 %v6742_v43, %v4996_v42  ;;  %1266 = vmatpush.bf16.msra.mxu1 %v4741_v45  ;;  %v45_v43 = vld [vmem:[%s10603_s0 + $0x38] sm:$0xff] }
  0x12   :  { %v4724_v49 = vld [vmem:[%s10602_s2 + $0x160] sm:$0xf]  ;;  %v6674_v51 = vld [vmem:[%s10602_s2 + $0x16c] sm:$0xf0]  ;;  %v4597_v56 = vor.u32 %v6642_v48, %v4596_v47  ;;  %1280 = vmatpush.bf16.msra.mxu2 %v4869_v46  ;;  %v4790_v46 = vld [vmem:[%s10602_s2 + $0x1f0] sm:$0xf0] }
  0x13   :  { %v4852_v52 = vld [vmem:[%s10602_s2 + $0x260] sm:$0xf]  ;;  %v6706_v53 = vld [vmem:[%s10602_s2 + $0x26c] sm:$0xf0]  ;;  %v4725_v57 = vor.u32 %v6674_v51, %v4724_v49  ;;  %1294 = vmatpush.bf16.msra.mxu3 %v4997_v50  ;;  %v41_v47 = vld [vmem:[%s10603_s0 + $0x18] sm:$0xff]  ;;  %v4665_v50 = vor.u32 %v6656_v32, %v4662_v33 }
  0x14   :  { %v4980_v54 = vld [vmem:[%s10602_s2 + $0x360] sm:$0xf]  ;;  %v6738_v55 = vld [vmem:[%s10602_s2 + $0x36c] sm:$0xf0]  ;;  %v4853_v58 = vor.u32 %v6706_v53, %v4852_v52  ;;  %1253 = vmatpush.bf16.msra.mxu0 %v4597_v56 }
  0x15   :  { %v4580_v59 = vld [vmem:[%s10602_s2 + $0x40] sm:$0xf]  ;;  %v6638_v60 = vld [vmem:[%s10602_s2 + $0x4c] sm:$0xf0]  ;;  %v4981_v62 = vor.u32 %v6738_v55, %v4980_v54  ;;  %1267 = vmatpush.bf16.msra.mxu1 %v4725_v57  ;;  %v6652_v57 = vld [vmem:[%s10602_s2 + $0xc4] sm:$0xf] }
  0x16   :  { %v4708_v61 = vld [vmem:[%s10602_s2 + $0x140] sm:$0xf]  ;;  %v6670_v63 = vld [vmem:[%s10602_s2 + $0x14c] sm:$0xf0]  ;;  %v4581_v4 = vor.u32 %v6638_v60, %v4580_v59  ;;  %1281 = vmatpush.bf16.msra.mxu2 %v4853_v58  ;;  %v4646_v58 = vld [vmem:[%s10602_s2 + $0xd0] sm:$0xf0] }
  0x17   :  { %v4836_v0 = vld [vmem:[%s10602_s2 + $0x240] sm:$0xf]  ;;  %v6702_v1 = vld [vmem:[%s10602_s2 + $0x24c] sm:$0xf0]  ;;  %v4709_v6 = vor.u32 %v6670_v63, %v4708_v61  ;;  %1295 = vmatpush.bf16.msra.mxu3 %v4981_v62  ;;  %v39_v61 = vld [vmem:[%s10603_s0 + $0x8] sm:$0xff]  ;;  %v4793_v63 = vor.u32 %v6688_v41, %v4790_v46 }
  0x18   :  { %v4964_v2 = vld [vmem:[%s10602_s2 + $0x340] sm:$0xf]  ;;  %v6734_v3 = vld [vmem:[%s10602_s2 + $0x34c] sm:$0xf0]  ;;  %v4837_v7 = vor.u32 %v6702_v1, %v4836_v0  ;;  %1254 = vmatpush.bf16.msra.mxu0 %v4581_v4  ;;  %v6684_v1 = vld [vmem:[%s10602_s2 + $0x1c4] sm:$0xf]  ;;  %v4649_v4 = vor.u32 %v6652_v57, %v4646_v58 }
  0x19   :  { %v4564_v5 = vld [vmem:[%s10602_s2 + $0x20] sm:$0xf]  ;;  %v6634_v8 = vld [vmem:[%s10602_s2 + $0x2c] sm:$0xf0]  ;;  %v4965_v11 = vor.u32 %v6734_v3, %v4964_v2  ;;  %1268 = vmatpush.bf16.msra.mxu1 %v4709_v6  ;;  %v4774_v2 = vld [vmem:[%s10602_s2 + $0x1d0] sm:$0xf0] }
  0x1a   :  { %v4692_v9 = vld [vmem:[%s10602_s2 + $0x120] sm:$0xf]  ;;  %v6666_v10 = vld [vmem:[%s10602_s2 + $0x12c] sm:$0xf0]  ;;  %v4565_v18 = vor.u32 %v6634_v8, %v4564_v5  ;;  %1282 = vmatpush.bf16.msra.mxu2 %v4837_v7  ;;  %v4726_v41 = vld [vmem:[%s10602_s2 + $0x170] sm:$0xf0] }
  0x1b   :  { %v4820_v12 = vld [vmem:[%s10602_s2 + $0x220] sm:$0xf]  ;;  %v6698_v13 = vld [vmem:[%s10602_s2 + $0x22c] sm:$0xf0]  ;;  %v4693_v23 = vor.u32 %v6666_v10, %v4692_v9  ;;  %1296 = vmatpush.bf16.msra.mxu3 %v4965_v11  ;;  %v6648_v10 = vld [vmem:[%s10602_s2 + $0xa4] sm:$0xf] }
  0x1c   :  { %v4948_v14 = vld [vmem:[%s10602_s2 + $0x320] sm:$0xf]  ;;  %v6730_v15 = vld [vmem:[%s10602_s2 + $0x32c] sm:$0xf0]  ;;  %v4821_v24 = vor.u32 %v6698_v13, %v4820_v12  ;;  %1255 = vmatpush.bf16.msra.mxu0 %v4565_v18  ;;  %v4630_v11 = vld [vmem:[%s10602_s2 + $0xb0] sm:$0xf0]  ;;  %v4777_v12 = vor.u32 %v6684_v1, %v4774_v2 }
  0x1d   :  { %v4548_v16 = vld [vmem:[%s10602_s2] sm:$0xf]  ;;  %v6630_v17 = vld [vmem:[%s10602_s2 + $0xc] sm:$0xf0]  ;;  %v4949_v28 = vor.u32 %v6730_v15, %v4948_v14  ;;  %1269 = vmatpush.bf16.msra.mxu1 %v4693_v23  ;;  %v6680_v14 = vld [vmem:[%s10602_s2 + $0x1a4] sm:$0xf] }
  0x1e   :  { %v4676_v19 = vld [vmem:[%s10602_s2 + $0x100] sm:$0xf]  ;;  %v6662_v20 = vld [vmem:[%s10602_s2 + $0x10c] sm:$0xf0]  ;;  %v4549_v35 = vor.u32 %v6630_v17, %v4548_v16  ;;  %1283 = vmatpush.bf16.msra.mxu2 %v4821_v24  ;;  %v4758_v15 = vld [vmem:[%s10602_s2 + $0x1b0] sm:$0xf0]  ;;  %v4633_v17 = vor.u32 %v6648_v10, %v4630_v11 }
  0x1f   :  { %v4804_v21 = vld [vmem:[%s10602_s2 + $0x200] sm:$0xf]  ;;  %v6694_v22 = vld [vmem:[%s10602_s2 + $0x20c] sm:$0xf0]  ;;  %v4677_v39 = vor.u32 %v6662_v20, %v4676_v19  ;;  %1297 = vmatpush.bf16.msra.mxu3 %v4949_v28  ;;  %v4614_v23 = vld [vmem:[%s10602_s2 + $0x90] sm:$0xf0]  ;;  %v4761_v24 = vor.u32 %v6680_v14, %v4758_v15 }
  0x20   :  { %v4932_v25 = vld [vmem:[%s10602_s2 + $0x300] sm:$0xf]  ;;  %v6726_v26 = vld [vmem:[%s10602_s2 + $0x30c] sm:$0xf0]  ;;  %v4805_v40 = vor.u32 %v6694_v22, %v4804_v21  ;;  %1256 = vmatpush.bf16.msra.mxu0 %v4549_v35  ;;  %v6644_v22 = vld [vmem:[%s10602_s2 + $0x84] sm:$0xf] }
  0x21   :  { %v5172_v27 = vld [vmem:[%s10602_s2 + $0x4e0] sm:$0xf]  ;;  %v6786_v29 = vld [vmem:[%s10602_s2 + $0x4ec] sm:$0xf0]  ;;  %v4933_v44 = vor.u32 %v6726_v26, %v4932_v25  ;;  %1270 = vmatpush.bf16.msra.mxu1 %v4677_v39  ;;  %v6676_v26 = vld [vmem:[%s10602_s2 + $0x184] sm:$0xf] }
  0x22   :  { %v5300_v30 = vld [vmem:[%s10602_s2 + $0x5e0] sm:$0xf]  ;;  %v6818_v31 = vld [vmem:[%s10602_s2 + $0x5ec] sm:$0xf0]  ;;  %v5173_v45 = vor.u32 %v6786_v29, %v5172_v27  ;;  %1284 = vmatpush.bf16.msra.mxu2 %v4805_v40  ;;  %v4742_v27 = vld [vmem:[%s10602_s2 + $0x190] sm:$0xf0]  ;;  %v4617_v29 = vor.u32 %v6644_v22, %v4614_v23 }
  0x23   :  { %v40_v34 = vld [vmem:[%s10603_s0 + $0x10] sm:$0xff]  ;;  %v5316_v37 = vld [vmem:[%s10602_s2 + $0x600] sm:$0xf]  ;;  %v5301_v49 = vor.u32 %v6818_v31, %v5300_v30  ;;  %1298 = vmatpush.bf16.msra.mxu3 %v4933_v44  ;;  %v6672_v40 = vld [vmem:[%s10602_s2 + $0x164] sm:$0xf] }
  0x24   :  { %v6822_v38 = vld [vmem:[%s10602_s2 + $0x60c] sm:$0xf0]  ;;  %v38_v42 = vld [vmem:[%s10603_s0] sm:$0xff]  ;;  %v7513_v54 = vpack.c.bf16 %v47_v36, %v40_v34  ;;  %1305 = vmatpush.bf16.msrb.mxu0 %v5173_v45  ;;  %v4598_v35 = vld [vmem:[%s10602_s2 + $0x70] sm:$0xf0] }
  0x25   :  { %v48_v48 = vld [vmem:[%s10603_s0 + $0x50] sm:$0xff]  ;;  %v5156_v51 = vld [vmem:[%s10602_s2 + $0x4c0] sm:$0xf]  ;;  %v7515_v55 = vpack.c.bf16 %v45_v43, %v38_v42  ;;  %v5317_v59 = vor.u32 %v6822_v38, %v5316_v37  ;;  %1319 = vmatpush.bf16.msrb.mxu1 %v5301_v49  ;;  %v6640_v34 = vld [vmem:[%s10602_s2 + $0x64] sm:$0xf]  ;;  %v4745_v38 = vor.u32 %v6676_v26, %v4742_v27 }
  0x26   :  { %v6782_v52 = vld [vmem:[%s10602_s2 + $0x4cc] sm:$0xf0]  ;;  %v5284_v53 = vld [vmem:[%s10602_s2 + $0x5c0] sm:$0xf]  ;;  %v7526_v60 = vpack.c.bf16 %v48_v48, %v41_v47  ;;  %1285 = vmatmul.bf16.vlgmr.msra.gmra.mxu2 %v7513_v54  ;;  %v51_v37 = vld [vmem:[%s10603_s0 + $0x68] sm:$0xff]  ;;  %v4601_v43 = vor.u32 %v6640_v34, %v4598_v35 }
  0x27   :  { %v6814_v56 = vld [vmem:[%s10602_s2 + $0x5cc] sm:$0xf0]  ;;  %v46_v62 = vld [vmem:[%s10603_s0 + $0x40] sm:$0xff]  ;;  %v5157_v0 = vor.u32 %v6782_v52, %v5156_v51  ;;  %1347 = vmatpush.bf16.msrb.mxu3 %v4665_v50  ;;  %1257 = vmatmul.bf16.vlgmr.msra.gmra.mxu0 %v7515_v55  ;;  %v4582_v49 = vld [vmem:[%s10602_s2 + $0x50] sm:$0xf0]  ;;  %v4729_v51 = vor.u32 %v6672_v40, %v4726_v41 }
  0x28   :  { %v5285_v3 = vor.u32 %v6814_v56, %v5284_v53  ;;  %v5140_v5 = vld [vmem:[%s10602_s2 + $0x4a0] sm:$0xf]  ;;  %v6778_v6 = vld [vmem:[%s10602_s2 + $0x4ac] sm:$0xf0]  ;;  %v7551_v8 = vpack.c.bf16 %v46_v62, %v39_v61  ;;  %1340 = vmatpush.bf16.msrb.mxu2 %v5317_v59  ;;  %1299 = vmatmul.bf16.vlgmr.msra.gmra.mxu3 %v7526_v60  ;;  %v6636_v48 = vld [vmem:[%s10602_s2 + $0x44] sm:$0xf] }
  0x29   :  { %v5268_v7 = vld [vmem:[%s10602_s2 + $0x5a0] sm:$0xf]  ;;  %v6810_v9 = vld [vmem:[%s10602_s2 + $0x5ac] sm:$0xf0]  ;;  %1306 = vmatpush.bf16.msrb.mxu0 %v5157_v0  ;;  %v5141_v13 = vor.u32 %v6778_v6, %v5140_v5  ;;  %v6668_v53 = vld [vmem:[%s10602_s2 + $0x144] sm:$0xf]  ;;  %v4585_v58 = vor.u32 %v6636_v48, %v4582_v49 }
  0x2a   :  { %1320 = vmatpush.bf16.msrb.mxu1 %v5285_v3  ;;  %v5269_v16 = vor.u32 %v6810_v9, %v5268_v7  ;;  %v5124_v18 = vld [vmem:[%s10602_s2 + $0x480] sm:$0xf]  ;;  %v6774_v19 = vld [vmem:[%s10602_s2 + $0x48c] sm:$0xf0]  ;;  %v4710_v56 = vld [vmem:[%s10602_s2 + $0x150] sm:$0xf0] }
  0x2b   :  { %1348 = vmatpush.bf16.msrb.mxu3 %v4649_v4  ;;  %v5252_v20 = vld [vmem:[%s10602_s2 + $0x580] sm:$0xf]  ;;  %1271 = vmatmul.bf16.vlgmr.msra.gmra.mxu1 %v7551_v8  ;;  %v6806_v21 = vld [vmem:[%s10602_s2 + $0x58c] sm:$0xf0]  ;;  %v5125_v25 = vor.u32 %v6774_v19, %v5124_v18  ;;  %v6632_v0 = vld [vmem:[%s10602_s2 + $0x24] sm:$0xf]  ;;  %v4713_v4 = vor.u32 %v6668_v53, %v4710_v56 }
  0x2c   :  { %1361 = vmatpush.bf16.msra.mxu2 %v4793_v63  ;;  %v5253_v28 = vor.u32 %v6806_v21, %v5252_v20  ;;  %v5108_v30 = vld [vmem:[%s10602_s2 + $0x460] sm:$0xf]  ;;  %v6770_v31 = vld [vmem:[%s10602_s2 + $0x46c] sm:$0xf0]  ;;  %v4566_v1 = vld [vmem:[%s10602_s2 + $0x30] sm:$0xf0] }
  0x2d   :  { %1307 = vmatpush.bf16.msrb.mxu0 %v5141_v13  ;;  %v5236_v32 = vld [vmem:[%s10602_s2 + $0x560] sm:$0xf]  ;;  %v6802_v33 = vld [vmem:[%s10602_s2 + $0x56c] sm:$0xf0]  ;;  %v5109_v39 = vor.u32 %v6770_v31, %v5108_v30  ;;  %v6664_v2 = vld [vmem:[%s10602_s2 + $0x124] sm:$0xf]  ;;  %v4569_v11 = vor.u32 %v6632_v0, %v4566_v1 }
  0x2e   :  { %1321 = vmatpush.bf16.msrb.mxu1 %v5269_v16  ;;  %v44_v36 = vld [vmem:[%s10603_s0 + $0x30] sm:$0xff]  ;;  %v5237_v42 = vor.u32 %v6802_v33, %v5236_v32  ;;  %v5092_v44 = vld [vmem:[%s10602_s2 + $0x440] sm:$0xf]  ;;  %v6628_v13 = vld [vmem:[%s10602_s2 + $0x4] sm:$0xf] }
  0x2f   :  { %1349 = vmatpush.bf16.msrb.mxu3 %v4633_v17  ;;  %v6766_v45 = vld [vmem:[%s10602_s2 + $0x44c] sm:$0xf0]  ;;  %v5220_v46 = vld [vmem:[%s10602_s2 + $0x540] sm:$0xf]  ;;  %v7642_v50 = vpack.c.bf16 %v51_v37, %v44_v36  ;;  %v4694_v3 = vld [vmem:[%s10602_s2 + $0x130] sm:$0xf0] }
  0x30   :  { %1362 = vmatpush.bf16.msra.mxu2 %v4777_v12  ;;  %v6798_v47 = vld [vmem:[%s10602_s2 + $0x54c] sm:$0xf0]  ;;  %v5093_v52 = vor.u32 %v6766_v45, %v5092_v44  ;;  %v5076_v59 = vld [vmem:[%s10602_s2 + $0x420] sm:$0xf]  ;;  %v4550_v14 = vld [vmem:[%s10602_s2 + $0x10] sm:$0xf0]  ;;  %v4697_v21 = vor.u32 %v6664_v2, %v4694_v3 }
  0x31   :  { %1308 = vmatpush.bf16.msrb.mxu0 %v5125_v25  ;;  %v5221_v57 = vor.u32 %v6798_v47, %v5220_v46  ;;  %v6762_v61 = vld [vmem:[%s10602_s2 + $0x42c] sm:$0xf0]  ;;  %v5204_v62 = vld [vmem:[%s10602_s2 + $0x520] sm:$0xf]  ;;  %v6720_v15 = vld [vmem:[%s10602_s2 + $0x2e4] sm:$0xf]  ;;  %v4553_v27 = vor.u32 %v6628_v13, %v4550_v14 }
  0x32   :  { %1322 = vmatpush.bf16.msrb.mxu1 %v5253_v28  ;;  %v6794_v63 = vld [vmem:[%s10602_s2 + $0x52c] sm:$0xf0]  ;;  %v5077_v5 = vor.u32 %v6762_v61, %v5076_v59  ;;  %v5060_v6 = vld [vmem:[%s10602_s2 + $0x400] sm:$0xf]  ;;  %v4918_v16 = vld [vmem:[%s10602_s2 + $0x2f0] sm:$0xf0] }
  0x33   :  { %1350 = vmatpush.bf16.msrb.mxu3 %v4617_v29  ;;  %v6758_v7 = vld [vmem:[%s10602_s2 + $0x40c] sm:$0xf0]  ;;  %v5188_v9 = vld [vmem:[%s10602_s2 + $0x500] sm:$0xf]  ;;  %v5205_v10 = vor.u32 %v6794_v63, %v5204_v62  ;;  %v6752_v17 = vld [vmem:[%s10602_s2 + $0x3e4] sm:$0xf]  ;;  %v4921_v31 = vor.u32 %v6720_v15, %v4918_v16 }
  0x34   :  { %1363 = vmatpush.bf16.msra.mxu2 %v4761_v24  ;;  %v6790_v12 = vld [vmem:[%s10602_s2 + $0x50c] sm:$0xf0]  ;;  %v5046_v18 = vld [vmem:[%s10602_s2 + $0x3f0] sm:$0xf0]  ;;  %v6784_v19 = vld [vmem:[%s10602_s2 + $0x4e4] sm:$0xf]  ;;  %v5061_v22 = vor.u32 %v6758_v7, %v5060_v6 }
  0x35   :  { %1309 = vmatpush.bf16.msrb.mxu0 %v5109_v39  ;;  %v5174_v20 = vld [vmem:[%s10602_s2 + $0x4f0] sm:$0xf0]  ;;  %v42_v23 = vld [vmem:[%s10603_s0 + $0x20] sm:$0xff]  ;;  %v49_v24 = vld [vmem:[%s10603_s0 + $0x58] sm:$0xff]  ;;  %v5189_v26 = vor.u32 %v6790_v12, %v5188_v9  ;;  %v5049_v32 = vor.u32 %v6752_v17, %v5046_v18 }
  0x36   :  { %1323 = vmatpush.bf16.msrb.mxu1 %v5237_v42  ;;  %5330 = vmatmul.msk.bf16.vlgmr.msrb.gmra.mxu2 %vm1245_vm0, %v7642_v50  ;;  %v6660_v25 = vld [vmem:[%s10602_s2 + $0x104] sm:$0xf]  ;;  %v4678_v28 = vld [vmem:[%s10602_s2 + $0x110] sm:$0xf0]  ;;  %v43_v29 = vld [vmem:[%s10603_s0 + $0x28] sm:$0xff]  ;;  %v5177_v36 = vor.u32 %v6784_v19, %v5174_v20  ;;  %v7739_v37 = vpack.c.bf16 %v49_v24, %v42_v23 }
  0x37   :  { %1351 = vmatpush.bf16.msrb.mxu3 %v4601_v43  ;;  %v50_v30 = vld [vmem:[%s10603_s0 + $0x60] sm:$0xff]  ;;  %v5302_v34 = vld [vmem:[%s10602_s2 + $0x5f0] sm:$0xf0]  ;;  %v4681_v41 = vor.u32 %v6660_v25, %v4678_v28 }
  0x38   :  { %1364 = vmatpush.bf16.msra.mxu2 %v4745_v38  ;;  %v6816_v33 = vld [vmem:[%s10602_s2 + $0x5e4] sm:$0xf]  ;;  %v4902_v38 = vld [vmem:[%s10602_s2 + $0x2d0] sm:$0xf0]  ;;  %v7750_v42 = vpack.c.bf16 %v50_v30, %v43_v29 }
  0x39   :  { %1310 = vmatpush.bf16.msrb.mxu0 %v5093_v52  ;;  %v6716_v35 = vld [vmem:[%s10602_s2 + $0x2c4] sm:$0xf]  ;;  %v5030_v40 = vld [vmem:[%s10602_s2 + $0x3d0] sm:$0xf0]  ;;  %v5305_v45 = vor.u32 %v6816_v33, %v5302_v34 }
  0x3a   :  { %1324 = vmatpush.bf16.msrb.mxu1 %v5221_v57  ;;  %v6748_v39 = vld [vmem:[%s10602_s2 + $0x3c4] sm:$0xf]  ;;  %v5158_v44 = vld [vmem:[%s10602_s2 + $0x4d0] sm:$0xf0]  ;;  %v4905_v46 = vor.u32 %v6716_v35, %v4902_v38 }
  0x3b   :  { %1352 = vmatpush.bf16.msrb.mxu3 %v4585_v58  ;;  %v6780_v43 = vld [vmem:[%s10602_s2 + $0x4c4] sm:$0xf]  ;;  %v5033_v47 = vor.u32 %v6748_v39, %v5030_v40  ;;  %v5286_v49 = vld [vmem:[%s10602_s2 + $0x5d0] sm:$0xf0] }
  0x3c   :  { %1365 = vmatpush.bf16.msra.mxu2 %v4729_v51  ;;  %v6812_v48 = vld [vmem:[%s10602_s2 + $0x5c4] sm:$0xf]  ;;  %v5161_v52 = vor.u32 %v6780_v43, %v5158_v44  ;;  %v4886_v53 = vld [vmem:[%s10602_s2 + $0x2b0] sm:$0xf0] }
  0x3d   :  { %1311 = vmatpush.bf16.msrb.mxu0 %v5077_v5  ;;  %v6712_v51 = vld [vmem:[%s10602_s2 + $0x2a4] sm:$0xf]  ;;  %v5014_v57 = vld [vmem:[%s10602_s2 + $0x3b0] sm:$0xf0]  ;;  %v5289_v61 = vor.u32 %v6812_v48, %v5286_v49 }
  0x3e   :  { %1325 = vmatpush.bf16.msrb.mxu1 %v5205_v10  ;;  %v6744_v56 = vld [vmem:[%s10602_s2 + $0x3a4] sm:$0xf]  ;;  %v5142_v59 = vld [vmem:[%s10602_s2 + $0x4b0] sm:$0xf0]  ;;  %v4889_v62 = vor.u32 %v6712_v51, %v4886_v53 }
  0x3f   :  { %1353 = vmatpush.bf16.msrb.mxu3 %v4569_v11  ;;  %v6776_v58 = vld [vmem:[%s10602_s2 + $0x4a4] sm:$0xf]  ;;  %v5017_v63 = vor.u32 %v6744_v56, %v5014_v57  ;;  %v5270_v1 = vld [vmem:[%s10602_s2 + $0x5b0] sm:$0xf0] }
  0x40   :  { %1366 = vmatpush.bf16.msra.mxu2 %v4713_v4  ;;  %v6808_v0 = vld [vmem:[%s10602_s2 + $0x5a4] sm:$0xf]  ;;  %v5145_v3 = vor.u32 %v6776_v58, %v5142_v59  ;;  %v4870_v4 = vld [vmem:[%s10602_s2 + $0x290] sm:$0xf0] }
  0x41   :  { %1312 = vmatpush.bf16.msrb.mxu0 %v5061_v22  ;;  %v6708_v2 = vld [vmem:[%s10602_s2 + $0x284] sm:$0xf]  ;;  %v4998_v6 = vld [vmem:[%s10602_s2 + $0x390] sm:$0xf0]  ;;  %v5273_v10 = vor.u32 %v6808_v0, %v5270_v1  ;;  %v4668_v0 = vld [vmem:[%s10602_s2 + $0xe8] sm:$0xf] }
  0x42   :  { %1326 = vmatpush.bf16.msrb.mxu1 %v5189_v26  ;;  %v6740_v5 = vld [vmem:[%s10602_s2 + $0x384] sm:$0xf]  ;;  %v5126_v9 = vld [vmem:[%s10602_s2 + $0x490] sm:$0xf0]  ;;  %v4873_v11 = vor.u32 %v6708_v2, %v4870_v4  ;;  %v6659_v1 = vld [vmem:[%s10602_s2 + $0xf4] sm:$0xf0] }
  0x43   :  { %1354 = vmatpush.bf16.msrb.mxu3 %v4553_v27  ;;  %v6772_v7 = vld [vmem:[%s10602_s2 + $0x484] sm:$0xf]  ;;  %v5001_v12 = vor.u32 %v6740_v5, %v4998_v6  ;;  %v5254_v14 = vld [vmem:[%s10602_s2 + $0x590] sm:$0xf0]  ;;  %v4924_v5 = vld [vmem:[%s10602_s2 + $0x2e8] sm:$0xf] }
  0x44   :  { %1367 = vmatpush.bf16.msra.mxu2 %v4697_v21  ;;  %1313 = vmatmul.bf16.vlgmr.msrb.gmra.mxu0 %v7739_v37  ;;  %v6804_v13 = vld [vmem:[%s10602_s2 + $0x584] sm:$0xf]  ;;  %v5129_v16 = vor.u32 %v6772_v7, %v5126_v9  ;;  %v4854_v17 = vld [vmem:[%s10602_s2 + $0x270] sm:$0xf0]  ;;  %v6723_v6 = vld [vmem:[%s10602_s2 + $0x2f4] sm:$0xf0] }
  0x45   :  { %1375 = vmatpush.bf16.msra.mxu0 %v4921_v31  ;;  %1327 = vmatmul.bf16.vlgmr.msrb.gmra.mxu1 %v7750_v42  ;;  %v6704_v15 = vld [vmem:[%s10602_s2 + $0x264] sm:$0xf]  ;;  %v4982_v19 = vld [vmem:[%s10602_s2 + $0x370] sm:$0xf0]  ;;  %v5257_v22 = vor.u32 %v6804_v13, %v5254_v14  ;;  %v4669_v13 = vor.u32 %v6659_v1, %v4668_v0  ;;  %v5052_v14 = vld [vmem:[%s10602_s2 + $0x3e8] sm:$0xf] }
  0x46   :  { %1389 = vmatpush.bf16.msra.mxu1 %v5049_v32  ;;  %1355 = vmatmul.bf16.vlgmr.msrb.gmra.mxu3 %v7515_v55  ;;  %v6736_v18 = vld [vmem:[%s10602_s2 + $0x364] sm:$0xf]  ;;  %v5110_v21 = vld [vmem:[%s10602_s2 + $0x470] sm:$0xf0]  ;;  %v4857_v23 = vor.u32 %v6704_v15, %v4854_v17  ;;  %v6755_v15 = vld [vmem:[%s10602_s2 + $0x3f4] sm:$0xf0] }
  0x47   :  { %1403 = vmatpush.bf16.msra.mxu3 %v5177_v36  ;;  %v6768_v20 = vld [vmem:[%s10602_s2 + $0x464] sm:$0xf]  ;;  %v4985_v24 = vor.u32 %v6736_v18, %v4982_v19  ;;  %v5238_v26 = vld [vmem:[%s10602_s2 + $0x570] sm:$0xf0]  ;;  %v4796_v17 = vld [vmem:[%s10602_s2 + $0x1e8] sm:$0xf]  ;;  %v4925_v19 = vor.u32 %v6723_v6, %v4924_v5 }
  0x48   :  { %1368 = vmatpush.bf16.msra.mxu2 %v4681_v41  ;;  %v6800_v25 = vld [vmem:[%s10602_s2 + $0x564] sm:$0xf]  ;;  %v5113_v28 = vor.u32 %v6768_v20, %v5110_v21  ;;  %v4838_v29 = vld [vmem:[%s10602_s2 + $0x250] sm:$0xf0]  ;;  %v6691_v18 = vld [vmem:[%s10602_s2 + $0x1f4] sm:$0xf0] }
  0x49   :  { %1376 = vmatpush.bf16.msra.mxu0 %v4905_v46  ;;  %v6700_v27 = vld [vmem:[%s10602_s2 + $0x244] sm:$0xf]  ;;  %v4966_v31 = vld [vmem:[%s10602_s2 + $0x350] sm:$0xf0]  ;;  %v5241_v34 = vor.u32 %v6800_v25, %v5238_v26  ;;  %v4652_v21 = vld [vmem:[%s10602_s2 + $0xc8] sm:$0xf]  ;;  %v4797_v26 = vor.u32 %v6691_v18, %v4796_v17 }
  0x4a   :  { %1390 = vmatpush.bf16.msra.mxu1 %v5033_v47  ;;  %v6732_v30 = vld [vmem:[%s10602_s2 + $0x344] sm:$0xf]  ;;  %v5094_v33 = vld [vmem:[%s10602_s2 + $0x450] sm:$0xf0]  ;;  %v4841_v35 = vor.u32 %v6700_v27, %v4838_v29  ;;  %v6719_v25 = vld [vmem:[%s10602_s2 + $0x2d4] sm:$0xf0] }
  0x4b   :  { %1404 = vmatpush.bf16.msra.mxu3 %v5161_v52  ;;  %1369 = vmatmul.bf16.vlgmr.msra.gmra.mxu2 %v7551_v8  ;;  %v6764_v32 = vld [vmem:[%s10602_s2 + $0x444] sm:$0xf]  ;;  %v4969_v36 = vor.u32 %v6732_v30, %v4966_v31  ;;  %v5222_v39 = vld [vmem:[%s10602_s2 + $0x550] sm:$0xf0]  ;;  %v5036_v27 = vld [vmem:[%s10602_s2 + $0x3c8] sm:$0xf] }
  0x4c   :  { %1417 = vmatpush.bf16.msrb.mxu2 %v5305_v45  ;;  %v6796_v38 = vld [vmem:[%s10602_s2 + $0x544] sm:$0xf]  ;;  %v5097_v41 = vor.u32 %v6764_v32, %v5094_v33  ;;  %v4822_v43 = vld [vmem:[%s10602_s2 + $0x230] sm:$0xf0]  ;;  %v4780_v30 = vld [vmem:[%s10602_s2 + $0x1c8] sm:$0xf] }
  0x4d   :  { %1377 = vmatpush.bf16.msra.mxu0 %v4889_v62  ;;  %v6696_v40 = vld [vmem:[%s10602_s2 + $0x224] sm:$0xf]  ;;  %v4950_v45 = vld [vmem:[%s10602_s2 + $0x330] sm:$0xf0]  ;;  %v5225_v48 = vor.u32 %v6796_v38, %v5222_v39  ;;  %v6687_v31 = vld [vmem:[%s10602_s2 + $0x1d4] sm:$0xf0] }
  0x4e   :  { %1391 = vmatpush.bf16.msra.mxu1 %v5017_v63  ;;  %v6728_v44 = vld [vmem:[%s10602_s2 + $0x324] sm:$0xf]  ;;  %v5078_v47 = vld [vmem:[%s10602_s2 + $0x430] sm:$0xf0]  ;;  %v4825_v52 = vor.u32 %v6696_v40, %v4822_v43  ;;  %v4636_v33 = vld [vmem:[%s10602_s2 + $0xa8] sm:$0xf]  ;;  %v4781_v39 = vor.u32 %v6687_v31, %v4780_v30 }
  0x4f   :  { %1405 = vmatpush.bf16.msra.mxu3 %v5145_v3  ;;  %v6760_v46 = vld [vmem:[%s10602_s2 + $0x424] sm:$0xf]  ;;  %v5206_v51 = vld [vmem:[%s10602_s2 + $0x530] sm:$0xf0]  ;;  %v4953_v53 = vor.u32 %v6728_v44, %v4950_v45  ;;  %v6715_v38 = vld [vmem:[%s10602_s2 + $0x2b4] sm:$0xf0] }
  0x50   :  { %1418 = vmatpush.bf16.msrb.mxu2 %v5289_v61  ;;  %v6792_v49 = vld [vmem:[%s10602_s2 + $0x524] sm:$0xf]  ;;  %v4806_v57 = vld [vmem:[%s10602_s2 + $0x210] sm:$0xf0]  ;;  %v5081_v59 = vor.u32 %v6760_v46, %v5078_v47  ;;  %v5020_v40 = vld [vmem:[%s10602_s2 + $0x3a8] sm:$0xf] }
  0x51   :  { %1378 = vmatpush.bf16.msra.mxu0 %v4873_v11  ;;  %v6692_v56 = vld [vmem:[%s10602_s2 + $0x204] sm:$0xf]  ;;  %v4934_v61 = vld [vmem:[%s10602_s2 + $0x310] sm:$0xf0]  ;;  %v5209_v3 = vor.u32 %v6792_v49, %v5206_v51  ;;  %v4764_v44 = vld [vmem:[%s10602_s2 + $0x1a8] sm:$0xf] }
  0x52   :  { %1392 = vmatpush.bf16.msra.mxu1 %v5001_v12  ;;  %v6724_v58 = vld [vmem:[%s10602_s2 + $0x304] sm:$0xf]  ;;  %v5062_v63 = vld [vmem:[%s10602_s2 + $0x410] sm:$0xf0]  ;;  %v4809_v7 = vor.u32 %v6692_v56, %v4806_v57  ;;  %v6683_v45 = vld [vmem:[%s10602_s2 + $0x1b4] sm:$0xf0] }
  0x53   :  { %1406 = vmatpush.bf16.msra.mxu3 %v5129_v16  ;;  %v6756_v62 = vld [vmem:[%s10602_s2 + $0x404] sm:$0xf]  ;;  %v5318_v4 = vld [vmem:[%s10602_s2 + $0x610] sm:$0xf0]  ;;  %v4937_v9 = vor.u32 %v6724_v58, %v4934_v61  ;;  %v4620_v47 = vld [vmem:[%s10602_s2 + $0x88] sm:$0xf] }
  0x54   :  { %1419 = vmatpush.bf16.msrb.mxu2 %v5273_v10  ;;  %v6820_v2 = vld [vmem:[%s10602_s2 + $0x604] sm:$0xf]  ;;  %v5190_v11 = vld [vmem:[%s10602_s2 + $0x510] sm:$0xf0]  ;;  %v5065_v12 = vor.u32 %v6756_v62, %v5062_v63  ;;  %v4876_v51 = vld [vmem:[%s10602_s2 + $0x288] sm:$0xf] }
  0x55   :  { %1379 = vmatpush.bf16.msra.mxu0 %v4857_v23  ;;  %v6788_v10 = vld [vmem:[%s10602_s2 + $0x504] sm:$0xf]  ;;  %v5321_v16 = vor.u32 %v6820_v2, %v5318_v4  ;;  %v5053_v23 = vor.u32 %v6755_v15, %v5052_v14  ;;  %v5004_v56 = vld [vmem:[%s10602_s2 + $0x388] sm:$0xf]  ;;  %v6743_v57 = vld [vmem:[%s10602_s2 + $0x394] sm:$0xf0] }
  0x56   :  { %1393 = vmatpush.bf16.msra.mxu1 %v4985_v24  ;;  %v5193_v20 = vor.u32 %v6788_v10, %v5190_v11  ;;  %v4908_v24 = vld [vmem:[%s10602_s2 + $0x2c8] sm:$0xf]  ;;  %v6679_v61 = vld [vmem:[%s10602_s2 + $0x194] sm:$0xf0]  ;;  %v5005_v1 = vor.u32 %v6743_v57, %v5004_v56  ;;  %v6657_v56 = vld [vmem:[%s10602_s2 + $0xec] sm:$0xf] }
  0x57   :  { %1407 = vmatpush.bf16.msra.mxu3 %v5113_v28  ;;  %v6751_v28 = vld [vmem:[%s10602_s2 + $0x3d4] sm:$0xf0]  ;;  %v4909_v32 = vor.u32 %v6719_v25, %v4908_v24  ;;  %v4604_v63 = vld [vmem:[%s10602_s2 + $0x68] sm:$0xf]  ;;  %v4670_v57 = vld [vmem:[%s10602_s2 + $0xf8] sm:$0xf0] }
  0x58   :  { %1420 = vmatpush.bf16.msrb.mxu2 %v5257_v22  ;;  %v6655_v22 = vld [vmem:[%s10602_s2 + $0xd4] sm:$0xf0]  ;;  %v4860_v2 = vld [vmem:[%s10602_s2 + $0x268] sm:$0xf] }
  0x59   :  { %1380 = vmatpush.bf16.msra.mxu0 %v4841_v35  ;;  %v4653_v29 = vor.u32 %v6655_v22, %v4652_v21  ;;  %v5037_v35 = vor.u32 %v6751_v28, %v5036_v27  ;;  %v6643_v0 = vld [vmem:[%s10602_s2 + $0x74] sm:$0xf0]  ;;  %v4988_v5 = vld [vmem:[%s10602_s2 + $0x368] sm:$0xf] }
  0x5a   :  { %1394 = vmatpush.bf16.msra.mxu1 %v4969_v36  ;;  %v4892_v36 = vld [vmem:[%s10602_s2 + $0x2a8] sm:$0xf]  ;;  %v6739_v6 = vld [vmem:[%s10602_s2 + $0x374] sm:$0xf0] }
  0x5b   :  { %1408 = vmatpush.bf16.msra.mxu3 %v5097_v41  ;;  %v6747_v41 = vld [vmem:[%s10602_s2 + $0x3b4] sm:$0xf0]  ;;  %v4893_v46 = vor.u32 %v6715_v38, %v4892_v36  ;;  %v4989_v14 = vor.u32 %v6739_v6, %v4988_v5  ;;  %v4844_v15 = vld [vmem:[%s10602_s2 + $0x248] sm:$0xf]  ;;  %v4673_v6 = vor.u32 %v6657_v56, %v4670_v57 }
  0x5c   :  { %1421 = vmatpush.bf16.msrb.mxu2 %v5241_v34  ;;  %v6651_v34 = vld [vmem:[%s10602_s2 + $0xb4] sm:$0xf0]  ;;  %v5021_v49 = vor.u32 %v6747_v41, %v5020_v40  ;;  %v4972_v18 = vld [vmem:[%s10602_s2 + $0x348] sm:$0xf] }
  0x5d   :  { %1381 = vmatpush.bf16.msra.mxu0 %v4825_v52  ;;  %v4637_v43 = vor.u32 %v6651_v34, %v4636_v33  ;;  %v6711_v52 = vld [vmem:[%s10602_s2 + $0x294] sm:$0xf0]  ;;  %v4716_v21 = vld [vmem:[%s10602_s2 + $0x148] sm:$0xf] }
  0x5e   :  { %1395 = vmatpush.bf16.msra.mxu1 %v4953_v53  ;;  %v4765_v53 = vor.u32 %v6683_v45, %v4764_v44  ;;  %v4877_v62 = vor.u32 %v6711_v52, %v4876_v51  ;;  %v6675_v10 = vld [vmem:[%s10602_s2 + $0x174] sm:$0xf0]  ;;  %v4572_v24 = vld [vmem:[%s10602_s2 + $0x28] sm:$0xf] }
  0x5f   :  { %1409 = vmatpush.bf16.msra.mxu3 %v5081_v59  ;;  %v4748_v59 = vld [vmem:[%s10602_s2 + $0x188] sm:$0xf]  ;;  %v6671_v22 = vld [vmem:[%s10602_s2 + $0x154] sm:$0xf0] }
  0x60   :  { %1422 = vmatpush.bf16.msrb.mxu2 %v5225_v48  ;;  %v6647_v48 = vld [vmem:[%s10602_s2 + $0x94] sm:$0xf0]  ;;  %v4749_v4 = vor.u32 %v6679_v61, %v4748_v59  ;;  %v4828_v27 = vld [vmem:[%s10602_s2 + $0x228] sm:$0xf] }
  0x61   :  { %1382 = vmatpush.bf16.msra.mxu0 %v4809_v7  ;;  %v4621_v58 = vor.u32 %v6647_v48, %v4620_v47  ;;  %v4605_v7 = vor.u32 %v6643_v0, %v4604_v63  ;;  %v6635_v25 = vld [vmem:[%s10602_s2 + $0x34] sm:$0xf0]  ;;  %v4956_v30 = vld [vmem:[%s10602_s2 + $0x328] sm:$0xf] }
  0x62   :  { %1396 = vmatpush.bf16.msra.mxu1 %v4937_v9  ;;  %v4732_v9 = vld [vmem:[%s10602_s2 + $0x168] sm:$0xf]  ;;  %v6699_v28 = vld [vmem:[%s10602_s2 + $0x234] sm:$0xf0] }
  0x63   :  { %1410 = vmatpush.bf16.msra.mxu3 %v5065_v12  ;;  %v4588_v12 = vld [vmem:[%s10602_s2 + $0x48] sm:$0xf]  ;;  %v4733_v17 = vor.u32 %v6675_v10, %v4732_v9  ;;  %v6731_v31 = vld [vmem:[%s10602_s2 + $0x334] sm:$0xf0]  ;;  %v4829_v36 = vor.u32 %v6699_v28, %v4828_v27  ;;  %v6653_v9 = vld [vmem:[%s10602_s2 + $0xcc] sm:$0xf] }
  0x64   :  { %1423 = vmatpush.bf16.msrb.mxu2 %v5209_v3  ;;  %1383 = vmatmul.bf16.vlgmr.msra.gmra.mxu0 %v7513_v54  ;;  %v6707_v3 = vld [vmem:[%s10602_s2 + $0x274] sm:$0xf0]  ;;  %v4700_v33 = vld [vmem:[%s10602_s2 + $0x128] sm:$0xf]  ;;  %v4957_v41 = vor.u32 %v6731_v31, %v4956_v30  ;;  %v4654_v10 = vld [vmem:[%s10602_s2 + $0xd8] sm:$0xf0] }
  0x65   :  { %1473 = vmatpush.bf16.msrb.mxu0 %v4925_v19  ;;  %1397 = vmatmul.bf16.vlgmr.msra.gmra.mxu1 %v7526_v60  ;;  %v4861_v11 = vor.u32 %v6707_v3, %v4860_v2  ;;  %v6735_v19 = vld [vmem:[%s10602_s2 + $0x354] sm:$0xf0]  ;;  %v4812_v44 = vld [vmem:[%s10602_s2 + $0x208] sm:$0xf]  ;;  %v6689_v3 = vld [vmem:[%s10602_s2 + $0x1ec] sm:$0xf] }
  0x66   :  { %1445 = vmatpush.bf16.msrb.mxu1 %v4669_v13  ;;  %1411 = vmatmul.bf16.vlgmr.msra.gmra.mxu3 %v7739_v37  ;;  %v6639_v13 = vld [vmem:[%s10602_s2 + $0x54] sm:$0xf0]  ;;  %v5308_v61 = vld [vmem:[%s10602_s2 + $0x5e8] sm:$0xf]  ;;  %v4766_v30 = vld [vmem:[%s10602_s2 + $0x1b8] sm:$0xf0] }
  0x67   :  { %1438 = vmatpush.bf16.msrb.mxu3 %v5321_v16  ;;  %v6703_v16 = vld [vmem:[%s10602_s2 + $0x254] sm:$0xf0]  ;;  %v5164_v63 = vld [vmem:[%s10602_s2 + $0x4c8] sm:$0xf] }
  0x68   :  { %1424 = vmatpush.bf16.msrb.mxu2 %v5193_v20  ;;  %v4589_v20 = vor.u32 %v6639_v13, %v4588_v12  ;;  %v6667_v34 = vld [vmem:[%s10602_s2 + $0x134] sm:$0xf0]  ;;  %v5292_v13 = vld [vmem:[%s10602_s2 + $0x5c8] sm:$0xf] }
  0x69   :  { %1474 = vmatpush.bf16.msrb.mxu0 %v4909_v32  ;;  %v4573_v32 = vor.u32 %v6635_v25, %v4572_v24  ;;  %v6631_v38 = vld [vmem:[%s10602_s2 + $0x14] sm:$0xf0]  ;;  %v4701_v47 = vor.u32 %v6667_v34, %v4700_v33  ;;  %v5276_v25 = vld [vmem:[%s10602_s2 + $0x5a8] sm:$0xf]  ;;  %v6645_v33 = vld [vmem:[%s10602_s2 + $0x8c] sm:$0xf] }
  0x6a   :  { %1446 = vmatpush.bf16.msrb.mxu1 %v4653_v29  ;;  %v4717_v29 = vor.u32 %v6671_v22, %v4716_v21  ;;  %v6787_v40 = vld [vmem:[%s10602_s2 + $0x4f4] sm:$0xf0]  ;;  %v6649_v21 = vld [vmem:[%s10602_s2 + $0xac] sm:$0xf]  ;;  %v4638_v22 = vld [vmem:[%s10602_s2 + $0xb8] sm:$0xf0] }
  0x6b   :  { %1459 = vmatpush.bf16.msra.mxu3 %v4797_v26  ;;  %1425 = vmatmul.bf16.vlgmr.msrb.gmra.mxu2 %v7750_v42  ;;  %v4973_v26 = vor.u32 %v6735_v19, %v4972_v18  ;;  %v6695_v45 = vld [vmem:[%s10602_s2 + $0x214] sm:$0xf0]  ;;  %v4782_v18 = vld [vmem:[%s10602_s2 + $0x1d8] sm:$0xf0]  ;;  %v4657_v19 = vor.u32 %v6653_v9, %v4654_v10  ;;  %v5132_v27 = vld [vmem:[%s10602_s2 + $0x488] sm:$0xf]  ;;  %v4641_v31 = vor.u32 %v6649_v21, %v4638_v22 }
  0x6c   :  { %1487 = vmatpush.bf16.msra.mxu2 %v5053_v23  ;;  %v4845_v23 = vor.u32 %v6703_v16, %v4844_v15  ;;  %v6727_v48 = vld [vmem:[%s10602_s2 + $0x314] sm:$0xf0]  ;;  %v4813_v59 = vor.u32 %v6695_v45, %v4812_v44  ;;  %v5148_v15 = vld [vmem:[%s10602_s2 + $0x4a8] sm:$0xf]  ;;  %v4622_v34 = vld [vmem:[%s10602_s2 + $0x98] sm:$0xf0] }
  0x6d   :  { %1475 = vmatpush.bf16.msrb.mxu0 %v4893_v46  ;;  %v4940_v46 = vld [vmem:[%s10602_s2 + $0x308] sm:$0xf]  ;;  %v6823_v51 = vld [vmem:[%s10602_s2 + $0x614] sm:$0xf0]  ;;  %v4750_v44 = vld [vmem:[%s10602_s2 + $0x198] sm:$0xf0]  ;;  %v4625_v45 = vor.u32 %v6645_v33, %v4622_v34 }
  0x6e   :  { %1447 = vmatpush.bf16.msrb.mxu1 %v4637_v43  ;;  %v4684_v43 = vld [vmem:[%s10602_s2 + $0x108] sm:$0xf]  ;;  %v4941_v0 = vor.u32 %v6727_v48, %v4940_v46  ;;  %v6779_v16 = vld [vmem:[%s10602_s2 + $0x4b4] sm:$0xf0]  ;;  %v4606_v48 = vld [vmem:[%s10602_s2 + $0x78] sm:$0xf0] }
  0x6f   :  { %1460 = vmatpush.bf16.msra.mxu3 %v4781_v39  ;;  %v5180_v39 = vld [vmem:[%s10602_s2 + $0x4e8] sm:$0xf]  ;;  %v6775_v28 = vld [vmem:[%s10602_s2 + $0x494] sm:$0xf0]  ;;  %v4718_v9 = vld [vmem:[%s10602_s2 + $0x158] sm:$0xf0] }
  0x70   :  { %1488 = vmatpush.bf16.msra.mxu2 %v5037_v35  ;;  %v4556_v35 = vld [vmem:[%s10602_s2 + $0x8] sm:$0xf]  ;;  %v6767_v57 = vld [vmem:[%s10602_s2 + $0x454] sm:$0xf0]  ;;  %v4702_v21 = vld [vmem:[%s10602_s2 + $0x138] sm:$0xf0] }
  0x71   :  { %1476 = vmatpush.bf16.msrb.mxu0 %v4877_v62  ;;  %v4557_v52 = vor.u32 %v6631_v38, %v4556_v35  ;;  %v6819_v62 = vld [vmem:[%s10602_s2 + $0x5f4] sm:$0xf0]  ;;  %v5133_v35 = vor.u32 %v6775_v28, %v5132_v27  ;;  %v5260_v38 = vld [vmem:[%s10602_s2 + $0x588] sm:$0xf]  ;;  %v6629_v27 = vld [vmem:[%s10602_s2 + $0xc] sm:$0xf] }
  0x72   :  { %1448 = vmatpush.bf16.msrb.mxu1 %v4621_v58  ;;  %v5181_v58 = vor.u32 %v6787_v40, %v5180_v39  ;;  %v6807_v39 = vld [vmem:[%s10602_s2 + $0x594] sm:$0xf0]  ;;  %v5116_v40 = vld [vmem:[%s10602_s2 + $0x468] sm:$0xf]  ;;  %v4558_v28 = vld [vmem:[%s10602_s2 + $0x18] sm:$0xf0] }
  0x73   :  { %1461 = vmatpush.bf16.msra.mxu3 %v4765_v53  ;;  %v6663_v53 = vld [vmem:[%s10602_s2 + $0x114] sm:$0xf0]  ;;  %v5261_v46 = vor.u32 %v6807_v39, %v5260_v38  ;;  %v5100_v56 = vld [vmem:[%s10602_s2 + $0x448] sm:$0xf]  ;;  %v5054_v33 = vld [vmem:[%s10602_s2 + $0x3f8] sm:$0xf0]  ;;  %v4561_v39 = vor.u32 %v6629_v27, %v4558_v28 }
  0x74   :  { %1489 = vmatpush.bf16.msra.mxu2 %v5021_v49  ;;  %v5324_v49 = vld [vmem:[%s10602_s2 + $0x608] sm:$0xf]  ;;  %v4685_v5 = vor.u32 %v6663_v53, %v4684_v43  ;;  %v6677_v43 = vld [vmem:[%s10602_s2 + $0x18c] sm:$0xf]  ;;  %v6803_v53 = vld [vmem:[%s10602_s2 + $0x574] sm:$0xf0] }
  0x75   :  { %1477 = vmatpush.bf16.msrb.mxu0 %v4861_v11  ;;  %v5325_v2 = vor.u32 %v6823_v51, %v5324_v49  ;;  %v4753_v51 = vor.u32 %v6677_v43, %v4750_v44  ;;  %v6717_v38 = vld [vmem:[%s10602_s2 + $0x2cc] sm:$0xf]  ;;  %v4686_v43 = vld [vmem:[%s10602_s2 + $0x118] sm:$0xf0] }
  0x76   :  { %1449 = vmatpush.bf16.msrb.mxu1 %v4605_v7  ;;  %5331 = vmatmul.msk.bf16.vlgmr.msrb.gmra.mxu3 %vm1245_vm0, %v7642_v50  ;;  %v5309_v7 = vor.u32 %v6819_v62, %v5308_v61  ;;  %v4990_v27 = vld [vmem:[%s10602_s2 + $0x378] sm:$0xf0]  ;;  %v6769_v28 = vld [vmem:[%s10602_s2 + $0x46c] sm:$0xf] }
  0x77   :  { %1462 = vmatpush.bf16.msra.mxu3 %v4749_v4  ;;  %v4798_v4 = vld [vmem:[%s10602_s2 + $0x1f8] sm:$0xf0] }
  0x78   :  { %1490 = vmatpush.bf16.msra.mxu2 %v5005_v1  ;;  %v6783_v1 = vld [vmem:[%s10602_s2 + $0x4d4] sm:$0xf0]  ;;  %v4801_v12 = vor.u32 %v6689_v3, %v4798_v4  ;;  %v5228_v3 = vld [vmem:[%s10602_s2 + $0x548] sm:$0xf] }
  0x79   :  { %1478 = vmatpush.bf16.msrb.mxu0 %v4845_v23  ;;  %v5165_v11 = vor.u32 %v6783_v1, %v5164_v63  ;;  %v5149_v23 = vor.u32 %v6779_v16, %v5148_v15  ;;  %v6637_v63 = vld [vmem:[%s10602_s2 + $0x4c] sm:$0xf]  ;;  %v5101_v1 = vor.u32 %v6767_v57, %v5100_v56  ;;  %v6799_v4 = vld [vmem:[%s10602_s2 + $0x554] sm:$0xf0]  ;;  %v5212_v16 = vld [vmem:[%s10602_s2 + $0x528] sm:$0xf] }
  0x7a   :  { %1450 = vmatpush.bf16.msrb.mxu1 %v4589_v20  ;;  %v6781_v56 = vld [vmem:[%s10602_s2 + $0x4cc] sm:$0xf]  ;;  %v5166_v57 = vld [vmem:[%s10602_s2 + $0x4d8] sm:$0xf0] }
  0x7b   :  { %1463 = vmatpush.bf16.msra.mxu3 %v4733_v17  ;;  %v6685_v17 = vld [vmem:[%s10602_s2 + $0x1cc] sm:$0xf] }
  0x7c   :  { %1491 = vmatpush.bf16.msra.mxu2 %v4989_v14  ;;  %v6815_v14 = vld [vmem:[%s10602_s2 + $0x5d4] sm:$0xf0]  ;;  %v4785_v24 = vor.u32 %v6685_v17, %v4782_v18  ;;  %v5068_v18 = vld [vmem:[%s10602_s2 + $0x408] sm:$0xf] }
  0x7d   :  { %1479 = vmatpush.bf16.msrb.mxu0 %v4829_v36  ;;  %v5293_v20 = vor.u32 %v6815_v14, %v5292_v13  ;;  %v4574_v13 = vld [vmem:[%s10602_s2 + $0x38] sm:$0xf0]  ;;  %v6795_v17 = vld [vmem:[%s10602_s2 + $0x534] sm:$0xf0] }
  0x7e   :  { %1451 = vmatpush.bf16.msrb.mxu1 %v4573_v32 }
  0x7f   :  { %1464 = vmatpush.bf16.msra.mxu3 %v4717_v29  ;;  %v6681_v29 = vld [vmem:[%s10602_s2 + $0x1ac] sm:$0xf] }
  0x80   :  { %1492 = vmatpush.bf16.msra.mxu2 %v4973_v26  ;;  %v6811_v26 = vld [vmem:[%s10602_s2 + $0x5b4] sm:$0xf0]  ;;  %v4769_v36 = vor.u32 %v6681_v29, %v4766_v30 }
  0x81   :  { %1480 = vmatpush.bf16.msrb.mxu0 %v4813_v59  ;;  %v5277_v32 = vor.u32 %v6811_v26, %v5276_v25  ;;  %v4734_v59 = vld [vmem:[%s10602_s2 + $0x178] sm:$0xf0]  ;;  %v5213_v25 = vor.u32 %v6795_v17, %v5212_v16  ;;  %v5196_v26 = vld [vmem:[%s10602_s2 + $0x508] sm:$0xf]  ;;  %v6773_v17 = vld [vmem:[%s10602_s2 + $0x48c] sm:$0xf] }
  0x82   :  { %1452 = vmatpush.bf16.msrb.mxu1 %v4557_v52  ;;  %v5244_v52 = vld [vmem:[%s10602_s2 + $0x568] sm:$0xf] }
  0x83   :  { %1465 = vmatpush.bf16.msra.mxu3 %v4701_v47  ;;  %v6641_v47 = vld [vmem:[%s10602_s2 + $0x6c] sm:$0xf]  ;;  %v5245_v62 = vor.u32 %v6803_v53, %v5244_v52  ;;  %v5038_v53 = vld [vmem:[%s10602_s2 + $0x3d8] sm:$0xf0] }
  0x84   :  { %1493 = vmatpush.bf16.msra.mxu2 %v4957_v41  ;;  %1481 = vmatmul.bf16.vlgmr.msrb.gmra.mxu0 %v7513_v54  ;;  %v6771_v41 = vld [vmem:[%s10602_s2 + $0x474] sm:$0xf0]  ;;  %v4609_v61 = vor.u32 %v6641_v47, %v4606_v48 }
  0x85   :  { %1536 = vmatpush.bf16.msra.mxu0 %v5325_v2  ;;  %1453 = vmatmul.bf16.vlgmr.msrb.gmra.mxu1 %v7515_v55  ;;  %v5117_v49 = vor.u32 %v6771_v41, %v5116_v40  ;;  %v4910_v40 = vld [vmem:[%s10602_s2 + $0x2d8] sm:$0xf0]  ;;  %v6661_v41 = vld [vmem:[%s10602_s2 + $0x10c] sm:$0xf] }
  0x86   :  { %1501 = vmatpush.bf16.msra.mxu1 %v5181_v58  ;;  %v6673_v58 = vld [vmem:[%s10602_s2 + $0x16c] sm:$0xf]  ;;  %v4689_v52 = vor.u32 %v6661_v41, %v4686_v43  ;;  %v5102_v43 = vld [vmem:[%s10602_s2 + $0x458] sm:$0xf0] }
  0x87   :  { %1466 = vmatpush.bf16.msra.mxu3 %v4685_v5  ;;  %v4737_v2 = vor.u32 %v6673_v58, %v4734_v59  ;;  %v5084_v5 = vld [vmem:[%s10602_s2 + $0x428] sm:$0xf]  ;;  %v6713_v59 = vld [vmem:[%s10602_s2 + $0x2ac] sm:$0xf] }
  0x88   :  { %1494 = vmatpush.bf16.msra.mxu2 %v4941_v0  ;;  %v4590_v0 = vld [vmem:[%s10602_s2 + $0x58] sm:$0xf0]  ;;  %v6765_v41 = vld [vmem:[%s10602_s2 + $0x44c] sm:$0xf] }
  0x89   :  { %1557 = vmatpush.bf16.msrb.mxu0 %v4801_v12  ;;  %v4593_v10 = vor.u32 %v6637_v63, %v4590_v0  ;;  %v6633_v12 = vld [vmem:[%s10602_s2 + $0x2c] sm:$0xf]  ;;  %v5294_v63 = vld [vmem:[%s10602_s2 + $0x5d8] sm:$0xf0] }
  0x8a   :  { %1502 = vmatpush.bf16.msra.mxu1 %v5165_v11  ;;  %1467 = vmatmul.bf16.vlgmr.msra.gmra.mxu3 %v7551_v8  ;;  %v5229_v11 = vor.u32 %v6799_v4, %v5228_v3  ;;  %v4577_v22 = vor.u32 %v6633_v12, %v4574_v13  ;;  %v5022_v4 = vld [vmem:[%s10602_s2 + $0x3b8] sm:$0xf0] }
  0x8b   :  { %1515 = vmatpush.bf16.msrb.mxu3 %v5309_v7  ;;  %1495 = vmatmul.bf16.vlgmr.msra.gmra.mxu2 %v7526_v60  ;;  %v6669_v7 = vld [vmem:[%s10602_s2 + $0x14c] sm:$0xf]  ;;  %v5278_v12 = vld [vmem:[%s10602_s2 + $0x5b8] sm:$0xf0] }
  0x8c   :  { %1543 = vmatpush.bf16.msrb.mxu2 %v4673_v6  ;;  %v6763_v6 = vld [vmem:[%s10602_s2 + $0x434] sm:$0xf0]  ;;  %v4721_v15 = vor.u32 %v6669_v7, %v4718_v9  ;;  %v6709_v9 = vld [vmem:[%s10602_s2 + $0x28c] sm:$0xf] }
  0x8d   :  { %1558 = vmatpush.bf16.msrb.mxu0 %v4785_v24  ;;  %v5085_v14 = vor.u32 %v6763_v6, %v5084_v5  ;;  %v4926_v24 = vld [vmem:[%s10602_s2 + $0x2f8] sm:$0xf0]  ;;  %v6777_v5 = vld [vmem:[%s10602_s2 + $0x4ac] sm:$0xf] }
  0x8e   :  { %1503 = vmatpush.bf16.msra.mxu1 %v5149_v23  ;;  %v6721_v23 = vld [vmem:[%s10602_s2 + $0x2ec] sm:$0xf]  ;;  %v5150_v6 = vld [vmem:[%s10602_s2 + $0x4b8] sm:$0xf0] }
  0x8f   :  { %1516 = vmatpush.bf16.msrb.mxu3 %v5293_v20  ;;  %v6665_v20 = vld [vmem:[%s10602_s2 + $0x12c] sm:$0xf]  ;;  %v4929_v34 = vor.u32 %v6721_v23, %v4926_v24  ;;  %v5262_v23 = vld [vmem:[%s10602_s2 + $0x598] sm:$0xf0] }
  0x90   :  { %1544 = vmatpush.bf16.msrb.mxu2 %v4657_v19  ;;  %v6759_v19 = vld [vmem:[%s10602_s2 + $0x414] sm:$0xf0]  ;;  %v4705_v30 = vor.u32 %v6665_v20, %v4702_v21  ;;  %v6705_v20 = vld [vmem:[%s10602_s2 + $0x26c] sm:$0xf]  ;;  %v4862_v21 = vld [vmem:[%s10602_s2 + $0x278] sm:$0xf0] }
  0x91   :  { %1559 = vmatpush.bf16.msrb.mxu0 %v4769_v36  ;;  %v5069_v29 = vor.u32 %v6759_v19, %v5068_v18  ;;  %v5182_v36 = vld [vmem:[%s10602_s2 + $0x4f8] sm:$0xf0] }
  0x92   :  { %1504 = vmatpush.bf16.msra.mxu1 %v5133_v35  ;;  %v6785_v35 = vld [vmem:[%s10602_s2 + $0x4ec] sm:$0xf]  ;;  %v5134_v18 = vld [vmem:[%s10602_s2 + $0x498] sm:$0xf0] }
  0x93   :  { %1517 = vmatpush.bf16.msrb.mxu3 %v5277_v32  ;;  %v6753_v32 = vld [vmem:[%s10602_s2 + $0x3ec] sm:$0xf]  ;;  %v5185_v48 = vor.u32 %v6785_v35, %v5182_v36  ;;  %v5137_v24 = vor.u32 %v6773_v17, %v5134_v18  ;;  %v8529_v17 = vld [vmem:[%s10605_s3] sm:$0xf] }
  0x94   :  { %1545 = vmatpush.bf16.msrb.mxu2 %v4641_v31  ;;  %5332 = vmatmul.msk.bf16.vlgmr.msra.gmra.mxu0 %vm1245_vm0, %v7642_v50  ;;  %v6791_v31 = vld [vmem:[%s10602_s2 + $0x514] sm:$0xf0]  ;;  %v5057_v47 = vor.u32 %v6753_v32, %v5054_v33  ;;  %v4846_v32 = vld [vmem:[%s10602_s2 + $0x258] sm:$0xf0]  ;;  %v6801_v33 = vld [vmem:[%s10602_s2 + $0x56c] sm:$0xf] }
  0x95   :  { %1560 = vmatpush.bf16.msrb.mxu0 %v4753_v51  ;;  %v5197_v44 = vor.u32 %v6791_v31, %v5196_v26  ;;  %v4913_v51 = vor.u32 %v6717_v38, %v4910_v40  ;;  %v4865_v26 = vor.u32 %v6705_v20, %v4862_v21  ;;  %v6701_v31 = vld [vmem:[%s10602_s2 + $0x24c] sm:$0xf]  ;;  %v4974_v40 = vld [vmem:[%s10602_s2 + $0x358] sm:$0xf0] }
  0x96   :  { %1505 = vmatpush.bf16.msra.mxu1 %v5117_v49  ;;  %v6749_v49 = vld [vmem:[%s10602_s2 + $0x3cc] sm:$0xf] }
  0x97   :  { %1518 = vmatpush.bf16.msrb.mxu3 %v5261_v46  ;;  %v5310_v46 = vld [vmem:[%s10602_s2 + $0x5f8] sm:$0xf0]  ;;  %v5041_v0 = vor.u32 %v6749_v49, %v5038_v53  ;;  %v6733_v38 = vld [vmem:[%s10602_s2 + $0x34c] sm:$0xf] }
  0x98   :  { %1546 = vmatpush.bf16.msrb.mxu2 %v4625_v45  ;;  %v6817_v45 = vld [vmem:[%s10602_s2 + $0x5ec] sm:$0xf]  ;;  %v4977_v49 = vor.u32 %v6733_v38, %v4974_v40  ;;  %v6835_v38 = vld [vmem:[%s10604_s4 + $0x54] sm:$0xf0] }
  0x99   :  { %1561 = vmatpush.bf16.msrb.mxu0 %v4737_v2  ;;  %v5313_v58 = vor.u32 %v6817_v45, %v5310_v46  ;;  %v6745_v2 = vld [vmem:[%s10602_s2 + $0x3ac] sm:$0xf]  ;;  %v4830_v46 = vld [vmem:[%s10602_s2 + $0x238] sm:$0xf0] }
  0x9a   :  { %1506 = vmatpush.bf16.msra.mxu1 %v5101_v1  ;;  %v5169_v1 = vor.u32 %v6781_v56, %v5166_v57  ;;  %v5025_v13 = vor.u32 %v6745_v2, %v5022_v4  ;;  %v6697_v45 = vld [vmem:[%s10602_s2 + $0x22c] sm:$0xf]  ;;  %v4958_v57 = vld [vmem:[%s10602_s2 + $0x338] sm:$0xf0] }
  0x9b   :  { %1519 = vmatpush.bf16.msrb.mxu3 %v5245_v62  ;;  %v6813_v62 = vld [vmem:[%s10602_s2 + $0x5cc] sm:$0xf]  ;;  %v4833_v56 = vor.u32 %v6697_v45, %v4830_v46  ;;  %v5214_v2 = vld [vmem:[%s10602_s2 + $0x538] sm:$0xf0] }
  0x9c   :  { %1547 = vmatpush.bf16.msrb.mxu2 %v4609_v61  ;;  %v4894_v61 = vld [vmem:[%s10602_s2 + $0x2b8] sm:$0xf0]  ;;  %v5297_v7 = vor.u32 %v6813_v62, %v5294_v63  ;;  %v6693_v63 = vld [vmem:[%s10602_s2 + $0x20c] sm:$0xf] }
  0x9d   :  { %1562 = vmatpush.bf16.msrb.mxu0 %v4721_v15  ;;  %v4897_v3 = vor.u32 %v6713_v59, %v4894_v61  ;;  %v6741_v15 = vld [vmem:[%s10602_s2 + $0x38c] sm:$0xf]  ;;  %v5086_v59 = vld [vmem:[%s10602_s2 + $0x438] sm:$0xf0] }
  0x9e   :  { %1507 = vmatpush.bf16.msra.mxu1 %v5085_v14  ;;  %v5153_v14 = vor.u32 %v6777_v5, %v5150_v6  ;;  %v5326_v4 = vld [vmem:[%s10602_s2 + $0x618] sm:$0xf0]  ;;  %v6789_v18 = vld [vmem:[%s10602_s2 + $0x50c] sm:$0xf] }
  0x9f   :  { %1520 = vmatpush.bf16.msrb.mxu3 %v5229_v11  ;;  %v6809_v11 = vld [vmem:[%s10602_s2 + $0x5ac] sm:$0xf] }
  0xa0   :  { %1548 = vmatpush.bf16.msrb.mxu2 %v4593_v10  ;;  %v4878_v10 = vld [vmem:[%s10602_s2 + $0x298] sm:$0xf0]  ;;  %v5281_v19 = vor.u32 %v6809_v11, %v5278_v12  ;;  %v6757_v12 = vld [vmem:[%s10602_s2 + $0x40c] sm:$0xf] }
  0xa1   :  { %1563 = vmatpush.bf16.msrb.mxu0 %v4705_v30  ;;  %v4881_v16 = vor.u32 %v6709_v9, %v4878_v10  ;;  %v6725_v10 = vld [vmem:[%s10602_s2 + $0x30c] sm:$0xf]  ;;  %v4942_v11 = vld [vmem:[%s10602_s2 + $0x318] sm:$0xf0] }
  0xa2   :  { %1508 = vmatpush.bf16.msra.mxu1 %v5069_v29  ;;  %v5118_v29 = vld [vmem:[%s10602_s2 + $0x478] sm:$0xf0]  ;;  %v4945_v20 = vor.u32 %v6725_v10, %v4942_v11 }
  0xa3   :  { %1521 = vmatpush.bf16.msrb.mxu3 %v5213_v25  ;;  %v6737_v25 = vld [vmem:[%s10602_s2 + $0x36c] sm:$0xf]  ;;  %v5121_v36 = vor.u32 %v6769_v28, %v5118_v29 }
  0xa4   :  { %1549 = vmatpush.bf16.msrb.mxu2 %v4577_v22  ;;  %v6805_v22 = vld [vmem:[%s10602_s2 + $0x58c] sm:$0xf]  ;;  %v4993_v35 = vor.u32 %v6737_v25, %v4990_v27  ;;  %v1258_v53 = vpop.f32.mrf.mxu0  ;;  %v6837_v27 = vld [vmem:[%s10604_s4 + $0x64] sm:$0xf0] }
  0xa5   :  { %1509 = vmatmul.bf16.vlgmr.msra.gmra.mxu1 %v7739_v37  ;;  %1564 = vmatpush.bf16.msrb.mxu0 %v4689_v52  ;;  %v5265_v30 = vor.u32 %v6805_v22, %v5262_v23  ;;  %v6729_v52 = vld [vmem:[%s10602_s2 + $0x32c] sm:$0xf]  ;;  %v5456_v23 = vld [vmem:[%s10604_s4 + $0xf0] sm:$0xf] }
  0xa6   :  { %1571 = vmatpush.bf16.msrb.mxu1 %v4929_v34  ;;  %v5246_v34 = vld [vmem:[%s10602_s2 + $0x578] sm:$0xf0]  ;;  %v4961_v5 = vor.u32 %v6729_v52, %v4958_v57  ;;  %v6849_v52 = vld [vmem:[%s10604_s4 + $0xc4] sm:$0xf0]  ;;  %v5360_v57 = vld [vmem:[%s10604_s4 + $0x30] sm:$0xf] }
  0xa7   :  { %1522 = vmatpush.bf16.msrb.mxu3 %v5197_v44  ;;  %v5249_v44 = vor.u32 %v6801_v33, %v5246_v34  ;;  %v5448_v33 = vld [vmem:[%s10604_s4 + $0xe0] sm:$0xf]  ;;  %v6853_v34 = vld [vmem:[%s10604_s4 + $0xe4] sm:$0xf0] }
  0xa8   :  { %1550 = vmatpush.bf16.msrb.mxu2 %v4561_v39  ;;  %1565 = vmatmul.bf16.vlgmr.msrb.gmra.mxu0 %v7551_v8  ;;  %v4849_v39 = vor.u32 %v6701_v31, %v4846_v32  ;;  %v8486_v61 = vpop.f32.mrf.mxu1 }
  0xa9   :  { %1613 = vmatpush.bf16.msra.mxu0 %v5313_v58  ;;  %v6761_v58 = vld [vmem:[%s10602_s2 + $0x42c] sm:$0xf] }
  0xaa   :  { %1572 = vmatpush.bf16.msrb.mxu1 %v4913_v51  ;;  %1523 = vmatmul.bf16.vlgmr.msrb.gmra.mxu3 %v7750_v42  ;;  %v5105_v51 = vor.u32 %v6765_v41, %v5102_v43  ;;  %v5089_v6 = vor.u32 %v6761_v58, %v5086_v59  ;;  %v5440_v43 = vld [vmem:[%s10604_s4 + $0xd0] sm:$0xf]  ;;  %v6831_v58 = vld [vmem:[%s10604_s4 + $0x34] sm:$0xf0] }
  0xab   :  { %1585 = vmatpush.bf16.msra.mxu3 %v5057_v47  ;;  %1551 = vmatmul.bf16.vlgmr.msrb.gmra.mxu2 %v7515_v55  ;;  %v5006_v55 = vld [vmem:[%s10602_s2 + $0x398] sm:$0xf0]  ;;  %v6797_v47 = vld [vmem:[%s10602_s2 + $0x54c] sm:$0xf]  ;;  %v1300_v31 = vpop.f32.mrf.mxu3 }
  0xac   :  { %1599 = vmatpush.bf16.msra.mxu2 %v5185_v48  ;;  %v5009_v8 = vor.u32 %v6741_v15, %v5006_v55  ;;  %v5230_v48 = vld [vmem:[%s10602_s2 + $0x558] sm:$0xf0]  ;;  %v5392_v15 = vld [vmem:[%s10604_s4 + $0x70] sm:$0xf]  ;;  %v1260_v29 = vpop.f32.mrf.mxu0 }
  0xad   :  { %1614 = vmatpush.bf16.msra.mxu0 %v5297_v7  ;;  %v5233_v62 = vor.u32 %v6797_v47, %v5230_v48  ;;  %v8506_v7 = vpop.f32.mrf.mxu2 }
  0xae   :  { %1573 = vmatpush.bf16.msrb.mxu1 %v4897_v3  ;;  %v6821_v3 = vld [vmem:[%s10602_s2 + $0x60c] sm:$0xf] }
  0xaf   :  { %1586 = vmatpush.bf16.msra.mxu3 %v5041_v0  ;;  %v4814_v0 = vld [vmem:[%s10602_s2 + $0x218] sm:$0xf0]  ;;  %v5329_v55 = vor.u32 %v6821_v3, %v5326_v4  ;;  %v5352_v4 = vld [vmem:[%s10604_s4 + $0x20] sm:$0xf] }
  0xb0   :  { %1600 = vmatpush.bf16.msra.mxu2 %v5169_v1  ;;  %v6793_v1 = vld [vmem:[%s10602_s2 + $0x52c] sm:$0xf]  ;;  %v4817_v9 = vor.u32 %v6693_v63, %v4814_v0  ;;  %v5361_v63 = vor.u32 %v6831_v58, %v5360_v57  ;;  %v5424_v0 = vld [vmem:[%s10604_s4 + $0xb0] sm:$0xf] }
  0xb1   :  { %1615 = vmatpush.bf16.msra.mxu0 %v5281_v19  ;;  %v5198_v19 = vld [vmem:[%s10602_s2 + $0x518] sm:$0xf0] }
  0xb2   :  { %1574 = vmatpush.bf16.msrb.mxu1 %v4881_v16  ;;  %v6839_v16 = vld [vmem:[%s10604_s4 + $0x74] sm:$0xf0]  ;;  %v5201_v25 = vor.u32 %v6789_v18, %v5198_v19 }
  0xb3   :  { %1587 = vmatpush.bf16.msra.mxu3 %v5025_v13  ;;  %v5217_v13 = vor.u32 %v6793_v1, %v5214_v2  ;;  %v5393_v22 = vor.u32 %v6839_v16, %v5392_v15  ;;  %v6847_v1 = vld [vmem:[%s10604_s4 + $0xb4] sm:$0xf0]  ;;  %v5344_v16 = vld [vmem:[%s10604_s4 + $0x10] sm:$0xf] }
  0xb4   :  { %1601 = vmatpush.bf16.msra.mxu2 %v5153_v14  ;;  %v5070_v14 = vld [vmem:[%s10602_s2 + $0x418] sm:$0xf0] }
  0xb5   :  { %1616 = vmatpush.bf16.msra.mxu0 %v5265_v30  ;;  %v5073_v21 = vor.u32 %v6757_v12, %v5070_v14  ;;  %v1274_v30 = vpop.f32.mrf.mxu1  ;;  %v1288_v40 = vpop.f32.mrf.mxu2  ;;  %v6845_v14 = vld [vmem:[%s10604_s4 + $0xa4] sm:$0xf0] }
  0xb6   :  { %1575 = vmatpush.bf16.msrb.mxu1 %v4865_v26  ;;  %v5384_v26 = vld [vmem:[%s10604_s4 + $0x60] sm:$0xf] }
  0xb7   :  { %1588 = vmatpush.bf16.msra.mxu3 %v5009_v8  ;;  %v6855_v8 = vld [vmem:[%s10604_s4 + $0xf4] sm:$0xf0]  ;;  %v5385_v32 = vor.u32 %v6837_v27, %v5384_v26  ;;  %v6838_v26 = vld [vmem:[%s10604_s4 + $0x74] sm:$0xf]  ;;  %v5394_v27 = vld [vmem:[%s10604_s4 + $0x78] sm:$0xf0] }
  0xb8   :  { %1602 = vmatpush.bf16.msra.mxu2 %v5137_v24  ;;  %v257_v24 = vperm.slane %v8529_v17, 0  ;;  %v5457_v28 = vor.u32 %v6855_v8, %v5456_v23  ;;  %v5336_v8 = vld [vmem:[%s10604_s4] sm:$0xf] }
  0xb9   :  { %1617 = vmatpush.bf16.msra.mxu0 %v5249_v44  ;;  %v6851_v44 = vld [vmem:[%s10604_s4 + $0xd4] sm:$0xf0] }
  0xba   :  { %1576 = vmatpush.bf16.msrb.mxu1 %v4849_v39  ;;  %v5449_v39 = vor.u32 %v6853_v34, %v5448_v33  ;;  %v5397_v34 = vor.u32 %v6838_v26, %v5394_v27  ;;  %v5410_v26 = vld [vmem:[%s10604_s4 + $0x98] sm:$0xf0] }
  0xbb   :  { %1589 = vmatpush.bf16.msra.mxu3 %v4993_v35  ;;  %v1259_v35 = vadd.f32 %v1258_v53, %v257_v24 }
  0xbc   :  { %1603 = vmatpush.bf16.msra.mxu2 %v5121_v36  ;;  %v1261_v36 = vadd.f32 %v1260_v29, %v257_v24  ;;  %v6825_v24 = vld [vmem:[%s10604_s4 + $0x4] sm:$0xf0] }
  0xbd   :  { %1618 = vmatpush.bf16.msra.mxu0 %v5233_v62  ;;  %v1273_v45 = vadd.f32 %v8486_v61, %v1259_v35  ;;  %v1302_v61 = vpop.f32.mrf.mxu3  ;;  %v1342_v62 = vpop.f32.mrf.mxu2  ;;  %v5337_v29 = vor.u32 %v6825_v24, %v5336_v8 }
  0xbe   :  { %1577 = vmatpush.bf16.msrb.mxu1 %v4833_v56  ;;  %v1275_v46 = vadd.f32 %v1274_v30, %v1261_v36  ;;  %v5400_v30 = vld [vmem:[%s10604_s4 + $0x80] sm:$0xf]  ;;  %v6854_v36 = vld [vmem:[%s10604_s4 + $0xf4] sm:$0xf] }
  0xbf   :  { %1590 = vmatpush.bf16.msra.mxu3 %v4977_v49  ;;  %v1287_v53 = vadd.f32 %v8506_v7, %v1273_v45  ;;  %v6852_v45 = vld [vmem:[%s10604_s4 + $0xe4] sm:$0xf] }
  0xc0   :  { %1604 = vmatpush.bf16.msra.mxu2 %v5105_v51  ;;  %v5432_v51 = vld [vmem:[%s10604_s4 + $0xc0] sm:$0xf]  ;;  %v1289_v56 = vadd.f32 %v1288_v40, %v1275_v46  ;;  %v5450_v46 = vld [vmem:[%s10604_s4 + $0xe8] sm:$0xf0] }
  0xc1   :  { %1619 = vmatpush.bf16.msra.mxu0 %v5217_v13  ;;  %v1314_v47 = vpop.f32.mrf.mxu0  ;;  %v5433_v59 = vor.u32 %v6849_v52, %v5432_v51  ;;  %v1301_v2 = vadd.f32 %v1300_v31, %v1287_v53  ;;  %v5416_v13 = vld [vmem:[%s10604_s4 + $0xa0] sm:$0xf]  ;;  %v6841_v31 = vld [vmem:[%s10604_s4 + $0x84] sm:$0xf0]  ;;  %v6832_v51 = vld [vmem:[%s10604_s4 + $0x44] sm:$0xf] }
  0xc2   :  { %1578 = vmatpush.bf16.msrb.mxu1 %v4817_v9  ;;  %v1328_v48 = vpop.f32.mrf.mxu1  ;;  %v1303_v3 = vadd.f32 %v1302_v61, %v1289_v56  ;;  %v5401_v35 = vor.u32 %v6841_v31, %v5400_v30  ;;  %v5370_v52 = vld [vmem:[%s10604_s4 + $0x48] sm:$0xf0] }
  0xc3   :  { %1591 = vmatpush.bf16.msra.mxu3 %v4961_v5  ;;  %v6829_v5 = vld [vmem:[%s10604_s4 + $0x24] sm:$0xf0]  ;;  %v1315_v9 = vadd.f32 %v1314_v47, %v1301_v2  ;;  %v5373_v58 = vor.u32 %v6832_v51, %v5370_v52  ;;  %v5434_v61 = vld [vmem:[%s10604_s4 + $0xc8] sm:$0xf0]  ;;  %v6846_v2 = vld [vmem:[%s10604_s4 + $0xb4] sm:$0xf] }
  0xc4   :  { %1605 = vmatpush.bf16.msra.mxu2 %v5089_v6  ;;  %v5425_v6 = vor.u32 %v6847_v1, %v5424_v0  ;;  %v5353_v12 = vor.u32 %v6829_v5, %v5352_v4  ;;  %v6828_v4 = vld [vmem:[%s10604_s4 + $0x24] sm:$0xf]  ;;  %v5354_v5 = vld [vmem:[%s10604_s4 + $0x28] sm:$0xf0]  ;;  %v6863_v51 = vld [vmem:[%s10604_s4 + $0x134] sm:$0xf0] }
  0xc5   :  { %1579 = vmatmul.bf16.vlgmr.msrb.gmra.mxu1 %v7513_v54  ;;  %1620 = vmatpush.bf16.msra.mxu0 %v5201_v25  ;;  %v5376_v54 = vld [vmem:[%s10604_s4 + $0x50] sm:$0xf]  ;;  %v1329_v18 = vadd.f32 %v1328_v48, %v1315_v9  ;;  %v1344_v19 = vpop.f32.mrf.mxu2  ;;  %v6850_v48 = vld [vmem:[%s10604_s4 + $0xd4] sm:$0xf] }
  0xc6   :  { %1634 = vmatpush.bf16.msra.mxu1 %v5329_v55  ;;  %v5377_v41 = vor.u32 %v6835_v38, %v5376_v54  ;;  %v5417_v55 = vor.u32 %v6845_v14, %v5416_v13  ;;  %v5458_v54 = vld [vmem:[%s10604_s4 + $0xf8] sm:$0xf0]  ;;  %v6836_v38 = vld [vmem:[%s10604_s4 + $0x64] sm:$0xf] }
  0xc7   :  { %1592 = vmatpush.bf16.msra.mxu3 %v4945_v20  ;;  %v5461_v40 = vor.u32 %v6854_v36, %v5458_v54 }
  0xc8   :  { %1606 = vmatpush.bf16.msra.mxu2 %v5073_v21  ;;  %1621 = vmatmul.bf16.vlgmr.msra.gmra.mxu0 %v7750_v42  ;;  %v5441_v42 = vor.u32 %v6851_v44, %v5440_v43  ;;  %v5408_v21 = vld [vmem:[%s10604_s4 + $0x90] sm:$0xf] }
  0xc9   :  { %v1316_v7 = vpop.f32.mrf.mxu0  ;;  %v8642_v33 = vpop.f32.mrf.mxu3 }
  0xca   :  { %2057 = vmatpush.bf16.msrb.mxu1 %v5457_v28  ;;  %1593 = vmatmul.bf16.vlgmr.msra.gmra.mxu3 %v7526_v60  ;;  %v5368_v60 = vld [vmem:[%s10604_s4 + $0x40] sm:$0xf]  ;;  %v1317_v10 = vadd.f32 %v1316_v7, %v1303_v3  ;;  %v1330_v11 = vpop.f32.mrf.mxu1  ;;  %v1343_v28 = vadd.f32 %v1342_v62, %v1329_v18  ;;  %v6830_v62 = vld [vmem:[%s10604_s4 + $0x34] sm:$0xf]  ;;  %v5426_v3 = vld [vmem:[%s10604_s4 + $0xb8] sm:$0xf0] }
  0xcb   :  { %2043 = vmatpush.bf16.msrb.mxu3 %v5393_v22  ;;  %1607 = vmatmul.bf16.vlgmr.msra.gmra.mxu2 %v7739_v37  ;;  %v6833_v37 = vld [vmem:[%s10604_s4 + $0x44] sm:$0xf0]  ;;  %v6843_v22 = vld [vmem:[%s10604_s4 + $0x94] sm:$0xf0]  ;;  %v5346_v18 = vld [vmem:[%s10604_s4 + $0x18] sm:$0xf0] }
  0xcc   :  { %v5369_v49 = vor.u32 %v6833_v37, %v5368_v60  ;;  %v1331_v15 = vadd.f32 %v1330_v11, %v1317_v10  ;;  %v5409_v25 = vor.u32 %v6843_v22, %v5408_v21  ;;  %v6834_v60 = vld [vmem:[%s10604_s4 + $0x54] sm:$0xf]  ;;  %v5378_v37 = vld [vmem:[%s10604_s4 + $0x58] sm:$0xf0]  ;;  %v5520_v10 = vld [vmem:[%s10604_s4 + $0x170] sm:$0xf] }
  0xcd   :  { %v5381_v47 = vor.u32 %v6834_v60, %v5378_v37  ;;  %v6871_v11 = vld [vmem:[%s10604_s4 + $0x174] sm:$0xf0]  ;;  %v5512_v21 = vld [vmem:[%s10604_s4 + $0x160] sm:$0xf]  ;;  %v6869_v22 = vld [vmem:[%s10604_s4 + $0x164] sm:$0xf0] }
  0xce   :  { %2058 = vmatpush.bf16.msrb.mxu1 %v5449_v39  ;;  %v1345_v23 = vadd.f32 %v1344_v19, %v1331_v15  ;;  %v5386_v39 = vld [vmem:[%s10604_s4 + $0x68] sm:$0xf0]  ;;  %v1370_v56 = vpop.f32.mrf.mxu2  ;;  %v5521_v13 = vor.u32 %v6871_v11, %v5520_v10  ;;  %v5357_v15 = vor.u32 %v6828_v4, %v5354_v5  ;;  %v5513_v8 = vor.u32 %v6869_v22, %v5512_v21  ;;  %v6865_v60 = vld [vmem:[%s10604_s4 + $0x144] sm:$0xf0]  ;;  %v5464_v10 = vld [vmem:[%s10604_s4 + $0x100] sm:$0xf] }
  0xcf   :  { %2044 = vmatpush.bf16.msrb.mxu3 %v5385_v32  ;;  %v5389_v44 = vor.u32 %v6836_v38, %v5386_v39  ;;  %v6840_v39 = vld [vmem:[%s10604_s4 + $0x84] sm:$0xf]  ;;  %v6857_v11 = vld [vmem:[%s10604_s4 + $0x104] sm:$0xf0]  ;;  %v6887_v21 = vld [vmem:[%s10604_s4 + $0x1f4] sm:$0xf0] }
  0xd0   :  { %v1645_v32 = vmax.f32 %v1345_v23, 0.0  ;;  %2071 = vmatpush.bf16.msrb.mxu2 %v5521_v13  ;;  %v5465_v13 = vor.u32 %v6857_v11, %v5464_v10 }
  0xd1   :  { %v1358_v57 = vpop.f32.mrf.mxu3 }
  0xd2   :  { %2059 = vmatpush.bf16.msrb.mxu1 %v5441_v42  ;;  %v5453_v42 = vor.u32 %v6852_v45, %v5450_v46  ;;  %v5496_v46 = vld [vmem:[%s10604_s4 + $0x140] sm:$0xf] }
  0xd3   :  { %2045 = vmatpush.bf16.msrb.mxu3 %v5377_v41  ;;  %v1641_v41 = vmax.f32 %v1343_v28, 0.0  ;;  %v6824_v28 = vld [vmem:[%s10604_s4 + $0x4] sm:$0xf] }
  0xd4   :  { %2072 = vmatpush.bf16.msrb.mxu2 %v5513_v8  ;;  %v6866_v8 = vld [vmem:[%s10604_s4 + $0x154] sm:$0xf] }
  0xd5   :  { %5333 = vmatmul.msk.bf16.vlgmr.msra.gmra.mxu1 %vm1245_vm0, %v7642_v50  ;;  %v6827_v50 = vld [vmem:[%s10604_s4 + $0x14] sm:$0xf0]  ;;  %v8656_v43 = vpack.c.bf16 %v1645_v32, %v1641_v41  ;;  %v5504_v32 = vld [vmem:[%s10604_s4 + $0x150] sm:$0xf] }
  0xd6   :  { %2060 = vmatpush.bf16.msrb.mxu1 %v5433_v59  ;;  %v5345_v20 = vor.u32 %v6827_v50, %v5344_v16  ;;  %v6848_v59 = vld [vmem:[%s10604_s4 + $0xc4] sm:$0xf]  ;;  %v1372_v14 = vpop.f32.mrf.mxu2  ;;  %v5418_v50 = vld [vmem:[%s10604_s4 + $0xa8] sm:$0xf0] }
  0xd7   :  { %2046 = vmatpush.bf16.msrb.mxu3 %v5369_v49  ;;  %v5442_v49 = vld [vmem:[%s10604_s4 + $0xd8] sm:$0xf0]  ;;  %v5437_v0 = vor.u32 %v6848_v59, %v5434_v61  ;;  %v6844_v16 = vld [vmem:[%s10604_s4 + $0xa4] sm:$0xf]  ;;  %v5480_v61 = vld [vmem:[%s10604_s4 + $0x120] sm:$0xf] }
  0xd8   :  { %v5445_v53 = vor.u32 %v6850_v48, %v5442_v49  ;;  %v5421_v19 = vor.u32 %v6844_v16, %v5418_v50  ;;  %v5488_v49 = vld [vmem:[%s10604_s4 + $0x130] sm:$0xf]  ;;  %v6868_v50 = vld [vmem:[%s10604_s4 + $0x164] sm:$0xf] }
  0xda   :  { %2061 = vmatpush.bf16.msrb.mxu1 %v5425_v6  ;;  %v5429_v6 = vor.u32 %v6846_v2, %v5426_v3 }
  0xdb   :  { %2047 = vmatpush.bf16.msrb.mxu3 %v5361_v63  ;;  %v5362_v63 = vld [vmem:[%s10604_s4 + $0x38] sm:$0xf0] }
  0xdc   :  { %v5365_v1 = vor.u32 %v6830_v62, %v5362_v63  ;;  %v6861_v62 = vld [vmem:[%s10604_s4 + $0x124] sm:$0xf0] }
  0xde   :  { %2062 = vmatpush.bf16.msrb.mxu1 %v5417_v55  ;;  %v6826_v55 = vld [vmem:[%s10604_s4 + $0x14] sm:$0xf] }
  0xdf   :  { %2048 = vmatpush.bf16.msrb.mxu3 %v5353_v12  ;;  %v258_v12 = vperm.slane %v8529_v17, 1  ;;  %v5349_v24 = vor.u32 %v6826_v55, %v5346_v18  ;;  %v5514_v55 = vld [vmem:[%s10604_s4 + $0x168] sm:$0xf0] }
  0xe1   :  { %v1384_v7 = vpop.f32.mrf.mxu0  ;;  %v1357_v23 = vadd.f32 %v8642_v33, %v258_v12  ;;  %v1359_v27 = vadd.f32 %v1358_v57, %v258_v12  ;;  %v6867_v33 = vld [vmem:[%s10604_s4 + $0x154] sm:$0xf0] }
  0xe2   :  { %2063 = vmatpush.bf16.msrb.mxu1 %v5409_v25  ;;  %v6842_v25 = vld [vmem:[%s10604_s4 + $0x94] sm:$0xf] }
  0xe3   :  { %2049 = vmatpush.bf16.msrb.mxu3 %v5345_v20  ;;  %v1398_v20 = vpop.f32.mrf.mxu1  ;;  %v5413_v30 = vor.u32 %v6842_v25, %v5410_v26  ;;  %v1373_v41 = vadd.f32 %v1372_v14, %v1359_v27  ;;  %v6870_v14 = vld [vmem:[%s10604_s4 + $0x174] sm:$0xf]  ;;  %v5576_v26 = vld [vmem:[%s10604_s4 + $0x1e0] sm:$0xf]  ;;  %v6885_v27 = vld [vmem:[%s10604_s4 + $0x1e4] sm:$0xf0] }
  0xe6   :  { %2064 = vmatpush.bf16.msrb.mxu1 %v5401_v35  ;;  %v5505_v35 = vor.u32 %v6867_v33, %v5504_v32  ;;  %v5568_v32 = vld [vmem:[%s10604_s4 + $0x1d0] sm:$0xf]  ;;  %v6883_v33 = vld [vmem:[%s10604_s4 + $0x1d4] sm:$0xf0] }
  0xe7   :  { %2050 = vmatpush.bf16.msrb.mxu3 %v5337_v29  ;;  %v5338_v29 = vld [vmem:[%s10604_s4 + $0x8] sm:$0xf0] }
  0xe8   :  { %v5341_v38 = vor.u32 %v6824_v28, %v5338_v29  ;;  %2073 = vmatpush.bf16.msrb.mxu2 %v5505_v35  ;;  %v5577_v28 = vor.u32 %v6885_v27, %v5576_v26  ;;  %v6864_v29 = vld [vmem:[%s10604_s4 + $0x144] sm:$0xf]  ;;  %v5569_v35 = vor.u32 %v6883_v33, %v5568_v32  ;;  %v5570_v32 = vld [vmem:[%s10604_s4 + $0x1d8] sm:$0xf0] }
  0xe9   :  { %v1412_v9 = vpop.f32.mrf.mxu3  ;;  %v1386_v36 = vpop.f32.mrf.mxu0 }
  0xea   :  { %2113 = vmatpush.bf16.msra.mxu1 %v5461_v40  ;;  %2051 = vmatmul.bf16.vlgmr.msrb.gmra.mxu3 %v8656_v43  ;;  %v5402_v40 = vld [vmem:[%s10604_s4 + $0x88] sm:$0xf0]  ;;  %v1387_v37 = vadd.f32 %v1386_v36, %v1373_v41  ;;  %v5560_v41 = vld [vmem:[%s10604_s4 + $0x1c0] sm:$0xf] }
  0xeb   :  { %2099 = vmatpush.bf16.msra.mxu3 %v5397_v34  ;;  %v1371_v34 = vadd.f32 %v1370_v56, %v1357_v23  ;;  %v5405_v45 = vor.u32 %v6840_v39, %v5402_v40  ;;  %v259_v39 = vperm.slane %v8529_v17, 2 }
  0xee   :  { %2114 = vmatpush.bf16.msra.mxu1 %v5453_v42  ;;  %v1426_v54 = vpop.f32.mrf.mxu2  ;;  %v5497_v42 = vor.u32 %v6865_v60, %v5496_v46  ;;  %v6860_v60 = vld [vmem:[%s10604_s4 + $0x124] sm:$0xf] }
  0xef   :  { %2100 = vmatpush.bf16.msra.mxu3 %v5389_v44  ;;  %v1385_v44 = vadd.f32 %v1384_v7, %v1371_v34 }
  0xf0   :  { %2074 = vmatpush.bf16.msrb.mxu2 %v5497_v42 }
  0xf1   :  { %v1414_v31 = vpop.f32.mrf.mxu3  ;;  %v1399_v48 = vadd.f32 %v1398_v20, %v1385_v44  ;;  %v5584_v20 = vld [vmem:[%s10604_s4 + $0x1f0] sm:$0xf]  ;;  %v6881_v44 = vld [vmem:[%s10604_s4 + $0x1c4] sm:$0xf0] }
  0xf2   :  { %2115 = vmatpush.bf16.msra.mxu1 %v5445_v53  ;;  %v5489_v53 = vor.u32 %v6863_v51, %v5488_v49  ;;  %v5585_v22 = vor.u32 %v6887_v21, %v5584_v20  ;;  %v5561_v46 = vor.u32 %v6881_v44, %v5560_v41  ;;  %v6879_v49 = vld [vmem:[%s10604_s4 + $0x1b4] sm:$0xf0] }
  0xf3   :  { %2101 = vmatpush.bf16.msra.mxu3 %v5381_v47  ;;  %v1400_v47 = vpop.f32.mrf.mxu1  ;;  %v1413_v56 = vadd.f32 %v1412_v9, %v1399_v48  ;;  %v5552_v48 = vld [vmem:[%s10604_s4 + $0x1b0] sm:$0xf] }
  0xf4   :  { %v1401_v57 = vadd.f32 %v1400_v47, %v1387_v37  ;;  %2075 = vmatpush.bf16.msrb.mxu2 %v5489_v53  ;;  %2085 = vmatpush.bf16.msrb.mxu0 %v5585_v22  ;;  %v5482_v37 = vld [vmem:[%s10604_s4 + $0x128] sm:$0xf0]  ;;  %v5553_v51 = vor.u32 %v6879_v49, %v5552_v48 }
  0xf5   :  { %v1427_v63 = vadd.f32 %v1426_v54, %v1413_v56  ;;  %v6862_v54 = vld [vmem:[%s10604_s4 + $0x134] sm:$0xf]  ;;  %v5485_v47 = vor.u32 %v6860_v60, %v5482_v37  ;;  %v5554_v60 = vld [vmem:[%s10604_s4 + $0x1b8] sm:$0xf0] }
  0xf6   :  { %2116 = vmatpush.bf16.msra.mxu1 %v5437_v0  ;;  %v1428_v59 = vpop.f32.mrf.mxu2  ;;  %v5481_v0 = vor.u32 %v6861_v62, %v5480_v61 }
  0xf7   :  { %2102 = vmatpush.bf16.msra.mxu3 %v5373_v58  ;;  %v1415_v58 = vadd.f32 %v1414_v31, %v1401_v57  ;;  %v6858_v57 = vld [vmem:[%s10604_s4 + $0x114] sm:$0xf] }
  0xf8   :  { %2076 = vmatpush.bf16.msrb.mxu2 %v5481_v0  ;;  %2086 = vmatpush.bf16.msrb.mxu0 %v5577_v28  ;;  %v6877_v0 = vld [vmem:[%s10604_s4 + $0x1a4] sm:$0xf0] }
  0xf9   :  { %v1440_v52 = vpop.f32.mrf.mxu3  ;;  %v1429_v2 = vadd.f32 %v1428_v59, %v1415_v58  ;;  %v5474_v58 = vld [vmem:[%s10604_s4 + $0x118] sm:$0xf0] }
  0xfa   :  { %2117 = vmatpush.bf16.msra.mxu1 %v5429_v6  ;;  %v1441_v3 = vadd.f32 %v1440_v52, %v1427_v63  ;;  %v5477_v62 = vor.u32 %v6858_v57, %v5474_v58  ;;  %v5544_v63 = vld [vmem:[%s10604_s4 + $0x1a0] sm:$0xf]  ;;  %v5538_v57 = vld [vmem:[%s10604_s4 + $0x198] sm:$0xf0] }
  0xfb   :  { %2103 = vmatpush.bf16.msra.mxu3 %v5365_v1  ;;  %v5472_v1 = vld [vmem:[%s10604_s4 + $0x110] sm:$0xf] }
  0xfc   :  { %v1642_v7 = vmax.f32 %v1441_v3, 0.0  ;;  %2087 = vmatpush.bf16.msrb.mxu0 %v5569_v35  ;;  %v5466_v3 = vld [vmem:[%s10604_s4 + $0x108] sm:$0xf0] }
  0xfe   :  { %2118 = vmatpush.bf16.msra.mxu1 %v5421_v19  ;;  %v5517_v19 = vor.u32 %v6868_v50, %v5514_v55 }
  0xff   :  { %2104 = vmatpush.bf16.msra.mxu3 %v5357_v15  ;;  %v5522_v15 = vld [vmem:[%s10604_s4 + $0x178] sm:$0xf0] }
 0x100   :  { %v5525_v16 = vor.u32 %v6870_v14, %v5522_v15  ;;  %2088 = vmatpush.bf16.msrb.mxu0 %v5561_v46  ;;  %v5528_v15 = vld [vmem:[%s10604_s4 + $0x180] sm:$0xf]  ;;  %v6878_v46 = vld [vmem:[%s10604_s4 + $0x1b4] sm:$0xf] }
 0x101   :  { %v1442_v5 = vpop.f32.mrf.mxu3  ;;  %v1482_v18 = vpop.f32.mrf.mxu0  ;;  %v5557_v37 = vor.u32 %v6878_v46, %v5554_v60  ;;  %v8985_v46 = vld [vmem:[%s10607_s5] sm:$0x3] }
 0x102   :  { %2119 = vmatpush.bf16.msra.mxu1 %v5413_v30  ;;  %v1443_v6 = vadd.f32 %v1442_v5, %v1429_v2  ;;  %v1454_v23 = vpop.f32.mrf.mxu1  ;;  %v5498_v30 = vld [vmem:[%s10604_s4 + $0x148] sm:$0xf0]  ;;  %v6856_v2 = vld [vmem:[%s10604_s4 + $0x104] sm:$0xf] }
 0x103   :  { %2105 = vmatpush.bf16.msra.mxu3 %v5349_v24  ;;  %v5506_v24 = vld [vmem:[%s10604_s4 + $0x158] sm:$0xf0]  ;;  %v5501_v31 = vor.u32 %v6864_v29, %v5498_v30  ;;  %v1455_v42 = vadd.f32 %v1454_v23, %v259_v39 }
 0x104   :  { %v1646_v9 = vmax.f32 %v1443_v6, 0.0  ;;  %v5509_v25 = vor.u32 %v6866_v8, %v5506_v24  ;;  %2089 = vmatpush.bf16.msrb.mxu0 %v5553_v51  ;;  %v5469_v6 = vor.u32 %v6856_v2, %v5466_v3  ;;  %v6884_v24 = vld [vmem:[%s10604_s4 + $0x1e4] sm:$0xf] }
 0x106   :  { %2120 = vmatpush.bf16.msra.mxu1 %v5405_v45  ;;  %v1650_v12 = vpack.c.bf16 %v1646_v9, %v1642_v7  ;;  %v5536_v7 = vld [vmem:[%s10604_s4 + $0x190] sm:$0xf]  ;;  %v6875_v9 = vld [vmem:[%s10604_s4 + $0x194] sm:$0xf0] }
 0x107   :  { %2106 = vmatpush.bf16.msra.mxu3 %v5341_v38  ;;  %v5490_v38 = vld [vmem:[%s10604_s4 + $0x138] sm:$0xf0]  ;;  %v5537_v10 = vor.u32 %v6875_v9, %v5536_v7 }
 0x108   :  { %2065 = vmatmul.bf16.vlgmr.msrb.gmra.mxu1 %v1650_v12  ;;  %v5493_v40 = vor.u32 %v6862_v54, %v5490_v38 }
 0x109   :  { %v1484_v36 = vpop.f32.mrf.mxu0 }
 0x10a   :  { %2107 = vmatmul.bf16.vlgmr.msra.gmra.mxu3 %v8656_v43  ;;  %v6859_v43 = vld [vmem:[%s10604_s4 + $0x114] sm:$0xf0]  ;;  %v1456_v45 = vpop.f32.mrf.mxu1 }
 0x10b   :  { %v5473_v4 = vor.u32 %v6859_v43, %v5472_v1  ;;  %v1457_v61 = vadd.f32 %v1456_v45, %v259_v39  ;;  %v5545_v43 = vor.u32 %v6877_v0, %v5544_v63  ;;  %v6880_v39 = vld [vmem:[%s10604_s4 + $0x1c4] sm:$0xf]  ;;  %v260_v45 = vperm.slane %v8529_v17, 3 }
 0x10d   :  { %2077 = vmatpush.bf16.msrb.mxu2 %v5473_v4  ;;  %v1468_v34 = vpop.f32.mrf.mxu3  ;;  %2090 = vmatpush.bf16.msrb.mxu0 %v5545_v43 }
 0x10e   :  { %v1496_v53 = vpop.f32.mrf.mxu2  ;;  %v1469_v59 = vadd.f32 %v1468_v34, %v1455_v42  ;;  %v6876_v42 = vld [vmem:[%s10604_s4 + $0x1a4] sm:$0xf] }
 0x110   :  { %v1483_v4 = vadd.f32 %v1482_v18, %v1469_v59  ;;  %v6886_v18 = vld [vmem:[%s10604_s4 + $0x1f4] sm:$0xf]  ;;  %v6872_v59 = vld [vmem:[%s10604_s4 + $0x184] sm:$0xf] }
 0x111   :  { %2078 = vmatpush.bf16.msrb.mxu2 %v5465_v13  ;;  %v1538_v52 = vpop.f32.mrf.mxu0  ;;  %2091 = vmatpush.bf16.msrb.mxu0 %v5537_v10 }
 0x115   :  { %2127 = vmatpush.bf16.msra.mxu2 %v5525_v16  ;;  %v1470_v56 = vpop.f32.mrf.mxu3  ;;  %v6873_v16 = vld [vmem:[%s10604_s4 + $0x184] sm:$0xf0] }
 0x116   :  { %v1471_v5 = vadd.f32 %v1470_v56, %v1457_v61  ;;  %v1498_v50 = vpop.f32.mrf.mxu2  ;;  %v5529_v55 = vor.u32 %v6873_v16, %v5528_v15  ;;  %v6874_v56 = vld [vmem:[%s10604_s4 + $0x194] sm:$0xf]  ;;  %v5530_v61 = vld [vmem:[%s10604_s4 + $0x188] sm:$0xf0] }
 0x117   :  { %v5541_v58 = vor.u32 %v6874_v56, %v5538_v57 }
 0x118   :  { %2121 = vmatmul.bf16.vlgmr.msra.gmra.mxu1 %v1650_v12  ;;  %v1497_v12 = vadd.f32 %v1496_v53, %v1483_v4  ;;  %v1485_v13 = vadd.f32 %v1484_v36, %v1471_v5  ;;  %2092 = vmatpush.bf16.msrb.mxu0 %v5529_v55 }
 0x119   :  { %2128 = vmatpush.bf16.msra.mxu2 %v5517_v19  ;;  %v1540_v14 = vpop.f32.mrf.mxu0  ;;  %v5586_v19 = vld [vmem:[%s10604_s4 + $0x1f8] sm:$0xf0] }
 0x11a   :  { %v5589_v21 = vor.u32 %v6886_v18, %v5586_v19  ;;  %v1499_v23 = vadd.f32 %v1498_v50, %v1485_v13 }
 0x11c   :  { %2141 = vmatpush.bf16.msra.mxu0 %v5589_v21 }
 0x11d   :  { %2129 = vmatpush.bf16.msra.mxu2 %v5509_v25  ;;  %v5578_v25 = vld [vmem:[%s10604_s4 + $0x1e8] sm:$0xf0] }
 0x11e   :  { %v5581_v27 = vor.u32 %v6884_v24, %v5578_v25  ;;  %v5706_v25 = vld [vmem:[%s10606_s6 + $0xf0] sm:$0xf0] }
 0x120   :  { %2142 = vmatpush.bf16.msra.mxu0 %v5581_v27  ;;  %v6919_v27 = vld [vmem:[%s10606_s6 + $0xf4] sm:$0xf0] }
 0x121   :  { %2130 = vmatpush.bf16.msra.mxu2 %v5501_v31  ;;  %v6882_v31 = vld [vmem:[%s10604_s4 + $0x1d4] sm:$0xf] }
 0x122   :  { %v1510_v1 = vpop.f32.mrf.mxu1  ;;  %v5573_v35 = vor.u32 %v6882_v31, %v5570_v32  ;;  %v5714_v31 = vld [vmem:[%s10606_s6 + $0xf8] sm:$0xf0] }
 0x123   :  { %v1511_v20 = vadd.f32 %v1510_v1, %v1497_v12  ;;  %v5533_v1 = vor.u32 %v6872_v59, %v5530_v61  ;;  %v5682_v59 = vld [vmem:[%s10606_s6 + $0xb8] sm:$0xf0]  ;;  %v1719_v61 = vperm.slane %v8985_v46, 0 }
 0x124   :  { %2143 = vmatpush.bf16.msra.mxu0 %v5573_v35  ;;  %v6912_v35 = vld [vmem:[%s10606_s6 + $0xc4] sm:$0xf] }
 0x125   :  { %2131 = vmatpush.bf16.msra.mxu2 %v5493_v40  ;;  %v1566_v34 = vpop.f32.mrf.mxu0  ;;  %v5562_v40 = vld [vmem:[%s10604_s4 + $0x1c8] sm:$0xf0] }
 0x126   :  { %v5565_v44 = vor.u32 %v6880_v39, %v5562_v40  ;;  %v6915_v39 = vld [vmem:[%s10606_s6 + $0xd4] sm:$0xf0] }
 0x128   :  { %2144 = vmatpush.bf16.msra.mxu0 %v5565_v44  ;;  %v6913_v44 = vld [vmem:[%s10606_s6 + $0xcc] sm:$0xf] }
 0x129   :  { %2132 = vmatpush.bf16.msra.mxu2 %v5485_v47  ;;  %v5546_v47 = vld [vmem:[%s10604_s4 + $0x1a8] sm:$0xf0] }
 0x12a   :  { %v1512_v22 = vpop.f32.mrf.mxu1  ;;  %v5549_v51 = vor.u32 %v6876_v42, %v5546_v47  ;;  %v6910_v42 = vld [vmem:[%s10606_s6 + $0xac] sm:$0xf0]  ;;  %v6908_v47 = vld [vmem:[%s10606_s6 + $0xa4] sm:$0xf] }
 0x12b   :  { %v1513_v26 = vadd.f32 %v1512_v22, %v1499_v23  ;;  %v5704_v22 = vld [vmem:[%s10606_s6 + $0xe0] sm:$0xf]  ;;  %v6918_v23 = vld [vmem:[%s10606_s6 + $0xec] sm:$0xf0] }
 0x12c   :  { %2145 = vmatpush.bf16.msra.mxu0 %v5557_v37  ;;  %v5705_v24 = vor.u32 %v6918_v23, %v5704_v22  ;;  %v5672_v37 = vld [vmem:[%s10606_s6 + $0xa0] sm:$0xf]  ;;  %v6901_v22 = vld [vmem:[%s10606_s6 + $0x6c] sm:$0xf]  ;;  %v5650_v23 = vld [vmem:[%s10606_s6 + $0x78] sm:$0xf0] }
 0x12d   :  { %2133 = vmatpush.bf16.msra.mxu2 %v5477_v62  ;;  %v1524_v11 = vpop.f32.mrf.mxu3  ;;  %v1568_v49 = vpop.f32.mrf.mxu0 }
 0x12e   :  { %v1525_v8 = vadd.f32 %v1524_v11, %v1511_v20  ;;  %v1552_v36 = vpop.f32.mrf.mxu2  ;;  %2370 = vmatpush.bf16.msrb.mxu3 %v5705_v24 }
 0x12f   :  { %v1553_v48 = vadd.f32 %v1552_v36, %v260_v45 }
 0x130   :  { %v1539_v29 = vadd.f32 %v1538_v52, %v1525_v8  ;;  %2146 = vmatpush.bf16.msra.mxu0 %v5549_v51  ;;  %v6916_v8 = vld [vmem:[%s10606_s6 + $0xe4] sm:$0xf]  ;;  %v5674_v51 = vld [vmem:[%s10606_s6 + $0xb0] sm:$0xf0] }
 0x131   :  { %2134 = vmatpush.bf16.msra.mxu2 %v5469_v6  ;;  %v1567_v53 = vadd.f32 %v1566_v34, %v1553_v48  ;;  %v6914_v34 = vld [vmem:[%s10606_s6 + $0xcc] sm:$0xf0]  ;;  %v5677_v56 = vor.u32 %v6908_v47, %v5674_v51  ;;  %v5610_v47 = vld [vmem:[%s10606_s6 + $0x30] sm:$0xf0] }
 0x132   :  { %v1643_v54 = vmax.f32 %v1539_v29, 0.0 }
 0x134   :  { %2147 = vmatpush.bf16.msra.mxu0 %v5541_v58  ;;  %v6909_v58 = vld [vmem:[%s10606_s6 + $0xac] sm:$0xf] }
 0x135   :  { %v1526_v28 = vpop.f32.mrf.mxu3 }
 0x136   :  { %v1527_v30 = vadd.f32 %v1526_v28, %v1513_v26  ;;  %v1554_v52 = vpop.f32.mrf.mxu2  ;;  %v5712_v26 = vld [vmem:[%s10606_s6 + $0xe8] sm:$0xf]  ;;  %v5709_v28 = vor.u32 %v6916_v8, %v5706_v25  ;;  %v5653_v25 = vor.u32 %v6901_v22, %v5650_v23 }
 0x137   :  { %v1555_v43 = vadd.f32 %v1554_v52, %v260_v45  ;;  %v5713_v29 = vor.u32 %v6919_v27, %v5712_v26  ;;  %v5698_v45 = vld [vmem:[%s10606_s6 + $0xd8] sm:$0xf0]  ;;  %v5680_v52 = vld [vmem:[%s10606_s6 + $0xa8] sm:$0xf]  ;;  %v5624_v27 = vld [vmem:[%s10606_s6 + $0x40] sm:$0xf] }
 0x138   :  { %v1541_v33 = vadd.f32 %v1540_v14, %v1527_v30  ;;  %2148 = vmatpush.bf16.msra.mxu0 %v5533_v1  ;;  %v6917_v30 = vld [vmem:[%s10606_s6 + $0xec] sm:$0xf]  ;;  %2384 = vmatpush.bf16.msrb.mxu1 %v5709_v28  ;;  %v5701_v60 = vor.u32 %v6913_v44, %v5698_v45  ;;  %v6906_v1 = vld [vmem:[%s10606_s6 + $0x8c] sm:$0xf0]  ;;  %v5608_v45 = vld [vmem:[%s10606_s6 + $0x20] sm:$0xf] }
 0x139   :  { %v1569_v5 = vadd.f32 %v1568_v49, %v1555_v43  ;;  %v5717_v32 = vor.u32 %v6917_v30, %v5714_v31  ;;  %v5673_v49 = vor.u32 %v6910_v42, %v5672_v37  ;;  %v6904_v43 = vld [vmem:[%s10606_s6 + $0x84] sm:$0xf]  ;;  %v6898_v28 = vld [vmem:[%s10606_s6 + $0x4c] sm:$0xf0] }
 0x13a   :  { %v1647_v38 = vmax.f32 %v1541_v33, 0.0  ;;  %v5688_v33 = vld [vmem:[%s10606_s6 + $0xc0] sm:$0xf]  ;;  %v6892_v37 = vld [vmem:[%s10606_s6 + $0x24] sm:$0xf] }
 0x13b   :  { %v5689_v36 = vor.u32 %v6914_v34, %v5688_v33  ;;  %v5626_v33 = vld [vmem:[%s10606_s6 + $0x50] sm:$0xf0]  ;;  %v5632_v34 = vld [vmem:[%s10606_s6 + $0x48] sm:$0xf] }
 0x13c   :  { %v1651_v41 = vpack.c.bf16 %v1647_v38, %v1643_v54  ;;  %v5690_v54 = vld [vmem:[%s10606_s6 + $0xd0] sm:$0xf0]  ;;  %v5696_v38 = vld [vmem:[%s10606_s6 + $0xc8] sm:$0xf] }
 0x13d   :  { %v5693_v40 = vor.u32 %v6912_v35, %v5690_v54  ;;  %2371 = vmatpush.bf16.msrb.mxu3 %v5689_v36  ;;  %v6899_v35 = vld [vmem:[%s10606_s6 + $0x54] sm:$0xf0] }
 0x13e   :  { %2079 = vmatmul.bf16.vlgmr.msrb.gmra.mxu2 %v1651_v41 }
 0x13f   :  { %2398 = vmatpush.bf16.msrb.mxu2 %v5713_v29  ;;  %2385 = vmatpush.bf16.msrb.mxu1 %v5693_v40  ;;  %v6896_v29 = vld [vmem:[%s10606_s6 + $0x44] sm:$0xf]  ;;  %v5634_v40 = vld [vmem:[%s10606_s6 + $0x58] sm:$0xf0] }
 0x140   :  { %v5629_v54 = vor.u32 %v6896_v29, %v5626_v33  ;;  %v6972_v29 = vld [vmem:[%s10609_s8 + $0x1a0] sm:$0xf0] }
 0x141   :  { %2372 = vmatpush.bf16.msrb.mxu3 %v5673_v49  ;;  %v1720_v49 = vperm.slane %v8985_v46, 1 }
 0x142   :  { %v1580_v17 = vpop.f32.mrf.mxu1 }
 0x143   :  { %v1581_v63 = vadd.f32 %v1580_v17, %v1567_v53  ;;  %v6911_v53 = vld [vmem:[%s10606_s6 + $0xb4] sm:$0xf0]  ;;  %2386 = vmatpush.bf16.msrb.mxu1 %v5677_v56  ;;  %v6893_v56 = vld [vmem:[%s10606_s6 + $0x2c] sm:$0xf] }
 0x144   :  { %v5681_v57 = vor.u32 %v6911_v53, %v5680_v52  ;;  %v5613_v52 = vor.u32 %v6892_v37, %v5610_v47  ;;  %v6336_v47 = vld [vmem:[%s10609_s8 + $0x4d0] sm:$0xf] }
 0x145   :  { %v1622_v3 = vpop.f32.mrf.mxu0 }
 0x14a   :  { %v1582_v62 = vpop.f32.mrf.mxu1 }
 0x14b   :  { %v1583_v7 = vadd.f32 %v1582_v62, %v1569_v5  ;;  %v6907_v5 = vld [vmem:[%s10606_s6 + $0x94] sm:$0xf0] }
 0x14d   :  { %v1594_v0 = vpop.f32.mrf.mxu3  ;;  %v1624_v15 = vpop.f32.mrf.mxu0 }
 0x14e   :  { %v1608_v2 = vpop.f32.mrf.mxu2  ;;  %v1595_v4 = vadd.f32 %v1594_v0, %v1581_v63  ;;  %2135 = vmatmul.bf16.vlgmr.msra.gmra.mxu2 %v1651_v41  ;;  %v5697_v41 = vor.u32 %v6915_v39, %v5696_v38  ;;  %v5685_v63 = vor.u32 %v6909_v58, %v5682_v59  ;;  %v5656_v0 = vld [vmem:[%s10606_s6 + $0x80] sm:$0xf]  ;;  %v5633_v38 = vor.u32 %v6899_v35, %v5632_v34  ;;  %v6897_v39 = vld [vmem:[%s10606_s6 + $0x4c] sm:$0xf] }
 0x150   :  { %v1609_v6 = vadd.f32 %v1608_v2, %v1595_v4  ;;  %2399 = vmatpush.bf16.msrb.mxu2 %v5697_v41  ;;  %v5657_v2 = vor.u32 %v6906_v1, %v5656_v0  ;;  %v5664_v4 = vld [vmem:[%s10606_s6 + $0x88] sm:$0xf]  ;;  %v5637_v41 = vor.u32 %v6897_v39, %v5634_v40  ;;  %v6532_v39 = vld [vmem:[%s10609_s8 + $0x658] sm:$0xf] }
 0x152   :  { %v1636_v9 = vpop.f32.mrf.mxu1  ;;  %v1623_v12 = vadd.f32 %v1622_v3, %v1609_v6  ;;  %v5658_v3 = vld [vmem:[%s10606_s6 + $0x90] sm:$0xf0]  ;;  %2373 = vmatpush.bf16.msrb.mxu3 %v5657_v2  ;;  %v5600_v2 = vld [vmem:[%s10606_s6 + $0x8] sm:$0xf] }
 0x153   :  { %v5661_v6 = vor.u32 %v6904_v43, %v5658_v3  ;;  %v5594_v43 = vld [vmem:[%s10606_s6 + $0x10] sm:$0xf0]  ;;  %v6891_v3 = vld [vmem:[%s10606_s6 + $0x14] sm:$0xf0] }
 0x154   :  { %v1637_v50 = vadd.f32 %v1636_v9, %v1623_v12  ;;  %2400 = vmatpush.bf16.msrb.mxu2 %v5681_v57  ;;  %v6905_v9 = vld [vmem:[%s10606_s6 + $0x8c] sm:$0xf]  ;;  %v5618_v57 = vld [vmem:[%s10606_s6 + $0x38] sm:$0xf0] }
 0x155   :  { %v1596_v10 = vpop.f32.mrf.mxu3  ;;  %2387 = vmatpush.bf16.msrb.mxu1 %v5661_v6  ;;  %v5621_v59 = vor.u32 %v6893_v56, %v5618_v57  ;;  %v6504_v57 = vld [vmem:[%s10609_s8 + $0x620] sm:$0xf] }
 0x156   :  { %v1597_v11 = vadd.f32 %v1596_v10, %v1583_v7  ;;  %v1610_v13 = vpop.f32.mrf.mxu2  ;;  %v1644_v19 = vmax.f32 %v1637_v50, 0.0  ;;  %v5665_v7 = vor.u32 %v6907_v5, %v5664_v4  ;;  %v5666_v10 = vld [vmem:[%s10606_s6 + $0x98] sm:$0xf0]  ;;  %v5642_v50 = vld [vmem:[%s10606_s6 + $0x70] sm:$0xf0] }
 0x158   :  { %v1611_v14 = vadd.f32 %v1610_v13, %v1597_v11  ;;  %v5669_v11 = vor.u32 %v6905_v9, %v5666_v10  ;;  %2401 = vmatpush.bf16.msrb.mxu2 %v5665_v7  ;;  %v5640_v13 = vld [vmem:[%s10606_s6 + $0x60] sm:$0xf]  ;;  %v5601_v7 = vor.u32 %v6891_v3, %v5600_v2  ;;  %v6889_v9 = vld [vmem:[%s10606_s6 + $0xc] sm:$0xf]  ;;  %v5602_v10 = vld [vmem:[%s10606_s6 + $0x18] sm:$0xf0] }
 0x15a   :  { %v1625_v16 = vadd.f32 %v1624_v15, %v1611_v14  ;;  %v1638_v55 = vpop.f32.mrf.mxu1  ;;  %v6902_v14 = vld [vmem:[%s10606_s6 + $0x6c] sm:$0xf0]  ;;  %v6900_v15 = vld [vmem:[%s10606_s6 + $0x64] sm:$0xf] }
 0x15c   :  { %v1639_v18 = vadd.f32 %v1638_v55, %v1625_v16  ;;  %v5641_v16 = vor.u32 %v6902_v14, %v5640_v13  ;;  %v5648_v55 = vld [vmem:[%s10606_s6 + $0x68] sm:$0xf] }
 0x15e   :  { %v1648_v20 = vmax.f32 %v1639_v18, 0.0  ;;  %v6903_v18 = vld [vmem:[%s10606_s6 + $0x74] sm:$0xf0]  ;;  %2374 = vmatpush.bf16.msrb.mxu3 %v5641_v16  ;;  %v6140_v16 = vld [vmem:[%s10609_s8 + $0x348] sm:$0xf] }
 0x160   :  { %v1652_v21 = vpack.c.bf16 %v1648_v20, %v1644_v19  ;;  %v5645_v20 = vor.u32 %v6900_v15, %v5642_v50  ;;  %v7028_v50 = vld [vmem:[%s10609_s8 + $0x360] sm:$0xf0] }
 0x162   :  { %2093 = vmatmul.bf16.vlgmr.msrb.gmra.mxu0 %v1652_v21  ;;  %2388 = vmatpush.bf16.msrb.mxu1 %v5645_v20  ;;  %v6112_v20 = vld [vmem:[%s10609_s8 + $0x310] sm:$0xf] }
 0x163   :  { %2412 = vmatpush.bf16.msrb.mxu0 %v5717_v32  ;;  %v5625_v32 = vor.u32 %v6898_v28, %v5624_v27 }
 0x165   :  { %2375 = vmatpush.bf16.msrb.mxu3 %v5625_v32 }
 0x166   :  { %2389 = vmatpush.bf16.msrb.mxu1 %v5629_v54  ;;  %v6084_v54 = vld [vmem:[%s10609_s8 + $0x2d8] sm:$0xf] }
 0x167   :  { %2413 = vmatpush.bf16.msrb.mxu0 %v5701_v60  ;;  %v6894_v60 = vld [vmem:[%s10606_s6 + $0x2c] sm:$0xf0] }
 0x168   :  { %v5609_v42 = vor.u32 %v6894_v60, %v5608_v45  ;;  %v6965_v45 = vld [vmem:[%s10609_s8 + $0x168] sm:$0xf0] }
 0x16a   :  { %2376 = vmatpush.bf16.msrb.mxu3 %v5609_v42  ;;  %2390 = vmatpush.bf16.msrb.mxu1 %v5613_v52  ;;  %v7007_v52 = vld [vmem:[%s10609_s8 + $0x2b8] sm:$0xf0] }
 0x16b   :  { %2414 = vmatpush.bf16.msrb.mxu0 %v5685_v63  ;;  %v6888_v63 = vld [vmem:[%s10606_s6 + $0x4] sm:$0xf] }
 0x16c   :  { %v5597_v6 = vor.u32 %v6888_v63, %v5594_v43  ;;  %v7070_v63 = vld [vmem:[%s10609_s8 + $0x4b0] sm:$0xf0] }
 0x16d   :  { %v2052_v17 = vpop.f32.mrf.mxu3 }
 0x16e   :  { %v2053_v12 = vadd.f32 %v2052_v17, %v1719_v61  ;;  %v5616_v17 = vld [vmem:[%s10606_s6 + $0x28] sm:$0xf]  ;;  %2391 = vmatpush.bf16.msrb.mxu1 %v5597_v6  ;;  %v5832_v6 = vld [vmem:[%s10609_s8 + $0xe0] sm:$0xf] }
 0x16f   :  { %2415 = vmatpush.bf16.msrb.mxu0 %v5669_v11 }
 0x172   :  { %2149 = vmatmul.bf16.vlgmr.msra.gmra.mxu0 %v1652_v21  ;;  %v5649_v21 = vor.u32 %v6903_v18, %v5648_v55  ;;  %v6588_v55 = vld [vmem:[%s10609_s8 + $0x6c8] sm:$0xf]  ;;  %v6141_v18 = vor.u32 %v7028_v50, %v6140_v16  ;;  %v7112_v16 = vld [vmem:[%s10609_s8 + $0x600] sm:$0xf0] }
 0x173   :  { %2416 = vmatpush.bf16.msrb.mxu0 %v5653_v25  ;;  %v5916_v25 = vld [vmem:[%s10609_s8 + $0x188] sm:$0xf] }
 0x174   :  { %2402 = vmatpush.bf16.msrb.mxu2 %v5649_v21  ;;  %v7021_v21 = vld [vmem:[%s10609_s8 + $0x328] sm:$0xf0]  ;;  %3876 = vmatpush.bf16.msra.mxu1 %v6141_v18  ;;  %v5917_v34 = vor.u32 %v6972_v29, %v5916_v25  ;;  %v6000_v25 = vld [vmem:[%s10609_s8 + $0x230] sm:$0xf] }
 0x175   :  { %v2054_v8 = vpop.f32.mrf.mxu3  ;;  %v6113_v28 = vor.u32 %v7021_v21, %v6112_v20  ;;  %v6944_v21 = vld [vmem:[%s10609_s8 + $0xc0] sm:$0xf0] }
 0x176   :  { %v2055_v44 = vadd.f32 %v2054_v8, %v1719_v61  ;;  %v5592_v61 = vld [vmem:[%s10606_s6] sm:$0xf]  ;;  %v6560_v8 = vld [vmem:[%s10609_s8 + $0x690] sm:$0xf] }
 0x177   :  { %2417 = vmatpush.bf16.msrb.mxu0 %v5637_v41  ;;  %v7126_v41 = vld [vmem:[%s10609_s8 + $0x670] sm:$0xf0] }
 0x178   :  { %2403 = vmatpush.bf16.msrb.mxu2 %v5633_v38  ;;  %v7014_v38 = vld [vmem:[%s10609_s8 + $0x2f0] sm:$0xf0]  ;;  %3877 = vmatpush.bf16.msra.mxu1 %v6113_v28  ;;  %v6533_v56 = vor.u32 %v7126_v41, %v6532_v39  ;;  %v7105_v28 = vld [vmem:[%s10609_s8 + $0x5c8] sm:$0xf0] }
 0x179   :  { %v6085_v46 = vor.u32 %v7014_v38, %v6084_v54  ;;  %v2155_v38 = vld [vmem:[%s10610_s1] sm:$0xff]  ;;  %v6986_v41 = vld [vmem:[%s10609_s8 + $0x210] sm:$0xf0] }
 0x17b   :  { %2418 = vmatpush.bf16.msrb.mxu0 %v5621_v59  ;;  %v5860_v59 = vld [vmem:[%s10609_s8 + $0x118] sm:$0xf] }
 0x17c   :  { %3878 = vmatpush.bf16.msra.mxu1 %v6085_v46  ;;  %v6930_v46 = vld [vmem:[%s10609_s8 + $0x50] sm:$0xf0] }
 0x185   :  { %v2066_v48 = vpop.f32.mrf.mxu1 }
 0x186   :  { %v2067_v19 = vadd.f32 %v2066_v48, %v2053_v12  ;;  %v6895_v48 = vld [vmem:[%s10606_s6 + $0x34] sm:$0xf0]  ;;  %v5605_v12 = vor.u32 %v6889_v9, %v5602_v10 }
 0x187   :  { %v5617_v53 = vor.u32 %v6895_v48, %v5616_v17  ;;  %v7077_v17 = vld [vmem:[%s10609_s8 + $0x4e8] sm:$0xf0] }
 0x188   :  { %2419 = vmatpush.bf16.msrb.mxu0 %v5605_v12  ;;  %v7000_v12 = vld [vmem:[%s10609_s8 + $0x280] sm:$0xf0] }
 0x189   :  { %2404 = vmatpush.bf16.msrb.mxu2 %v5617_v53 }
 0x18d   :  { %v2068_v24 = vpop.f32.mrf.mxu1  ;;  %v2108_v58 = vpop.f32.mrf.mxu3  ;;  %2405 = vmatpush.bf16.msrb.mxu2 %v5601_v7  ;;  %v6951_v7 = vld [vmem:[%s10609_s8 + $0xf8] sm:$0xf0] }
 0x18e   :  { %v2069_v51 = vadd.f32 %v2068_v24, %v2055_v44  ;;  %v2109_v14 = vadd.f32 %v2108_v58, %v1720_v49  ;;  %v7133_v24 = vld [vmem:[%s10609_s8 + $0x6a8] sm:$0xf0]  ;;  %v5888_v44 = vld [vmem:[%s10609_s8 + $0x150] sm:$0xf]  ;;  %v7119_v58 = vld [vmem:[%s10609_s8 + $0x638] sm:$0xf0] }
 0x18f   :  { %v6561_v33 = vor.u32 %v7133_v24, %v6560_v8  ;;  %v5889_v42 = vor.u32 %v6965_v45, %v5888_v44  ;;  %v6505_v10 = vor.u32 %v7119_v58, %v6504_v57  ;;  %v6420_v44 = vld [vmem:[%s10609_s8 + $0x578] sm:$0xf]  ;;  %v7098_v45 = vld [vmem:[%s10609_s8 + $0x590] sm:$0xf0]  ;;  %v6979_v58 = vld [vmem:[%s10609_s8 + $0x1d8] sm:$0xf0] }
 0x195   :  { %v2122_v4 = vpop.f32.mrf.mxu1 }
 0x196   :  { %v2123_v15 = vadd.f32 %v2122_v4, %v2109_v14  ;;  %v7063_v14 = vld [vmem:[%s10609_s8 + $0x478] sm:$0xf0] }
 0x19d   :  { %v2124_v40 = vpop.f32.mrf.mxu1 }
 0x1c1   :  { %v2080_v62 = vpop.f32.mrf.mxu2 }
 0x1c2   :  { %v2081_v26 = vadd.f32 %v2080_v62, %v2067_v19  ;;  %v6890_v62 = vld [vmem:[%s10606_s6 + $0xc] sm:$0xf0]  ;;  %v7140_v19 = vld [vmem:[%s10609_s8 + $0x6e0] sm:$0xf0] }
 0x1c3   :  { %v5593_v1 = vor.u32 %v6890_v62, %v5592_v61  ;;  %v6589_v23 = vor.u32 %v7140_v19, %v6588_v55  ;;  %v6958_v61 = vld [vmem:[%s10609_s8 + $0x130] sm:$0xf0]  ;;  %v6308_v62 = vld [vmem:[%s10609_s8 + $0x498] sm:$0xf]  ;;  %v5833_v55 = vor.u32 %v6951_v7, %v5832_v6  ;;  %v5804_v19 = vld [vmem:[%s10609_s8 + $0xa8] sm:$0xf] }
 0x1c4   :  { %v5861_v43 = vor.u32 %v6958_v61, %v5860_v59  ;;  %v6309_v2 = vor.u32 %v7070_v63, %v6308_v62  ;;  %v5805_v29 = vor.u32 %v6944_v21, %v5804_v19  ;;  %v6392_v59 = vld [vmem:[%s10609_s8 + $0x540] sm:$0xf]  ;;  %v7091_v61 = vld [vmem:[%s10609_s8 + $0x558] sm:$0xf0]  ;;  %v7025_v62 = vld [vmem:[%s10609_s8 + $0x34c] sm:$0xf] }
 0x1c5   :  { %2377 = vmatpush.bf16.msrb.mxu3 %v5593_v1  ;;  %3904 = vmatpush.bf16.msra.mxu0 %v6589_v23  ;;  %v7056_v23 = vld [vmem:[%s10609_s8 + $0x440] sm:$0xf0]  ;;  %v6142_v63 = vld [vmem:[%s10609_s8 + $0x364] sm:$0xf0]  ;;  %v6923_v6 = vld [vmem:[%s10609_s8 + $0x18] sm:$0xf0] }
 0x1c6   :  { %v6969_v7 = vld [vmem:[%s10609_s8 + $0x18c] sm:$0xf]  ;;  %v7130_v19 = vld [vmem:[%s10609_s8 + $0x694] sm:$0xf] }
 0x1c9   :  { %v2082_v30 = vpop.f32.mrf.mxu2  ;;  %3862 = vmatpush.bf16.msra.mxu3 %v5917_v34  ;;  %3905 = vmatpush.bf16.msra.mxu0 %v6561_v33  ;;  %v6937_v33 = vld [vmem:[%s10609_s8 + $0x88] sm:$0xf0]  ;;  %v6224_v34 = vld [vmem:[%s10609_s8 + $0x3f0] sm:$0xf] }
 0x1ca   :  { %v2083_v0 = vadd.f32 %v2082_v30, %v2069_v51  ;;  %v6364_v30 = vld [vmem:[%s10609_s8 + $0x508] sm:$0xf]  ;;  %v6056_v51 = vld [vmem:[%s10609_s8 + $0x2a0] sm:$0xf] }
 0x1cb   :  { %v6057_v4 = vor.u32 %v7007_v52, %v6056_v51  ;;  %v7042_v51 = vld [vmem:[%s10609_s8 + $0x3d0] sm:$0xf0] }
 0x1cd   :  { %3863 = vmatpush.bf16.msra.mxu3 %v5889_v42  ;;  %3906 = vmatpush.bf16.msra.mxu0 %v6533_v56  ;;  %v5944_v56 = vld [vmem:[%s10609_s8 + $0x1c0] sm:$0xf] }
 0x1ce   :  { %3879 = vmatpush.bf16.msra.mxu1 %v6057_v4  ;;  %v6590_v4 = vld [vmem:[%s10609_s8 + $0x6e4] sm:$0xf0] }
 0x1d1   :  { %v2136_v13 = vpop.f32.mrf.mxu2  ;;  %3864 = vmatpush.bf16.msra.mxu3 %v5861_v43  ;;  %3907 = vmatpush.bf16.msra.mxu0 %v6505_v10  ;;  %v5945_v10 = vor.u32 %v6979_v58, %v5944_v56  ;;  %v6478_v56 = vld [vmem:[%s10609_s8 + $0x604] sm:$0xf0]  ;;  %v6948_v58 = vld [vmem:[%s10609_s8 + $0xe4] sm:$0xf] }
 0x1d2   :  { %v2137_v22 = vadd.f32 %v2136_v13, %v2123_v15  ;;  %v6280_v13 = vld [vmem:[%s10609_s8 + $0x460] sm:$0xf]  ;;  %v6476_v15 = vld [vmem:[%s10609_s8 + $0x5e8] sm:$0xf] }
 0x1d3   :  { %v6281_v18 = vor.u32 %v7063_v14, %v6280_v13  ;;  %v6477_v24 = vor.u32 %v7112_v16, %v6476_v15  ;;  %v5918_v13 = vld [vmem:[%s10609_s8 + $0x1a4] sm:$0xf0]  ;;  %v7081_v14 = vld [vmem:[%s10609_s8 + $0x50c] sm:$0xf]  ;;  %v6145_v16 = vor.u32 %v7025_v62, %v6142_v63  ;;  %v6282_v63 = vld [vmem:[%s10609_s8 + $0x47c] sm:$0xf0] }
 0x1d4   :  { %v6366_v15 = vld [vmem:[%s10609_s8 + $0x524] sm:$0xf0] }
 0x1d5   :  { %3865 = vmatpush.bf16.msra.mxu3 %v5833_v55  ;;  %3908 = vmatpush.bf16.msra.mxu0 %v6477_v24  ;;  %v7018_v55 = vld [vmem:[%s10609_s8 + $0x314] sm:$0xf] }
 0x1d6   :  { %v6962_v24 = vld [vmem:[%s10609_s8 + $0x154] sm:$0xf] }
 0x1d9   :  { %v2138_v48 = vpop.f32.mrf.mxu2  ;;  %3866 = vmatpush.bf16.msra.mxu3 %v5805_v29 }
 0x1df   :  { %v2094_v31 = vpop.f32.mrf.mxu0 }
 0x1e0   :  { %v9078_v36 = vadd.f32 %v2094_v31, %v2081_v26  ;;  %v2110_v26 = vpop.f32.mrf.mxu3  ;;  %v7084_v31 = vld [vmem:[%s10609_s8 + $0x520] sm:$0xf0] }
 0x1e1   :  { %v6365_v35 = vor.u32 %v7084_v31, %v6364_v30  ;;  %v2111_v60 = vadd.f32 %v2110_v26, %v1720_v49  ;;  %v6337_v49 = vor.u32 %v7077_v17, %v6336_v47  ;;  %v6993_v26 = vld [vmem:[%s10609_s8 + $0x248] sm:$0xf0]  ;;  %v5776_v31 = vld [vmem:[%s10609_s8 + $0x70] sm:$0xf]  ;;  %v5748_v47 = vld [vmem:[%s10609_s8 + $0x38] sm:$0xf] }
 0x1e2   :  { %4534 = vst [vmem:[%s10608_s11] sm:$0xff] %v9078_v36 }
 0x1e3   :  { %3890 = vmatpush.bf16.msra.mxu2 %v6365_v35  ;;  %v2125_v53 = vadd.f32 %v2124_v40, %v2111_v60  ;;  %v7049_v35 = vld [vmem:[%s10609_s8 + $0x408] sm:$0xf0]  ;;  %v5972_v40 = vld [vmem:[%s10609_s8 + $0x1f8] sm:$0xf] }
 0x1e4   :  { %v2156_v60 = vld [vmem:[%s10610_s1 + $0x8] sm:$0xff]  ;;  %v6225_v42 = vor.u32 %v7049_v35, %v6224_v34 }
 0x1e7   :  { %v2096_v5 = vpop.f32.mrf.mxu0  ;;  %3891 = vmatpush.bf16.msra.mxu2 %v6337_v49  ;;  %v6196_v49 = vld [vmem:[%s10609_s8 + $0x3b8] sm:$0xf] }
 0x1e8   :  { %v9139_v11 = vadd.f32 %v2096_v5, %v2083_v0  ;;  %v2139_v0 = vadd.f32 %v2138_v48, %v2125_v53  ;;  %v6028_v5 = vld [vmem:[%s10609_s8 + $0x268] sm:$0xf]  ;;  %v5973_v48 = vor.u32 %v6986_v41, %v5972_v40  ;;  %v6421_v53 = vor.u32 %v7098_v45, %v6420_v44  ;;  %v6058_v40 = vld [vmem:[%s10609_s8 + $0x2bc] sm:$0xf0]  ;;  %v7116_v41 = vld [vmem:[%s10609_s8 + $0x624] sm:$0xf] }
 0x1e9   :  { %v6029_v20 = vor.u32 %v7000_v12, %v6028_v5  ;;  %v6197_v43 = vor.u32 %v7042_v51, %v6196_v49  ;;  %v5720_v5 = vld [vmem:[%s10609_s8] sm:$0xf]  ;;  %v6393_v12 = vor.u32 %v7091_v61, %v6392_v59  ;;  %v6997_v49 = vld [vmem:[%s10609_s8 + $0x26c] sm:$0xf]  ;;  %v6030_v51 = vld [vmem:[%s10609_s8 + $0x284] sm:$0xf0] }
 0x1ea   :  { %4536 = vst [vmem:[%s10608_s11 + $0x10] sm:$0xff] %v9139_v11  ;;  %v5721_v21 = vor.u32 %v6923_v6, %v5720_v5  ;;  %v6506_v44 = vld [vmem:[%s10609_s8 + $0x63c] sm:$0xf0]  ;;  %v7060_v61 = vld [vmem:[%s10609_s8 + $0x464] sm:$0xf] }
 0x1eb   :  { %3892 = vmatpush.bf16.msra.mxu2 %v6309_v2  ;;  %3880 = vmatpush.bf16.msra.mxu1 %v6029_v20  ;;  %v6562_v20 = vld [vmem:[%s10609_s8 + $0x6ac] sm:$0xf0]  ;;  %v5834_v59 = vld [vmem:[%s10609_s8 + $0xfc] sm:$0xf0]  ;;  %v6941_v6 = vld [vmem:[%s10609_s8 + $0xac] sm:$0xf] }
 0x1ec   :  { %v6565_v29 = vor.u32 %v7130_v19, %v6562_v20  ;;  %v5837_v62 = vor.u32 %v6948_v58, %v5834_v59  ;;  %v7046_v19 = vld [vmem:[%s10609_s8 + $0x3f4] sm:$0xf]  ;;  %v6596_v59 = vld [vmem:[%s10609_s8 + $0x6d0] sm:$0xf] }
 0x1ef   :  { %v2150_v27 = vpop.f32.mrf.mxu0  ;;  %3893 = vmatpush.bf16.msra.mxu2 %v6281_v18  ;;  %v6114_v18 = vld [vmem:[%s10609_s8 + $0x32c] sm:$0xf0] }
 0x1f0   :  { %v2151_v32 = vadd.f32 %v2150_v27, %v2137_v22  ;;  %v6252_v22 = vld [vmem:[%s10609_s8 + $0x428] sm:$0xf]  ;;  %v6448_v27 = vld [vmem:[%s10609_s8 + $0x5b0] sm:$0xf] }
 0x1f1   :  { %v6253_v30 = vor.u32 %v7056_v23, %v6252_v22  ;;  %v6449_v39 = vor.u32 %v7105_v28, %v6448_v27  ;;  %v5921_v23 = vor.u32 %v6969_v7, %v5918_v13  ;;  %v6338_v27 = vld [vmem:[%s10609_s8 + $0x4ec] sm:$0xf0]  ;;  %v6117_v28 = vor.u32 %v7018_v55, %v6114_v18  ;;  %v7053_v7 = vld [vmem:[%s10609_s8 + $0x42c] sm:$0xf]  ;;  %v5974_v13 = vld [vmem:[%s10609_s8 + $0x214] sm:$0xf0] }
 0x1f2   :  { %v2157_v37 = vmul.f32 0.5, %v2151_v32  ;;  %4535 = vst [vmem:[%s10608_s11 + $0x8] sm:$0xff] %v2151_v32  ;;  %v6001_v32 = vor.u32 %v6993_v26, %v6000_v25  ;;  %v5890_v25 = vld [vmem:[%s10609_s8 + $0x16c] sm:$0xf0]  ;;  %v7074_v26 = vld [vmem:[%s10609_s8 + $0x4d4] sm:$0xf] }
 0x1f3   :  { %3894 = vmatpush.bf16.msra.mxu2 %v6253_v30  ;;  %3909 = vmatpush.bf16.msra.mxu0 %v6449_v39  ;;  %v7011_v30 = vld [vmem:[%s10609_s8 + $0x2dc] sm:$0xf]  ;;  %v5893_v34 = vor.u32 %v6962_v24, %v5890_v25  ;;  %v6341_v35 = vor.u32 %v7074_v26, %v6338_v27  ;;  %v7004_v39 = vld [vmem:[%s10609_s8 + $0x2a4] sm:$0xf]  ;;  %v6934_v55 = vld [vmem:[%s10609_s8 + $0x74] sm:$0xf] }
 0x1f4   :  { %v2159_v1 = vmul.f32 1.442695, %v2157_v37  ;;  %v5777_v37 = vor.u32 %v6937_v33, %v5776_v31  ;;  %3881 = vmatpush.bf16.msra.mxu1 %v6001_v32  ;;  %v6086_v31 = vld [vmem:[%s10609_s8 + $0x2f4] sm:$0xf0]  ;;  %v7123_v32 = vld [vmem:[%s10609_s8 + $0x65c] sm:$0xf]  ;;  %v6061_v45 = vor.u32 %v7004_v39, %v6058_v40 }
 0x1f5   :  { %v6534_v33 = vld [vmem:[%s10609_s8 + $0x674] sm:$0xf0]  ;;  %v5778_v18 = vld [vmem:[%s10609_s8 + $0x8c] sm:$0xf0]  ;;  %v7088_v24 = vld [vmem:[%s10609_s8 + $0x544] sm:$0xf] }
 0x1f6   :  { %7144 = vpow2.f32 %v2159_v1  ;;  %3867 = vmatpush.bf16.msra.mxu3 %v5777_v37  ;;  %v5749_v1 = vor.u32 %v6930_v46, %v5748_v47  ;;  %v6955_v37 = vld [vmem:[%s10609_s8 + $0x11c] sm:$0xf]  ;;  %v5781_v20 = vor.u32 %v6934_v55, %v5778_v18  ;;  %v6394_v26 = vld [vmem:[%s10609_s8 + $0x55c] sm:$0xf0]  ;;  %v6372_v55 = vld [vmem:[%s10609_s8 + $0x510] sm:$0xf] }
 0x1f7   :  { %v2152_v3 = vpop.f32.mrf.mxu0  ;;  %3895 = vmatpush.bf16.msra.mxu2 %v6225_v42  ;;  %3910 = vmatpush.bf16.msra.mxu0 %v6421_v53  ;;  %v5862_v42 = vld [vmem:[%s10609_s8 + $0x134] sm:$0xf0]  ;;  %v7067_v47 = vld [vmem:[%s10609_s8 + $0x49c] sm:$0xf]  ;;  %v7109_v53 = vld [vmem:[%s10609_s8 + $0x5ec] sm:$0xf]  ;;  %v6397_v27 = vor.u32 %v7088_v24, %v6394_v26 }
 0x1f8   :  { %v2153_v9 = vadd.f32 %v2152_v3, %v2139_v0  ;;  %v7137_v0 = vld [vmem:[%s10609_s8 + $0x6cc] sm:$0xf]  ;;  %3882 = vmatpush.bf16.msra.mxu1 %v5973_v48  ;;  %v6310_v48 = vld [vmem:[%s10609_s8 + $0x4b4] sm:$0xf0]  ;;  %v6170_v39 = vld [vmem:[%s10609_s8 + $0x39c] sm:$0xf0] }
 0x1f9   :  { %v6313_v46 = vor.u32 %v7067_v47, %v6310_v48  ;;  %v7085_v18 = vld [vmem:[%s10609_s8 + $0x528] sm:$0xf0]  ;;  %v6540_v26 = vld [vmem:[%s10609_s8 + $0x660] sm:$0xf] }
 0x1fa   :  { %v2158_v50 = vmul.f32 0.5, %v2153_v9  ;;  %4537 = vst [vmem:[%s10608_s11 + $0x18] sm:$0xff] %v2153_v9  ;;  %3868 = vmatpush.bf16.msra.mxu3 %v5749_v1  ;;  %v6990_v1 = vld [vmem:[%s10609_s8 + $0x234] sm:$0xf] }
 0x1fb   :  { %3896 = vmatpush.bf16.msra.mxu2 %v6197_v43  ;;  %3911 = vmatpush.bf16.msra.mxu0 %v6393_v12  ;;  %v6002_v43 = vld [vmem:[%s10609_s8 + $0x24c] sm:$0xf0]  ;;  %v6983_v12 = vld [vmem:[%s10609_s8 + $0x1fc] sm:$0xf] }
 0x1fc   :  { %v2161_v8 = vmul.f32 1.442695, %v2158_v50  ;;  %v7145_v54 = vpop.eup %7144  ;;  %v6593_v50 = vor.u32 %v7137_v0, %v6590_v4  ;;  %3883 = vmatpush.bf16.msra.mxu1 %v5945_v10  ;;  %v6285_v0 = vor.u32 %v7060_v61, %v6282_v63  ;;  %v6450_v4 = vld [vmem:[%s10609_s8 + $0x5cc] sm:$0xf0]  ;;  %v7141_v61 = vld [vmem:[%s10609_s8 + $0x6e8] sm:$0xf0] }
 0x1fd   :  { %v2163_v17 = vmul.f32 %v7145_v54, %v2155_v38  ;;  %v6089_v54 = vor.u32 %v7011_v30, %v6086_v31  ;;  %v6537_v38 = vor.u32 %v7123_v32, %v6534_v33  ;;  %v7039_v30 = vld [vmem:[%s10609_s8 + $0x3bc] sm:$0xf]  ;;  %v6198_v32 = vld [vmem:[%s10609_s8 + $0x3d4] sm:$0xf0] }
 0x1fe   :  { %7146 = vpow2.f32 %v2161_v8  ;;  %v6369_v8 = vor.u32 %v7081_v14, %v6366_v15  ;;  %3869 = vmatpush.bf16.msra.mxu3 %v5721_v21  ;;  %v7095_v14 = vld [vmem:[%s10609_s8 + $0x57c] sm:$0xf]  ;;  %v5977_v15 = vor.u32 %v6983_v12, %v5974_v13  ;;  %v6226_v21 = vld [vmem:[%s10609_s8 + $0x40c] sm:$0xf0]  ;;  %v6201_v33 = vor.u32 %v7039_v30, %v6198_v32  ;;  %v5896_v30 = vld [vmem:[%s10609_s8 + $0x158] sm:$0xf] }
 0x1ff   :  { %v2165_v2 = vadd.f32 %v2163_v17, %v9078_v36  ;;  %v6168_v36 = vld [vmem:[%s10609_s8 + $0x380] sm:$0xf]  ;;  %v5865_v17 = vor.u32 %v6955_v37, %v5862_v42 }
 0x204   :  { %v7147_v52 = vpop.eup %7146 }
 0x205   :  { %v2164_v57 = vmul.f32 %v7147_v52, %v2156_v60  ;;  %v6509_v60 = vor.u32 %v7116_v41, %v6506_v44  ;;  %v6033_v52 = vor.u32 %v6997_v49, %v6030_v51  ;;  %v2200_v41 = vld [vmem:[%s10611_s7] sm:$0xf] }
 0x206   :  { %v2205_v37 = vperm.slane %v2200_v41, 3  ;;  %v2202_v49 = vperm.slane %v2200_v41, 0 }
 0x207   :  { %v2166_v3 = vadd.f32 %v2164_v57, %v9139_v11  ;;  %v7035_v11 = vld [vmem:[%s10609_s8 + $0x398] sm:$0xf0]  ;;  %v6481_v57 = vor.u32 %v7109_v53, %v6478_v56  ;;  %v6148_v53 = vld [vmem:[%s10609_s8 + $0x350] sm:$0xf]  ;;  %v7029_v56 = vld [vmem:[%s10609_s8 + $0x368] sm:$0xf0] }
 0x208   :  { %v6169_v22 = vor.u32 %v7035_v11, %v6168_v36  ;;  %v5806_v36 = vld [vmem:[%s10609_s8 + $0xc4] sm:$0xf0] }
 0x209   :  { %v2167_v9 = vpack.c.bf16 %v2166_v3, %v2165_v2  ;;  %v6005_v2 = vor.u32 %v6990_v1, %v6002_v43  ;;  %v7102_v3 = vld [vmem:[%s10609_s8 + $0x5b4] sm:$0xf]  ;;  %v5809_v11 = vor.u32 %v6941_v6, %v5806_v36  ;;  %v6149_v43 = vor.u32 %v7029_v56, %v6148_v53  ;;  %v7113_v53 = vld [vmem:[%s10609_s8 + $0x608] sm:$0xf0] }
 0x20a   :  { %3897 = vmatpush.bf16.msra.mxu2 %v6169_v22  ;;  %v6453_v5 = vor.u32 %v7102_v3, %v6450_v4  ;;  %v6229_v22 = vor.u32 %v7046_v19, %v6226_v21  ;;  %v6597_v4 = vor.u32 %v7141_v61, %v6596_v59  ;;  %v7022_v6 = vld [vmem:[%s10609_s8 + $0x330] sm:$0xf0]  ;;  %v6288_v61 = vld [vmem:[%s10609_s8 + $0x468] sm:$0xf] }
 0x20b   :  { %2378 = vmatmul.bf16.vlgmr.msrb.gmra.mxu3 %v2167_v9  ;;  %2392 = vmatmul.bf16.vlgmr.msrb.gmra.mxu1 %v2167_v9 }
 0x20c   :  { %2406 = vmatmul.bf16.vlgmr.msrb.gmra.mxu2 %v2167_v9  ;;  %2420 = vmatmul.bf16.vlgmr.msrb.gmra.mxu0 %v2167_v9  ;;  %v6254_v9 = vld [vmem:[%s10609_s8 + $0x444] sm:$0xf0] }
 0x20d   :  { %3932 = vmatpush.bf16.msrb.mxu1 %v6145_v16  ;;  %3960 = vmatpush.bf16.msrb.mxu0 %v6593_v50  ;;  %v6257_v10 = vor.u32 %v7053_v7, %v6254_v9  ;;  %v6422_v16 = vld [vmem:[%s10609_s8 + $0x594] sm:$0xf0] }
 0x20e   :  { %3918 = vmatpush.bf16.msrb.mxu3 %v5921_v23  ;;  %3946 = vmatpush.bf16.msrb.mxu2 %v6369_v8  ;;  %v6425_v50 = vor.u32 %v7095_v14, %v6422_v16  ;;  %v6976_v23 = vld [vmem:[%s10609_s8 + $0x1c4] sm:$0xf]  ;;  %v5946_v8 = vld [vmem:[%s10609_s8 + $0x1dc] sm:$0xf0]  ;;  %v6568_v9 = vld [vmem:[%s10609_s8 + $0x698] sm:$0xf] }
 0x20f   :  { %v5949_v25 = vor.u32 %v6976_v23, %v5946_v8  ;;  %v5924_v14 = vld [vmem:[%s10609_s8 + $0x190] sm:$0xf]  ;;  %v7015_v23 = vld [vmem:[%s10609_s8 + $0x2f8] sm:$0xf0] }
 0x211   :  { %3933 = vmatpush.bf16.msrb.mxu1 %v6117_v28  ;;  %3961 = vmatpush.bf16.msrb.mxu0 %v6565_v29  ;;  %v6927_v28 = vld [vmem:[%s10609_s8 + $0x3c] sm:$0xf]  ;;  %v5750_v29 = vld [vmem:[%s10609_s8 + $0x54] sm:$0xf0] }
 0x212   :  { %3919 = vmatpush.bf16.msrb.mxu3 %v5893_v34  ;;  %3947 = vmatpush.bf16.msrb.mxu2 %v6341_v35  ;;  %v5753_v31 = vor.u32 %v6927_v28, %v5750_v29  ;;  %v6920_v34 = vld [vmem:[%s10609_s8 + $0x4] sm:$0xf]  ;;  %v5722_v35 = vld [vmem:[%s10609_s8 + $0x1c] sm:$0xf0]  ;;  %v6373_v29 = vor.u32 %v7085_v18, %v6372_v55  ;;  %v5784_v18 = vld [vmem:[%s10609_s8 + $0x78] sm:$0xf] }
 0x215   :  { %3934 = vmatpush.bf16.msrb.mxu1 %v6089_v54  ;;  %3962 = vmatpush.bf16.msrb.mxu0 %v6537_v38  ;;  %v5725_v54 = vor.u32 %v6920_v34, %v5722_v35  ;;  %v7032_v38 = vld [vmem:[%s10609_s8 + $0x384] sm:$0xf]  ;;  %v6344_v34 = vld [vmem:[%s10609_s8 + $0x4d8] sm:$0xf]  ;;  %v7078_v35 = vld [vmem:[%s10609_s8 + $0x4f0] sm:$0xf0] }
 0x216   :  { %3920 = vmatpush.bf16.msrb.mxu3 %v5865_v17  ;;  %3948 = vmatpush.bf16.msrb.mxu2 %v6313_v46  ;;  %v6173_v40 = vor.u32 %v7032_v38, %v6170_v39  ;;  %v6064_v38 = vld [vmem:[%s10609_s8 + $0x2a8] sm:$0xf]  ;;  %v7008_v39 = vld [vmem:[%s10609_s8 + $0x2c0] sm:$0xf0] }
 0x219   :  { %3935 = vmatpush.bf16.msrb.mxu1 %v6061_v45  ;;  %3963 = vmatpush.bf16.msrb.mxu0 %v6509_v60  ;;  %v2203_v60 = vperm.slane %v2200_v41, 1 }
 0x21a   :  { %3921 = vmatpush.bf16.msrb.mxu3 %v5837_v62  ;;  %3949 = vmatpush.bf16.msrb.mxu2 %v6285_v0 }
 0x21d   :  { %3936 = vmatpush.bf16.msrb.mxu1 %v6033_v52  ;;  %3964 = vmatpush.bf16.msrb.mxu0 %v6481_v57  ;;  %v2204_v57 = vperm.slane %v2200_v41, 2  ;;  %v6512_v41 = vld [vmem:[%s10609_s8 + $0x628] sm:$0xf] }
 0x21e   :  { %3922 = vmatpush.bf16.msrb.mxu3 %v5809_v11  ;;  %3950 = vmatpush.bf16.msrb.mxu2 %v6257_v10  ;;  %v7134_v10 = vld [vmem:[%s10609_s8 + $0x6b0] sm:$0xf0] }
 0x21f   :  { %v6569_v21 = vor.u32 %v7134_v10, %v6568_v9  ;;  %v6260_v9 = vld [vmem:[%s10609_s8 + $0x430] sm:$0xf]  ;;  %v7057_v10 = vld [vmem:[%s10609_s8 + $0x448] sm:$0xf0] }
 0x220   :  { %v6261_v55 = vor.u32 %v7057_v10, %v6260_v9  ;;  %v7075_v9 = vld [vmem:[%s10609_s8 + $0x4dc] sm:$0xf]  ;;  %v6346_v10 = vld [vmem:[%s10609_s8 + $0x4f4] sm:$0xf0] }
 0x221   :  { %3937 = vmatpush.bf16.msrb.mxu1 %v6005_v2  ;;  %3965 = vmatpush.bf16.msrb.mxu0 %v6453_v5  ;;  %v6120_v5 = vld [vmem:[%s10609_s8 + $0x318] sm:$0xf] }
 0x222   :  { %3923 = vmatpush.bf16.msrb.mxu3 %v5781_v20  ;;  %3951 = vmatpush.bf16.msrb.mxu2 %v6229_v22  ;;  %v6092_v22 = vld [vmem:[%s10609_s8 + $0x2e0] sm:$0xf] }
 0x225   :  { %3938 = vmatpush.bf16.msrb.mxu1 %v5977_v15  ;;  %3966 = vmatpush.bf16.msrb.mxu0 %v6425_v50  ;;  %v6973_v15 = vld [vmem:[%s10609_s8 + $0x1a8] sm:$0xf0]  ;;  %v6121_v50 = vor.u32 %v7022_v6, %v6120_v5  ;;  %v5812_v6 = vld [vmem:[%s10609_s8 + $0xb0] sm:$0xf] }
 0x226   :  { %3924 = vmatpush.bf16.msrb.mxu3 %v5753_v31  ;;  %3952 = vmatpush.bf16.msrb.mxu2 %v6201_v33  ;;  %v6966_v31 = vld [vmem:[%s10609_s8 + $0x170] sm:$0xf0]  ;;  %v6093_v33 = vor.u32 %v7015_v23, %v6092_v22  ;;  %v5952_v23 = vld [vmem:[%s10609_s8 + $0x1c8] sm:$0xf] }
 0x227   :  { %v7050_v22 = vld [vmem:[%s10609_s8 + $0x410] sm:$0xf0] }
 0x229   :  { %3939 = vmatpush.bf16.msrb.mxu1 %v5949_v25  ;;  %3967 = vmatpush.bf16.msrb.mxu0 %v6397_v27  ;;  %v5925_v25 = vor.u32 %v6973_v15, %v5924_v14  ;;  %v7127_v27 = vld [vmem:[%s10609_s8 + $0x678] sm:$0xf0] }
 0x22a   :  { %3925 = vmatpush.bf16.msrb.mxu3 %v5725_v54  ;;  %3953 = vmatpush.bf16.msrb.mxu2 %v6173_v40  ;;  %v6541_v54 = vor.u32 %v7127_v27, %v6540_v26  ;;  %v5897_v40 = vor.u32 %v6966_v31, %v5896_v30  ;;  %v6987_v14 = vld [vmem:[%s10609_s8 + $0x218] sm:$0xf0]  ;;  %v7092_v26 = vld [vmem:[%s10609_s8 + $0x560] sm:$0xf0]  ;;  %v6150_v30 = vld [vmem:[%s10609_s8 + $0x36c] sm:$0xf0] }
 0x22b   :  { %v7138_v31 = vld [vmem:[%s10609_s8 + $0x6d4] sm:$0xf] }
 0x288   :  { %v2393_v44 = vpop.f32.mrf.mxu1 }
 0x289   :  { %v2421_v45 = vpop.f32.mrf.mxu0  ;;  %v2394_v47 = vadd.f32 %v2393_v44, %v2203_v60  ;;  %v7120_v44 = vld [vmem:[%s10609_s8 + $0x640] sm:$0xf0] }
 0x28a   :  { %v2422_v48 = vadd.f32 %v2421_v45, %v2205_v37  ;;  %v6345_v45 = vor.u32 %v7078_v35, %v6344_v34  ;;  %v6598_v34 = vld [vmem:[%s10609_s8 + $0x6ec] sm:$0xf0]  ;;  %v5756_v35 = vld [vmem:[%s10609_s8 + $0x40] sm:$0xf] }
 0x28b   :  { %v2427_v62 = vmax.f32 %v2394_v47, 0.0  ;;  %v6316_v47 = vld [vmem:[%s10609_s8 + $0x4a0] sm:$0xf] }
 0x28c   :  { %v2429_v0 = vmax.f32 %v2422_v48, 0.0  ;;  %v6513_v48 = vor.u32 %v7120_v44, %v6512_v41 }
 0x28e   :  { %v2379_v42 = vpop.f32.mrf.mxu3 }
 0x28f   :  { %v2407_v17 = vpop.f32.mrf.mxu2  ;;  %v2380_v2 = vadd.f32 %v2379_v42, %v2202_v49  ;;  %v6065_v42 = vor.u32 %v7008_v39, %v6064_v38  ;;  %v6204_v39 = vld [vmem:[%s10609_s8 + $0x3c0] sm:$0xf] }
 0x290   :  { %v2395_v46 = vpop.f32.mrf.mxu1  ;;  %v2408_v36 = vadd.f32 %v2407_v17, %v2204_v57  ;;  %v7071_v17 = vld [vmem:[%s10609_s8 + $0x4b8] sm:$0xf0] }
 0x291   :  { %v2396_v51 = vadd.f32 %v2395_v46, %v2203_v60  ;;  %v2423_v52 = vpop.f32.mrf.mxu0  ;;  %v2426_v19 = vmax.f32 %v2380_v2, 0.0  ;;  %v5868_v60 = vld [vmem:[%s10609_s8 + $0x120] sm:$0xf]  ;;  %v6036_v46 = vld [vmem:[%s10609_s8 + $0x270] sm:$0xf]  ;;  %v6317_v56 = vor.u32 %v7071_v17, %v6316_v47 }
 0x292   :  { %v2424_v58 = vadd.f32 %v2423_v52, %v2205_v37  ;;  %v2428_v8 = vmax.f32 %v2408_v36, 0.0  ;;  %v6959_v37 = vld [vmem:[%s10609_s8 + $0x138] sm:$0xf0]  ;;  %v6484_v52 = vld [vmem:[%s10609_s8 + $0x5f0] sm:$0xf] }
 0x293   :  { %v2431_v63 = vmax.f32 %v2396_v51, 0.0  ;;  %v5869_v51 = vor.u32 %v6959_v37, %v5868_v60  ;;  %v6456_v2 = vld [vmem:[%s10609_s8 + $0x5b8] sm:$0xf]  ;;  %v6945_v36 = vld [vmem:[%s10609_s8 + $0xc8] sm:$0xf0]  ;;  %v6601_v60 = vor.u32 %v7138_v31, %v6598_v34 }
 0x294   :  { %v2433_v1 = vmax.f32 %v2424_v58, 0.0  ;;  %v6952_v58 = vld [vmem:[%s10609_s8 + $0x100] sm:$0xf0]  ;;  %v5813_v15 = vor.u32 %v6945_v36, %v5812_v6  ;;  %v7131_v47 = vld [vmem:[%s10609_s8 + $0x69c] sm:$0xf] }
 0x295   :  { %v9562_v3 = vpack.c.bf16 %v2431_v63, %v2427_v62  ;;  %v7064_v62 = vld [vmem:[%s10609_s8 + $0x480] sm:$0xf0]  ;;  %v6485_v63 = vor.u32 %v7113_v53, %v6484_v52  ;;  %v6570_v17 = vld [vmem:[%s10609_s8 + $0x6b4] sm:$0xf0]  ;;  %v6970_v53 = vld [vmem:[%s10609_s8 + $0x194] sm:$0xf] }
 0x296   :  { %v9570_v11 = vpack.c.bf16 %v2433_v1, %v2429_v0  ;;  %v2381_v7 = vpop.f32.mrf.mxu3  ;;  %v6008_v0 = vld [vmem:[%s10609_s8 + $0x238] sm:$0xf]  ;;  %v6994_v1 = vld [vmem:[%s10609_s8 + $0x250] sm:$0xf0]  ;;  %v6289_v5 = vor.u32 %v7064_v62, %v6288_v61  ;;  %v7036_v52 = vld [vmem:[%s10609_s8 + $0x3a0] sm:$0xf0]  ;;  %v6573_v61 = vor.u32 %v7131_v47, %v6570_v17 }
 0x297   :  { %v2382_v12 = vadd.f32 %v2381_v7, %v2202_v49  ;;  %v2409_v13 = vpop.f32.mrf.mxu2  ;;  %3884 = vmatmul.bf16.vlgmr.msra.gmra.mxu1 %v9562_v3  ;;  %v7001_v49 = vld [vmem:[%s10609_s8 + $0x288] sm:$0xf0]  ;;  %v6009_v7 = vor.u32 %v6994_v1, %v6008_v0  ;;  %v6094_v0 = vld [vmem:[%s10609_s8 + $0x2fc] sm:$0xf0]  ;;  %v6963_v6 = vld [vmem:[%s10609_s8 + $0x15c] sm:$0xf] }
 0x298   :  { %v2410_v16 = vadd.f32 %v2409_v13, %v2204_v57  ;;  %3912 = vmatmul.bf16.vlgmr.msra.gmra.mxu0 %v9570_v11  ;;  %3988 = vmatpush.bf16.msra.mxu1 %v6149_v43  ;;  %v5840_v57 = vld [vmem:[%s10609_s8 + $0xe8] sm:$0xf]  ;;  %v6037_v59 = vor.u32 %v7001_v49, %v6036_v46  ;;  %v5980_v13 = vld [vmem:[%s10609_s8 + $0x200] sm:$0xf]  ;;  %v6924_v49 = vld [vmem:[%s10609_s8 + $0x20] sm:$0xf0] }
 0x299   :  { %v2430_v20 = vmax.f32 %v2382_v12, 0.0  ;;  %4016 = vmatpush.bf16.msra.mxu0 %v6597_v4  ;;  %v5841_v43 = vor.u32 %v6952_v58, %v5840_v57  ;;  %v7106_v4 = vld [vmem:[%s10609_s8 + $0x5d0] sm:$0xf0]  ;;  %v5728_v46 = vld [vmem:[%s10609_s8 + $0x8] sm:$0xf] }
 0x29a   :  { %v2432_v24 = vmax.f32 %v2410_v16, 0.0  ;;  %v6457_v12 = vor.u32 %v7106_v4, %v6456_v2  ;;  %v6428_v16 = vld [vmem:[%s10609_s8 + $0x580] sm:$0xf]  ;;  %v7082_v58 = vld [vmem:[%s10609_s8 + $0x514] sm:$0xf]  ;;  %v5729_v62 = vor.u32 %v6924_v49, %v5728_v46 }
 0x29b   :  { %v9604_v28 = vpack.c.bf16 %v2430_v20, %v2426_v19  ;;  %v6938_v19 = vld [vmem:[%s10609_s8 + $0x90] sm:$0xf0]  ;;  %v5981_v20 = vor.u32 %v6987_v14, %v5980_v13  ;;  %v7124_v2 = vld [vmem:[%s10609_s8 + $0x664] sm:$0xf]  ;;  %v6542_v4 = vld [vmem:[%s10609_s8 + $0x67c] sm:$0xf0] }
 0x29c   :  { %v9612_v32 = vpack.c.bf16 %v2432_v24, %v2428_v8  ;;  %3989 = vmatpush.bf16.msra.mxu1 %v6121_v50  ;;  %v7099_v50 = vld [vmem:[%s10609_s8 + $0x598] sm:$0xf0]  ;;  %v6980_v24 = vld [vmem:[%s10609_s8 + $0x1e0] sm:$0xf0]  ;;  %v5785_v27 = vor.u32 %v6938_v19, %v5784_v18  ;;  %v5898_v36 = vld [vmem:[%s10609_s8 + $0x174] sm:$0xf0] }
 0x29d   :  { %4017 = vmatpush.bf16.msra.mxu0 %v6569_v21  ;;  %3870 = vmatmul.bf16.vlgmr.msra.gmra.mxu3 %v9604_v28  ;;  %v6232_v21 = vld [vmem:[%s10609_s8 + $0x3f8] sm:$0xf]  ;;  %v6429_v8 = vor.u32 %v7099_v50, %v6428_v16  ;;  %v5953_v38 = vor.u32 %v6980_v24, %v5952_v23  ;;  %v7005_v13 = vld [vmem:[%s10609_s8 + $0x2ac] sm:$0xf]  ;;  %v6066_v14 = vld [vmem:[%s10609_s8 + $0x2c4] sm:$0xf0] }
 0x29e   :  { %3898 = vmatmul.bf16.vlgmr.msra.gmra.mxu2 %v9612_v32  ;;  %3974 = vmatpush.bf16.msra.mxu3 %v5925_v25  ;;  %v6400_v25 = vld [vmem:[%s10609_s8 + $0x548] sm:$0xf]  ;;  %v7117_v16 = vld [vmem:[%s10609_s8 + $0x62c] sm:$0xf]  ;;  %v6956_v18 = vld [vmem:[%s10609_s8 + $0x124] sm:$0xf] }
 0x29f   :  { %4002 = vmatpush.bf16.msra.mxu2 %v6373_v29  ;;  %v7026_v29 = vld [vmem:[%s10609_s8 + $0x354] sm:$0xf]  ;;  %v6401_v41 = vor.u32 %v7092_v26, %v6400_v25  ;;  %v6514_v50 = vld [vmem:[%s10609_s8 + $0x644] sm:$0xf0]  ;;  %v5870_v19 = vld [vmem:[%s10609_s8 + $0x13c] sm:$0xf0] }
 0x2a0   :  { %3990 = vmatpush.bf16.msra.mxu1 %v6093_v33  ;;  %v6233_v33 = vor.u32 %v7050_v22, %v6232_v21  ;;  %v6153_v44 = vor.u32 %v7026_v29, %v6150_v30  ;;  %v7068_v21 = vld [vmem:[%s10609_s8 + $0x4a4] sm:$0xf]  ;;  %v6318_v22 = vld [vmem:[%s10609_s8 + $0x4bc] sm:$0xf0]  ;;  %v6517_v23 = vor.u32 %v7117_v16, %v6514_v50  ;;  %v6038_v24 = vld [vmem:[%s10609_s8 + $0x28c] sm:$0xf0]  ;;  %v5873_v25 = vor.u32 %v6956_v18, %v5870_v19 }
 0x2a1   :  { %4018 = vmatpush.bf16.msra.mxu0 %v6541_v54  ;;  %v6931_v54 = vld [vmem:[%s10609_s8 + $0x58] sm:$0xf0]  ;;  %v7110_v26 = vld [vmem:[%s10609_s8 + $0x5f4] sm:$0xf]  ;;  %v6321_v29 = vor.u32 %v7068_v21, %v6318_v22  ;;  %v6949_v30 = vld [vmem:[%s10609_s8 + $0xec] sm:$0xf] }
 0x2a2   :  { %3975 = vmatpush.bf16.msra.mxu3 %v5897_v40  ;;  %v7043_v40 = vld [vmem:[%s10609_s8 + $0x3d8] sm:$0xf0]  ;;  %v5757_v37 = vor.u32 %v6931_v54, %v5756_v35  ;;  %v5842_v31 = vld [vmem:[%s10609_s8 + $0x104] sm:$0xf0]  ;;  %v7061_v34 = vld [vmem:[%s10609_s8 + $0x46c] sm:$0xf] }
 0x2a3   :  { %4003 = vmatpush.bf16.msra.mxu2 %v6345_v45  ;;  %v7019_v45 = vld [vmem:[%s10609_s8 + $0x31c] sm:$0xf]  ;;  %v6290_v35 = vld [vmem:[%s10609_s8 + $0x484] sm:$0xf0]  ;;  %v7054_v47 = vld [vmem:[%s10609_s8 + $0x434] sm:$0xf] }
 0x2a4   :  { %3991 = vmatpush.bf16.msra.mxu1 %v6065_v42  ;;  %v6122_v42 = vld [vmem:[%s10609_s8 + $0x334] sm:$0xf0]  ;;  %v6262_v17 = vld [vmem:[%s10609_s8 + $0x44c] sm:$0xf0]  ;;  %v6984_v46 = vld [vmem:[%s10609_s8 + $0x204] sm:$0xf] }
 0x2a5   :  { %4019 = vmatpush.bf16.msra.mxu0 %v6513_v48  ;;  %v6205_v48 = vor.u32 %v7043_v40, %v6204_v39  ;;  %v6125_v57 = vor.u32 %v7019_v45, %v6122_v42  ;;  %v6010_v39 = vld [vmem:[%s10609_s8 + $0x254] sm:$0xf0]  ;;  %v5845_v40 = vor.u32 %v6949_v30, %v5842_v31  ;;  %v6293_v45 = vor.u32 %v7061_v34, %v6290_v35  ;;  %v5982_v49 = vld [vmem:[%s10609_s8 + $0x21c] sm:$0xf0]  ;;  %v7135_v22 = vld [vmem:[%s10609_s8 + $0x6b8] sm:$0xf0] }
 0x2a6   :  { %3976 = vmatpush.bf16.msra.mxu3 %v5869_v51  ;;  %v6176_v51 = vld [vmem:[%s10609_s8 + $0x388] sm:$0xf]  ;;  %v6576_v21 = vld [vmem:[%s10609_s8 + $0x6a0] sm:$0xf]  ;;  %v6380_v31 = vld [vmem:[%s10609_s8 + $0x518] sm:$0xf] }
 0x2a7   :  { %4004 = vmatpush.bf16.msra.mxu2 %v6317_v56  ;;  %3940 = vmatmul.bf16.vlgmr.msrb.gmra.mxu1 %v9562_v3  ;;  %v5926_v56 = vld [vmem:[%s10609_s8 + $0x1ac] sm:$0xf0]  ;;  %v6177_v1 = vor.u32 %v7036_v52, %v6176_v51  ;;  %v7096_v52 = vld [vmem:[%s10609_s8 + $0x584] sm:$0xf]  ;;  %v6577_v34 = vor.u32 %v7135_v22, %v6576_v21  ;;  %v6268_v21 = vld [vmem:[%s10609_s8 + $0x438] sm:$0xf] }
 0x2a8   :  { %3968 = vmatmul.bf16.vlgmr.msrb.gmra.mxu0 %v9570_v11  ;;  %3992 = vmatpush.bf16.msra.mxu1 %v6037_v59  ;;  %v6374_v59 = vld [vmem:[%s10609_s8 + $0x52c] sm:$0xf0]  ;;  %v7058_v22 = vld [vmem:[%s10609_s8 + $0x450] sm:$0xf0] }
 0x2a9   :  { %4020 = vmatpush.bf16.msra.mxu0 %v6485_v63  ;;  %v7012_v63 = vld [vmem:[%s10609_s8 + $0x2e4] sm:$0xf] }
 0x2aa   :  { %3977 = vmatpush.bf16.msra.mxu3 %v5841_v43  ;;  %v5929_v43 = vor.u32 %v6970_v53, %v5926_v56  ;;  %v6430_v53 = vld [vmem:[%s10609_s8 + $0x59c] sm:$0xf0]  ;;  %v6265_v56 = vor.u32 %v7054_v47, %v6262_v17  ;;  %v7079_v17 = vld [vmem:[%s10609_s8 + $0x4f8] sm:$0xf0] }
 0x2ab   :  { %4005 = vmatpush.bf16.msra.mxu2 %v6289_v5  ;;  %v6377_v5 = vor.u32 %v7082_v58, %v6374_v59  ;;  %v5786_v58 = vld [vmem:[%s10609_s8 + $0x94] sm:$0xf0]  ;;  %v5985_v59 = vor.u32 %v6984_v46, %v5982_v49  ;;  %v6352_v47 = vld [vmem:[%s10609_s8 + $0x4e0] sm:$0xf]  ;;  %v6072_v46 = vld [vmem:[%s10609_s8 + $0x2b0] sm:$0xf] }
 0x2ac   :  { %3993 = vmatpush.bf16.msra.mxu1 %v6009_v7  ;;  %v6097_v7 = vor.u32 %v7012_v63, %v6094_v0  ;;  %v6977_v63 = vld [vmem:[%s10609_s8 + $0x1cc] sm:$0xf]  ;;  %v6433_v0 = vor.u32 %v7096_v52, %v6430_v53  ;;  %v6520_v52 = vld [vmem:[%s10609_s8 + $0x630] sm:$0xf] }
 0x2ad   :  { %4021 = vmatpush.bf16.msra.mxu0 %v6457_v12  ;;  %3926 = vmatmul.bf16.vlgmr.msrb.gmra.mxu3 %v9604_v28  ;;  %v6545_v12 = vor.u32 %v7124_v2, %v6542_v4  ;;  %v6402_v2 = vld [vmem:[%s10609_s8 + $0x564] sm:$0xf0]  ;;  %v7009_v49 = vld [vmem:[%s10609_s8 + $0x2c8] sm:$0xf0] }
 0x2ae   :  { %3954 = vmatmul.bf16.vlgmr.msrb.gmra.mxu2 %v9612_v32  ;;  %3978 = vmatpush.bf16.msra.mxu3 %v5813_v15  ;;  %v5901_v15 = vor.u32 %v6963_v6, %v5898_v36  ;;  %v7030_v6 = vld [vmem:[%s10609_s8 + $0x370] sm:$0xf0]  ;;  %v6604_v36 = vld [vmem:[%s10609_s8 + $0x6d8] sm:$0xf]  ;;  %v7121_v53 = vld [vmem:[%s10609_s8 + $0x648] sm:$0xf0] }
 0x2af   :  { %4006 = vmatpush.bf16.msra.mxu2 %v6261_v55  ;;  %v6349_v55 = vor.u32 %v7075_v9, %v6346_v10  ;;  %v7142_v9 = vld [vmem:[%s10609_s8 + $0x6f0] sm:$0xf0]  ;;  %v6928_v10 = vld [vmem:[%s10609_s8 + $0x44] sm:$0xf] }
 0x2b0   :  { %3994 = vmatpush.bf16.msra.mxu1 %v5981_v20  ;;  %v6069_v20 = vor.u32 %v7005_v13, %v6066_v14  ;;  %v7040_v14 = vld [vmem:[%s10609_s8 + $0x3c4] sm:$0xf]  ;;  %v6605_v18 = vor.u32 %v7142_v9, %v6604_v36  ;;  %v6953_v36 = vld [vmem:[%s10609_s8 + $0x108] sm:$0xf0]  ;;  %v6296_v9 = vld [vmem:[%s10609_s8 + $0x470] sm:$0xf] }
 0x2b1   :  { %4022 = vmatpush.bf16.msra.mxu0 %v6429_v8  ;;  %v6998_v8 = vld [vmem:[%s10609_s8 + $0x274] sm:$0xf] }
 0x2b2   :  { %3979 = vmatpush.bf16.msra.mxu3 %v5785_v27  ;;  %v6486_v27 = vld [vmem:[%s10609_s8 + $0x60c] sm:$0xf0] }
 0x2b3   :  { %4007 = vmatpush.bf16.msra.mxu2 %v6233_v33  ;;  %v6041_v33 = vor.u32 %v6998_v8, %v6038_v24  ;;  %v6489_v54 = vor.u32 %v7110_v26, %v6486_v27  ;;  %v6921_v8 = vld [vmem:[%s10609_s8 + $0xc] sm:$0xf]  ;;  %v5730_v24 = vld [vmem:[%s10609_s8 + $0x24] sm:$0xf0]  ;;  %v5932_v27 = vld [vmem:[%s10609_s8 + $0x198] sm:$0xf] }
 0x2b4   :  { %3995 = vmatpush.bf16.msra.mxu1 %v5953_v38  ;;  %v6991_v38 = vld [vmem:[%s10609_s8 + $0x23c] sm:$0xf]  ;;  %v6178_v26 = vld [vmem:[%s10609_s8 + $0x3a4] sm:$0xf0]  ;;  %v5733_v35 = vor.u32 %v6921_v8, %v5730_v24  ;;  %v6988_v24 = vld [vmem:[%s10609_s8 + $0x220] sm:$0xf0] }
 0x2b5   :  { %4023 = vmatpush.bf16.msra.mxu0 %v6401_v41  ;;  %v7103_v41 = vld [vmem:[%s10609_s8 + $0x5bc] sm:$0xf]  ;;  %v6013_v42 = vor.u32 %v6991_v38, %v6010_v39  ;;  %v7016_v38 = vld [vmem:[%s10609_s8 + $0x300] sm:$0xf0]  ;;  %v5988_v8 = vld [vmem:[%s10609_s8 + $0x208] sm:$0xf] }
 0x2b6   :  { %3980 = vmatpush.bf16.msra.mxu3 %v5757_v37  ;;  %v5814_v37 = vld [vmem:[%s10609_s8 + $0xcc] sm:$0xf0] }
 0x2b7   :  { %4008 = vmatpush.bf16.msra.mxu2 %v6205_v48  ;;  %3996 = vmatmul.bf16.vlgmr.msra.gmra.mxu1 %v9562_v3 }
 0x2b8   :  { %4044 = vmatpush.bf16.msrb.mxu1 %v6153_v44  ;;  %4024 = vmatmul.bf16.vlgmr.msra.gmra.mxu0 %v9570_v11  ;;  %v6458_v44 = vld [vmem:[%s10609_s8 + $0x5d4] sm:$0xf0] }
 0x2b9   :  { %4072 = vmatpush.bf16.msrb.mxu0 %v6601_v60  ;;  %v6942_v60 = vld [vmem:[%s10609_s8 + $0xb4] sm:$0xf]  ;;  %v6461_v48 = vor.u32 %v7103_v41, %v6458_v44  ;;  %v6548_v41 = vld [vmem:[%s10609_s8 + $0x668] sm:$0xf]  ;;  %v7128_v44 = vld [vmem:[%s10609_s8 + $0x680] sm:$0xf0] }
 0x2ba   :  { %3981 = vmatpush.bf16.msra.mxu3 %v5729_v62  ;;  %v5817_v51 = vor.u32 %v6942_v60, %v5814_v37  ;;  %v6234_v62 = vld [vmem:[%s10609_s8 + $0x414] sm:$0xf0]  ;;  %v5904_v60 = vld [vmem:[%s10609_s8 + $0x160] sm:$0xf]  ;;  %v6967_v37 = vld [vmem:[%s10609_s8 + $0x178] sm:$0xf0] }
 0x2bb   :  { %4009 = vmatpush.bf16.msra.mxu2 %v6177_v1  ;;  %v5954_v1 = vld [vmem:[%s10609_s8 + $0x1e4] sm:$0xf0] }
 0x2bc   :  { %4045 = vmatpush.bf16.msrb.mxu1 %v6125_v57  ;;  %v6935_v57 = vld [vmem:[%s10609_s8 + $0x7c] sm:$0xf]  ;;  %v5957_v13 = vor.u32 %v6977_v63, %v5954_v1  ;;  %v6521_v63 = vor.u32 %v7121_v53, %v6520_v52  ;;  %v7002_v1 = vld [vmem:[%s10609_s8 + $0x290] sm:$0xf0] }
 0x2bd   :  { %4073 = vmatpush.bf16.msrb.mxu0 %v6573_v61  ;;  %3982 = vmatmul.bf16.vlgmr.msra.gmra.mxu3 %v9604_v28  ;;  %v7047_v61 = vld [vmem:[%s10609_s8 + $0x3fc] sm:$0xf]  ;;  %v5789_v4 = vor.u32 %v6935_v57, %v5786_v58  ;;  %v5876_v57 = vld [vmem:[%s10609_s8 + $0x128] sm:$0xf]  ;;  %v6960_v58 = vld [vmem:[%s10609_s8 + $0x140] sm:$0xf0] }
 0x2be   :  { %4030 = vmatpush.bf16.msrb.mxu3 %v5929_v43  ;;  %4010 = vmatmul.bf16.vlgmr.msra.gmra.mxu2 %v9612_v32  ;;  %v7089_v43 = vld [vmem:[%s10609_s8 + $0x54c] sm:$0xf] }
 0x2bf   :  { %4058 = vmatpush.bf16.msrb.mxu2 %v6377_v5  ;;  %v6156_v5 = vld [vmem:[%s10609_s8 + $0x358] sm:$0xf]  ;;  %v6405_v16 = vor.u32 %v7089_v43, %v6402_v2  ;;  %v5877_v43 = vor.u32 %v6960_v58, %v5876_v57 }
 0x2c0   :  { %4046 = vmatpush.bf16.msrb.mxu1 %v6097_v7  ;;  %v6237_v7 = vor.u32 %v7047_v61, %v6234_v62  ;;  %v6157_v50 = vor.u32 %v7030_v6, %v6156_v5  ;;  %v6324_v61 = vld [vmem:[%s10609_s8 + $0x4a8] sm:$0xf]  ;;  %v7072_v62 = vld [vmem:[%s10609_s8 + $0x4c0] sm:$0xf0]  ;;  %v6492_v2 = vld [vmem:[%s10609_s8 + $0x5f8] sm:$0xf] }
 0x2c1   :  { %4074 = vmatpush.bf16.msrb.mxu0 %v6545_v12  ;;  %v5758_v12 = vld [vmem:[%s10609_s8 + $0x5c] sm:$0xf0]  ;;  %v6325_v5 = vor.u32 %v7072_v62, %v6324_v61  ;;  %v5848_v6 = vld [vmem:[%s10609_s8 + $0xf0] sm:$0xf]  ;;  %v7132_v61 = vld [vmem:[%s10609_s8 + $0x6a4] sm:$0xf] }
 0x2c2   :  { %4031 = vmatpush.bf16.msrb.mxu3 %v5901_v15  ;;  %v6206_v15 = vld [vmem:[%s10609_s8 + $0x3dc] sm:$0xf0]  ;;  %v5761_v19 = vor.u32 %v6928_v10, %v5758_v12  ;;  %v7065_v10 = vld [vmem:[%s10609_s8 + $0x488] sm:$0xf0] }
 0x2c3   :  { %4059 = vmatpush.bf16.msrb.mxu2 %v6349_v55  ;;  %v6128_v55 = vld [vmem:[%s10609_s8 + $0x320] sm:$0xf] }
 0x2c4   :  { %4047 = vmatpush.bf16.msrb.mxu1 %v6069_v20  ;;  %v7023_v20 = vld [vmem:[%s10609_s8 + $0x338] sm:$0xf0]  ;;  %v6578_v62 = vld [vmem:[%s10609_s8 + $0x6bc] sm:$0xf0] }
 0x2c5   :  { %4075 = vmatpush.bf16.msrb.mxu0 %v6517_v23  ;;  %v6209_v23 = vor.u32 %v7040_v14, %v6206_v15  ;;  %v6129_v30 = vor.u32 %v7023_v20, %v6128_v55  ;;  %v6995_v14 = vld [vmem:[%s10609_s8 + $0x258] sm:$0xf0]  ;;  %v5849_v15 = vor.u32 %v6953_v36, %v5848_v6  ;;  %v6297_v55 = vor.u32 %v7065_v10, %v6296_v9 }
 0x2c6   :  { %4032 = vmatpush.bf16.msrb.mxu3 %v5873_v25  ;;  %v7033_v25 = vld [vmem:[%s10609_s8 + $0x38c] sm:$0xf]  ;;  %v7083_v36 = vld [vmem:[%s10609_s8 + $0x51c] sm:$0xf]  ;;  %v6581_v9 = vor.u32 %v7132_v61, %v6578_v62  ;;  %v6270_v62 = vld [vmem:[%s10609_s8 + $0x454] sm:$0xf0] }
 0x2c7   :  { %4060 = vmatpush.bf16.msrb.mxu2 %v6321_v29  ;;  %v6974_v29 = vld [vmem:[%s10609_s8 + $0x1b0] sm:$0xf0]  ;;  %v6181_v39 = vor.u32 %v7033_v25, %v6178_v26  ;;  %v6436_v26 = vld [vmem:[%s10609_s8 + $0x588] sm:$0xf]  ;;  %v7055_v61 = vld [vmem:[%s10609_s8 + $0x43c] sm:$0xf] }
 0x2c8   :  { %4048 = vmatpush.bf16.msrb.mxu1 %v6041_v33  ;;  %v7086_v33 = vld [vmem:[%s10609_s8 + $0x530] sm:$0xf0] }
 0x2c9   :  { %4076 = vmatpush.bf16.msrb.mxu0 %v6489_v54  ;;  %v6100_v54 = vld [vmem:[%s10609_s8 + $0x2e8] sm:$0xf] }
 0x2ca   :  { %4033 = vmatpush.bf16.msrb.mxu3 %v5845_v40  ;;  %v5933_v40 = vor.u32 %v6974_v29, %v5932_v27  ;;  %v7100_v27 = vld [vmem:[%s10609_s8 + $0x5a0] sm:$0xf0]  ;;  %v6269_v29 = vor.u32 %v7058_v22, %v6268_v21  ;;  %v6354_v22 = vld [vmem:[%s10609_s8 + $0x4fc] sm:$0xf0] }
 0x2cb   :  { %4061 = vmatpush.bf16.msrb.mxu2 %v6293_v45  ;;  %v6381_v45 = vor.u32 %v7086_v33, %v6380_v31  ;;  %v6939_v31 = vld [vmem:[%s10609_s8 + $0x98] sm:$0xf0]  ;;  %v5989_v33 = vor.u32 %v6988_v24, %v5988_v8  ;;  %v7076_v21 = vld [vmem:[%s10609_s8 + $0x4e4] sm:$0xf]  ;;  %v7006_v8 = vld [vmem:[%s10609_s8 + $0x2b4] sm:$0xf] }
 0x2cc   :  { %4049 = vmatpush.bf16.msrb.mxu1 %v6013_v42  ;;  %v6101_v42 = vor.u32 %v7016_v38, %v6100_v54  ;;  %v5960_v54 = vld [vmem:[%s10609_s8 + $0x1d0] sm:$0xf]  ;;  %v6437_v38 = vor.u32 %v7100_v27, %v6436_v26  ;;  %v7118_v26 = vld [vmem:[%s10609_s8 + $0x634] sm:$0xf] }
 0x2cd   :  { %4077 = vmatpush.bf16.msrb.mxu0 %v6461_v48  ;;  %v6549_v48 = vor.u32 %v7128_v44, %v6548_v41  ;;  %v7093_v41 = vld [vmem:[%s10609_s8 + $0x568] sm:$0xf0]  ;;  %v6074_v24 = vld [vmem:[%s10609_s8 + $0x2cc] sm:$0xf0] }
 0x2ce   :  { %4034 = vmatpush.bf16.msrb.mxu3 %v5817_v51  ;;  %v5905_v51 = vor.u32 %v6967_v37, %v5904_v60  ;;  %v6158_v60 = vld [vmem:[%s10609_s8 + $0x374] sm:$0xf0]  ;;  %v7139_v37 = vld [vmem:[%s10609_s8 + $0x6dc] sm:$0xf]  ;;  %v6522_v27 = vld [vmem:[%s10609_s8 + $0x64c] sm:$0xf0] }
 0x2cf   :  { %4062 = vmatpush.bf16.msrb.mxu2 %v6265_v56  ;;  %v6353_v56 = vor.u32 %v7079_v17, %v6352_v47  ;;  %v6606_v47 = vld [vmem:[%s10609_s8 + $0x6f4] sm:$0xf0]  ;;  %v5764_v17 = vld [vmem:[%s10609_s8 + $0x48] sm:$0xf] }
 0x2d0   :  { %4050 = vmatpush.bf16.msrb.mxu1 %v5985_v59  ;;  %v6073_v59 = vor.u32 %v7009_v49, %v6072_v46  ;;  %v6212_v49 = vld [vmem:[%s10609_s8 + $0x3c8] sm:$0xf]  ;;  %v6609_v57 = vor.u32 %v7139_v37, %v6606_v47  ;;  %v5850_v37 = vld [vmem:[%s10609_s8 + $0x10c] sm:$0xf0]  ;;  %v7062_v47 = vld [vmem:[%s10609_s8 + $0x474] sm:$0xf] }
 0x2d1   :  { %4078 = vmatpush.bf16.msrb.mxu0 %v6433_v0  ;;  %v6044_v0 = vld [vmem:[%s10609_s8 + $0x278] sm:$0xf] }
 0x2d2   :  { %4035 = vmatpush.bf16.msrb.mxu3 %v5789_v4  ;;  %v7114_v4 = vld [vmem:[%s10609_s8 + $0x610] sm:$0xf0] }
 0x2d3   :  { %4063 = vmatpush.bf16.msrb.mxu2 %v6237_v7  ;;  %v6045_v7 = vor.u32 %v7002_v1, %v6044_v0  ;;  %v6493_v12 = vor.u32 %v7114_v4, %v6492_v2  ;;  %v5736_v0 = vld [vmem:[%s10609_s8 + $0x10] sm:$0xf]  ;;  %v6925_v1 = vld [vmem:[%s10609_s8 + $0x28] sm:$0xf0]  ;;  %v6971_v4 = vld [vmem:[%s10609_s8 + $0x19c] sm:$0xf] }
 0x2d4   :  { %4051 = vmatpush.bf16.msrb.mxu1 %v5957_v13  ;;  %v6016_v13 = vld [vmem:[%s10609_s8 + $0x240] sm:$0xf]  ;;  %v7037_v2 = vld [vmem:[%s10609_s8 + $0x3a8] sm:$0xf0]  ;;  %v5737_v10 = vor.u32 %v6925_v1, %v5736_v0  ;;  %v5990_v1 = vld [vmem:[%s10609_s8 + $0x224] sm:$0xf0] }
 0x2d5   :  { %4079 = vmatpush.bf16.msrb.mxu0 %v6405_v16  ;;  %v6464_v16 = vld [vmem:[%s10609_s8 + $0x5c0] sm:$0xf]  ;;  %v6017_v20 = vor.u32 %v6995_v14, %v6016_v13  ;;  %v6102_v13 = vld [vmem:[%s10609_s8 + $0x304] sm:$0xf0]  ;;  %v6985_v0 = vld [vmem:[%s10609_s8 + $0x20c] sm:$0xf] }
 0x2d6   :  { %4036 = vmatpush.bf16.msrb.mxu3 %v5761_v19  ;;  %v6946_v19 = vld [vmem:[%s10609_s8 + $0xd0] sm:$0xf0] }
 0x2d7   :  { %4064 = vmatpush.bf16.msrb.mxu2 %v6209_v23  ;;  %4052 = vmatmul.bf16.vlgmr.msrb.gmra.mxu1 %v9562_v3 }
 0x2d8   :  { %4100 = vmatpush.bf16.msra.mxu1 %v6157_v50  ;;  %4080 = vmatmul.bf16.vlgmr.msrb.gmra.mxu0 %v9570_v11  ;;  %v7107_v50 = vld [vmem:[%s10609_s8 + $0x5d8] sm:$0xf0] }
 0x2d9   :  { %4128 = vmatpush.bf16.msra.mxu0 %v6605_v18  ;;  %v5820_v18 = vld [vmem:[%s10609_s8 + $0xb8] sm:$0xf]  ;;  %v6465_v23 = vor.u32 %v7107_v50, %v6464_v16  ;;  %v7125_v16 = vld [vmem:[%s10609_s8 + $0x66c] sm:$0xf]  ;;  %v6550_v50 = vld [vmem:[%s10609_s8 + $0x684] sm:$0xf0] }
 0x2da   :  { %4037 = vmatpush.bf16.msrb.mxu3 %v5733_v35  ;;  %v5821_v25 = vor.u32 %v6946_v19, %v5820_v18  ;;  %v7051_v35 = vld [vmem:[%s10609_s8 + $0x418] sm:$0xf0]  ;;  %v6964_v18 = vld [vmem:[%s10609_s8 + $0x164] sm:$0xf]  ;;  %v5906_v19 = vld [vmem:[%s10609_s8 + $0x17c] sm:$0xf0] }
 0x2db   :  { %4065 = vmatpush.bf16.msrb.mxu2 %v6181_v39  ;;  %v6981_v39 = vld [vmem:[%s10609_s8 + $0x1e8] sm:$0xf0] }
 0x2dc   :  { %4101 = vmatpush.bf16.msra.mxu1 %v6129_v30  ;;  %v5792_v30 = vld [vmem:[%s10609_s8 + $0x80] sm:$0xf]  ;;  %v5961_v46 = vor.u32 %v6981_v39, %v5960_v54  ;;  %v6525_v54 = vor.u32 %v7118_v26, %v6522_v27  ;;  %v6046_v39 = vld [vmem:[%s10609_s8 + $0x294] sm:$0xf0] }
 0x2dd   :  { %4129 = vmatpush.bf16.msra.mxu0 %v6577_v34  ;;  %4038 = vmatmul.bf16.vlgmr.msrb.gmra.mxu3 %v9604_v28  ;;  %v6240_v34 = vld [vmem:[%s10609_s8 + $0x400] sm:$0xf]  ;;  %v5793_v44 = vor.u32 %v6939_v31, %v5792_v30  ;;  %v6957_v30 = vld [vmem:[%s10609_s8 + $0x12c] sm:$0xf]  ;;  %v5878_v31 = vld [vmem:[%s10609_s8 + $0x144] sm:$0xf0] }
 0x2de   :  { %4086 = vmatpush.bf16.msra.mxu3 %v5933_v40  ;;  %4066 = vmatmul.bf16.vlgmr.msrb.gmra.mxu2 %v9612_v32  ;;  %v6408_v40 = vld [vmem:[%s10609_s8 + $0x550] sm:$0xf] }
 0x2df   :  { %4114 = vmatpush.bf16.msra.mxu2 %v6381_v45  ;;  %v7027_v45 = vld [vmem:[%s10609_s8 + $0x35c] sm:$0xf]  ;;  %v6409_v52 = vor.u32 %v7093_v41, %v6408_v40  ;;  %v5881_v40 = vor.u32 %v6957_v30, %v5878_v31 }
 0x2e0   :  { %4102 = vmatpush.bf16.msra.mxu1 %v6101_v42  ;;  %v6241_v42 = vor.u32 %v7051_v35, %v6240_v34  ;;  %v6161_v53 = vor.u32 %v7027_v45, %v6158_v60  ;;  %v7069_v34 = vld [vmem:[%s10609_s8 + $0x4ac] sm:$0xf]  ;;  %v6326_v35 = vld [vmem:[%s10609_s8 + $0x4c4] sm:$0xf0]  ;;  %v7111_v41 = vld [vmem:[%s10609_s8 + $0x5fc] sm:$0xf] }
 0x2e1   :  { %4130 = vmatpush.bf16.msra.mxu0 %v6549_v48  ;;  %v6932_v48 = vld [vmem:[%s10609_s8 + $0x60] sm:$0xf0]  ;;  %v6329_v45 = vor.u32 %v7069_v34, %v6326_v35  ;;  %v6950_v60 = vld [vmem:[%s10609_s8 + $0xf4] sm:$0xf]  ;;  %v6584_v34 = vld [vmem:[%s10609_s8 + $0x6a8] sm:$0xf] }
 0x2e2   :  { %4087 = vmatpush.bf16.msra.mxu3 %v5905_v51  ;;  %v7044_v51 = vld [vmem:[%s10609_s8 + $0x3e0] sm:$0xf0]  ;;  %v5765_v58 = vor.u32 %v6932_v48, %v5764_v17  ;;  %v6298_v17 = vld [vmem:[%s10609_s8 + $0x48c] sm:$0xf0] }
 0x2e3   :  { %4115 = vmatpush.bf16.msra.mxu2 %v6353_v56  ;;  %v7020_v56 = vld [vmem:[%s10609_s8 + $0x324] sm:$0xf] }
 0x2e4   :  { %4103 = vmatpush.bf16.msra.mxu1 %v6073_v59  ;;  %v6130_v59 = vld [vmem:[%s10609_s8 + $0x33c] sm:$0xf0]  ;;  %v7136_v35 = vld [vmem:[%s10609_s8 + $0x6c0] sm:$0xf0] }
 0x2e5   :  { %4131 = vmatpush.bf16.msra.mxu0 %v6521_v63  ;;  %v6213_v63 = vor.u32 %v7044_v51, %v6212_v49  ;;  %v6133_v6 = vor.u32 %v7020_v56, %v6130_v59  ;;  %v6018_v49 = vld [vmem:[%s10609_s8 + $0x25c] sm:$0xf0]  ;;  %v5853_v51 = vor.u32 %v6950_v60, %v5850_v37  ;;  %v6301_v56 = vor.u32 %v7062_v47, %v6298_v17 }
 0x2e6   :  { %4088 = vmatpush.bf16.msra.mxu3 %v5877_v43  ;;  %v6184_v43 = vld [vmem:[%s10609_s8 + $0x390] sm:$0xf]  ;;  %v6388_v37 = vld [vmem:[%s10609_s8 + $0x520] sm:$0xf]  ;;  %v6585_v47 = vor.u32 %v7136_v35, %v6584_v34  ;;  %v6947_v34 = vld [vmem:[%s10609_s8 + $0xd8] sm:$0xf0] }
 0x2e7   :  { %4116 = vmatpush.bf16.msra.mxu2 %v6325_v5  ;;  %v5934_v5 = vld [vmem:[%s10609_s8 + $0x1b4] sm:$0xf0]  ;;  %v6185_v14 = vor.u32 %v7037_v2, %v6184_v43  ;;  %v7097_v2 = vld [vmem:[%s10609_s8 + $0x58c] sm:$0xf] }
 0x2e8   :  { %4104 = vmatpush.bf16.msra.mxu1 %v6045_v7  ;;  %v6382_v7 = vld [vmem:[%s10609_s8 + $0x534] sm:$0xf0] }
 0x2e9   :  { %4132 = vmatpush.bf16.msra.mxu0 %v6493_v12  ;;  %v7013_v12 = vld [vmem:[%s10609_s8 + $0x2ec] sm:$0xf] }
 0x2ea   :  { %4089 = vmatpush.bf16.msra.mxu3 %v5849_v15  ;;  %v5937_v15 = vor.u32 %v6971_v4, %v5934_v5  ;;  %v6438_v4 = vld [vmem:[%s10609_s8 + $0x5a4] sm:$0xf0]  ;;  %v6273_v5 = vor.u32 %v7055_v61, %v6270_v62  ;;  %v7080_v62 = vld [vmem:[%s10609_s8 + $0x500] sm:$0xf0] }
 0x2eb   :  { %4117 = vmatpush.bf16.msra.mxu2 %v6297_v55  ;;  %v6385_v55 = vor.u32 %v7083_v36, %v6382_v7  ;;  %v5794_v36 = vld [vmem:[%s10609_s8 + $0x9c] sm:$0xf0]  ;;  %v5993_v7 = vor.u32 %v6985_v0, %v5990_v1  ;;  %v6360_v61 = vld [vmem:[%s10609_s8 + $0x4e8] sm:$0xf]  ;;  %v6080_v0 = vld [vmem:[%s10609_s8 + $0x2b8] sm:$0xf] }
 0x2ec   :  { %4105 = vmatpush.bf16.msra.mxu1 %v6017_v20  ;;  %v6105_v20 = vor.u32 %v7013_v12, %v6102_v13  ;;  %v6978_v12 = vld [vmem:[%s10609_s8 + $0x1d4] sm:$0xf]  ;;  %v6441_v13 = vor.u32 %v7097_v2, %v6438_v4  ;;  %v6528_v2 = vld [vmem:[%s10609_s8 + $0x638] sm:$0xf] }
 0x2ed   :  { %4133 = vmatpush.bf16.msra.mxu0 %v6465_v23  ;;  %v6553_v23 = vor.u32 %v7125_v16, %v6550_v50  ;;  %v6410_v16 = vld [vmem:[%s10609_s8 + $0x56c] sm:$0xf0]  ;;  %v7010_v1 = vld [vmem:[%s10609_s8 + $0x2d0] sm:$0xf0] }
 0x2ee   :  { %4090 = vmatpush.bf16.msra.mxu3 %v5821_v25  ;;  %v5909_v25 = vor.u32 %v6964_v18, %v5906_v19  ;;  %v7031_v18 = vld [vmem:[%s10609_s8 + $0x378] sm:$0xf0]  ;;  %v6612_v19 = vld [vmem:[%s10609_s8 + $0x6e0] sm:$0xf]  ;;  %v7122_v4 = vld [vmem:[%s10609_s8 + $0x650] sm:$0xf0] }
 0x2ef   :  { %4118 = vmatpush.bf16.msra.mxu2 %v6269_v29  ;;  %v6357_v29 = vor.u32 %v7076_v21, %v6354_v22  ;;  %v7143_v21 = vld [vmem:[%s10609_s8 + $0x6f8] sm:$0xf0]  ;;  %v6929_v22 = vld [vmem:[%s10609_s8 + $0x4c] sm:$0xf] }
 0x2f0   :  { %4106 = vmatpush.bf16.msra.mxu1 %v5989_v33  ;;  %v6077_v33 = vor.u32 %v7006_v8, %v6074_v24  ;;  %v7041_v24 = vld [vmem:[%s10609_s8 + $0x3cc] sm:$0xf]  ;;  %v6613_v30 = vor.u32 %v7143_v21, %v6612_v19  ;;  %v6954_v19 = vld [vmem:[%s10609_s8 + $0x110] sm:$0xf0]  ;;  %v6304_v21 = vld [vmem:[%s10609_s8 + $0x478] sm:$0xf] }
 0x2f1   :  { %4134 = vmatpush.bf16.msra.mxu0 %v6437_v38  ;;  %v6999_v38 = vld [vmem:[%s10609_s8 + $0x27c] sm:$0xf] }
 0x2f2   :  { %4091 = vmatpush.bf16.msra.mxu3 %v5793_v44  ;;  %v6494_v44 = vld [vmem:[%s10609_s8 + $0x614] sm:$0xf0] }
 0x2f3   :  { %4119 = vmatpush.bf16.msra.mxu2 %v6241_v42  ;;  %v6049_v42 = vor.u32 %v6999_v38, %v6046_v39  ;;  %v6497_v48 = vor.u32 %v7111_v41, %v6494_v44  ;;  %v6922_v38 = vld [vmem:[%s10609_s8 + $0x14] sm:$0xf]  ;;  %v5738_v39 = vld [vmem:[%s10609_s8 + $0x2c] sm:$0xf0]  ;;  %v5940_v44 = vld [vmem:[%s10609_s8 + $0x1a0] sm:$0xf] }
 0x2f4   :  { %4107 = vmatpush.bf16.msra.mxu1 %v5961_v46  ;;  %v6992_v46 = vld [vmem:[%s10609_s8 + $0x244] sm:$0xf]  ;;  %v6186_v41 = vld [vmem:[%s10609_s8 + $0x3ac] sm:$0xf0]  ;;  %v5741_v17 = vor.u32 %v6922_v38, %v5738_v39  ;;  %v7059_v38 = vld [vmem:[%s10609_s8 + $0x458] sm:$0xf0] }
 0x2f5   :  { %4135 = vmatpush.bf16.msra.mxu0 %v6409_v52  ;;  %v7104_v52 = vld [vmem:[%s10609_s8 + $0x5c4] sm:$0xf]  ;;  %v6021_v59 = vor.u32 %v6992_v46, %v6018_v49  ;;  %v7017_v46 = vld [vmem:[%s10609_s8 + $0x308] sm:$0xf0] }
 0x2f6   :  { %4092 = vmatpush.bf16.msra.mxu3 %v5765_v58  ;;  %v5822_v58 = vld [vmem:[%s10609_s8 + $0xd4] sm:$0xf0] }
 0x2f7   :  { %4120 = vmatpush.bf16.msra.mxu2 %v6213_v63  ;;  %4108 = vmatmul.bf16.vlgmr.msra.gmra.mxu1 %v9562_v3 }
 0x2f8   :  { %4156 = vmatpush.bf16.msrb.mxu1 %v6161_v53  ;;  %4136 = vmatmul.bf16.vlgmr.msra.gmra.mxu0 %v9570_v11  ;;  %v6466_v53 = vld [vmem:[%s10609_s8 + $0x5dc] sm:$0xf0] }
 0x2f9   :  { %4184 = vmatpush.bf16.msrb.mxu0 %v6609_v57  ;;  %v6943_v57 = vld [vmem:[%s10609_s8 + $0xbc] sm:$0xf]  ;;  %v6469_v63 = vor.u32 %v7104_v52, %v6466_v53  ;;  %v6556_v52 = vld [vmem:[%s10609_s8 + $0x670] sm:$0xf]  ;;  %v7129_v53 = vld [vmem:[%s10609_s8 + $0x688] sm:$0xf0] }
 0x2fa   :  { %4093 = vmatpush.bf16.msra.mxu3 %v5737_v10  ;;  %v5825_v43 = vor.u32 %v6943_v57, %v5822_v58  ;;  %v6242_v10 = vld [vmem:[%s10609_s8 + $0x41c] sm:$0xf0]  ;;  %v5912_v57 = vld [vmem:[%s10609_s8 + $0x168] sm:$0xf]  ;;  %v6968_v58 = vld [vmem:[%s10609_s8 + $0x180] sm:$0xf0] }
 0x2fb   :  { %4121 = vmatpush.bf16.msra.mxu2 %v6185_v14  ;;  %v5962_v14 = vld [vmem:[%s10609_s8 + $0x1ec] sm:$0xf0] }
 0x2fc   :  { %4157 = vmatpush.bf16.msrb.mxu1 %v6133_v6  ;;  %v6936_v6 = vld [vmem:[%s10609_s8 + $0x84] sm:$0xf]  ;;  %v5965_v8 = vor.u32 %v6978_v12, %v5962_v14  ;;  %v6529_v12 = vor.u32 %v7122_v4, %v6528_v2  ;;  %v7003_v14 = vld [vmem:[%s10609_s8 + $0x298] sm:$0xf0]  ;;  %v6933_v2 = vld [vmem:[%s10609_s8 + $0x68] sm:$0xf0] }
 0x2fd   :  { %4185 = vmatpush.bf16.msrb.mxu0 %v6581_v9  ;;  %4094 = vmatmul.bf16.vlgmr.msra.gmra.mxu3 %v9604_v28  ;;  %v7048_v9 = vld [vmem:[%s10609_s8 + $0x404] sm:$0xf]  ;;  %v5797_v50 = vor.u32 %v6936_v6, %v5794_v36  ;;  %v5884_v6 = vld [vmem:[%s10609_s8 + $0x130] sm:$0xf]  ;;  %v6961_v36 = vld [vmem:[%s10609_s8 + $0x148] sm:$0xf0] }
 0x2fe   :  { %4142 = vmatpush.bf16.msrb.mxu3 %v5937_v15  ;;  %4122 = vmatmul.bf16.vlgmr.msra.gmra.mxu2 %v9612_v32  ;;  %v7090_v15 = vld [vmem:[%s10609_s8 + $0x554] sm:$0xf] }
 0x2ff   :  { %4170 = vmatpush.bf16.msrb.mxu2 %v6385_v55  ;;  %v6164_v55 = vld [vmem:[%s10609_s8 + $0x360] sm:$0xf]  ;;  %v6413_v26 = vor.u32 %v7090_v15, %v6410_v16  ;;  %v5885_v15 = vor.u32 %v6961_v36, %v5884_v6  ;;  %v6220_v6 = vld [vmem:[%s10609_s8 + $0x3d0] sm:$0xf]  ;;  %v7045_v36 = vld [vmem:[%s10609_s8 + $0x3e8] sm:$0xf0] }
 0x300   :  { %4158 = vmatpush.bf16.msrb.mxu1 %v6105_v20  ;;  %v6245_v20 = vor.u32 %v7048_v9, %v6242_v10  ;;  %v6165_v27 = vor.u32 %v7031_v18, %v6164_v55  ;;  %v6332_v9 = vld [vmem:[%s10609_s8 + $0x4b0] sm:$0xf]  ;;  %v7073_v10 = vld [vmem:[%s10609_s8 + $0x4c8] sm:$0xf0]  ;;  %v6500_v16 = vld [vmem:[%s10609_s8 + $0x600] sm:$0xf] }
 0x301   :  { %4186 = vmatpush.bf16.msrb.mxu0 %v6553_v23  ;;  %v5766_v23 = vld [vmem:[%s10609_s8 + $0x64] sm:$0xf0]  ;;  %v6333_v55 = vor.u32 %v7073_v10, %v6332_v9  ;;  %v5856_v18 = vld [vmem:[%s10609_s8 + $0xf8] sm:$0xf] }
 0x302   :  { %4143 = vmatpush.bf16.msrb.mxu3 %v5909_v25  ;;  %v6214_v25 = vld [vmem:[%s10609_s8 + $0x3e4] sm:$0xf0]  ;;  %v5769_v31 = vor.u32 %v6929_v22, %v5766_v23  ;;  %v7066_v22 = vld [vmem:[%s10609_s8 + $0x490] sm:$0xf0] }
 0x303   :  { %4171 = vmatpush.bf16.msrb.mxu2 %v6357_v29  ;;  %v6136_v29 = vld [vmem:[%s10609_s8 + $0x328] sm:$0xf] }
 0x304   :  { %4159 = vmatpush.bf16.msrb.mxu1 %v6077_v33  ;;  %v7024_v33 = vld [vmem:[%s10609_s8 + $0x340] sm:$0xf0] }
 0x305   :  { %4187 = vmatpush.bf16.msrb.mxu0 %v6525_v54  ;;  %v6217_v54 = vor.u32 %v7041_v24, %v6214_v25  ;;  %v6137_v60 = vor.u32 %v7024_v33, %v6136_v29  ;;  %v6996_v24 = vld [vmem:[%s10609_s8 + $0x260] sm:$0xf0]  ;;  %v5828_v33 = vld [vmem:[%s10609_s8 + $0xc0] sm:$0xf] }
 0x306   :  { %4144 = vmatpush.bf16.msrb.mxu3 %v5881_v40  ;;  %v7034_v40 = vld [vmem:[%s10609_s8 + $0x394] sm:$0xf]  ;;  %v7108_v29 = vld [vmem:[%s10609_s8 + $0x5e0] sm:$0xf0] }
 0x307   :  { %4172 = vmatpush.bf16.msrb.mxu2 %v6329_v45  ;;  %v6975_v45 = vld [vmem:[%s10609_s8 + $0x1b8] sm:$0xf0]  ;;  %v6189_v49 = vor.u32 %v7034_v40, %v6186_v41  ;;  %v5996_v41 = vld [vmem:[%s10609_s8 + $0x210] sm:$0xf] }
 0x308   :  { %4160 = vmatpush.bf16.msrb.mxu1 %v6049_v42  ;;  %v7087_v42 = vld [vmem:[%s10609_s8 + $0x538] sm:$0xf0] }
 0x309   :  { %4188 = vmatpush.bf16.msrb.mxu0 %v6497_v48  ;;  %v6108_v48 = vld [vmem:[%s10609_s8 + $0x2f0] sm:$0xf] }
 0x30a   :  { %4145 = vmatpush.bf16.msrb.mxu3 %v5853_v51  ;;  %v5941_v51 = vor.u32 %v6975_v45, %v5940_v44  ;;  %v6989_v44 = vld [vmem:[%s10609_s8 + $0x228] sm:$0xf0] }
 0x30b   :  { %4173 = vmatpush.bf16.msrb.mxu2 %v6301_v56  ;;  %v6389_v56 = vor.u32 %v7087_v42, %v6388_v37  ;;  %v6444_v37 = vld [vmem:[%s10609_s8 + $0x590] sm:$0xf]  ;;  %v7101_v42 = vld [vmem:[%s10609_s8 + $0x5a8] sm:$0xf0] }
 0x30c   :  { %4161 = vmatpush.bf16.msrb.mxu1 %v6021_v59  ;;  %v6109_v59 = vor.u32 %v7017_v46, %v6108_v48  ;;  %v6940_v48 = vld [vmem:[%s10609_s8 + $0xa0] sm:$0xf0] }
 0x30d   :  { %4189 = vmatpush.bf16.msrb.mxu0 %v6469_v63  ;;  %v6557_v63 = vor.u32 %v7129_v53, %v6556_v52  ;;  %v7052_v52 = vld [vmem:[%s10609_s8 + $0x420] sm:$0xf0] }
 0x30e   :  { %4146 = vmatpush.bf16.msrb.mxu3 %v5825_v43  ;;  %v5913_v43 = vor.u32 %v6968_v58, %v5912_v57  ;;  %v6445_v57 = vor.u32 %v7101_v42, %v6444_v37  ;;  %v5968_v58 = vld [vmem:[%s10609_s8 + $0x1d8] sm:$0xf] }
 0x30f   :  { %4174 = vmatpush.bf16.msrb.mxu2 %v6273_v5  ;;  %v6361_v5 = vor.u32 %v7080_v62, %v6360_v61  ;;  %v6416_v62 = vld [vmem:[%s10609_s8 + $0x558] sm:$0xf] }
 0x310   :  { %4162 = vmatpush.bf16.msrb.mxu1 %v5993_v7  ;;  %v6081_v7 = vor.u32 %v7010_v1, %v6080_v0 }
 0x311   :  { %4190 = vmatpush.bf16.msrb.mxu0 %v6441_v13  ;;  %v6052_v13 = vld [vmem:[%s10609_s8 + $0x280] sm:$0xf] }
 0x312   :  { %4147 = vmatpush.bf16.msrb.mxu3 %v5797_v50  ;;  %v7115_v50 = vld [vmem:[%s10609_s8 + $0x618] sm:$0xf0] }
 0x313   :  { %4175 = vmatpush.bf16.msrb.mxu2 %v6245_v20  ;;  %v6053_v20 = vor.u32 %v7003_v14, %v6052_v13  ;;  %v6501_v23 = vor.u32 %v7115_v50, %v6500_v16  ;;  %v6221_v13 = vor.u32 %v7045_v36, %v6220_v6  ;;  %v5744_v14 = vld [vmem:[%s10609_s8 + $0x18] sm:$0xf] }
 0x314   :  { %4163 = vmatpush.bf16.msrb.mxu1 %v5965_v8  ;;  %v6024_v8 = vld [vmem:[%s10609_s8 + $0x248] sm:$0xf]  ;;  %v3885_v25 = vpop.f32.mrf.mxu1 }
 0x315   :  { %4191 = vmatpush.bf16.msrb.mxu0 %v6413_v26  ;;  %v5857_v26 = vor.u32 %v6954_v19, %v5856_v18  ;;  %v6025_v35 = vor.u32 %v6996_v24, %v6024_v8  ;;  %v3913_v45 = vpop.f32.mrf.mxu0  ;;  %v7038_v18 = vld [vmem:[%s10609_s8 + $0x3b0] sm:$0xf0] }
 0x316   :  { %4148 = vmatpush.bf16.msrb.mxu3 %v5769_v31  ;;  %v6305_v31 = vor.u32 %v7066_v22, %v6304_v21 }
 0x317   :  { %4176 = vmatpush.bf16.msrb.mxu2 %v6217_v54  ;;  %4164 = vmatmul.bf16.vlgmr.msrb.gmra.mxu1 %v9562_v3  ;;  %v6276_v54 = vld [vmem:[%s10609_s8 + $0x440] sm:$0xf] }
 0x318   :  { %4212 = vmatpush.bf16.msra.mxu1 %v6165_v27  ;;  %4192 = vmatmul.bf16.vlgmr.msrb.gmra.mxu0 %v9570_v11  ;;  %v6472_v27 = vld [vmem:[%s10609_s8 + $0x5c8] sm:$0xf] }
 0x319   :  { %4240 = vmatpush.bf16.msra.mxu0 %v6613_v30  ;;  %v10473_v30 = vld [vmem:[%s10612_s9] sm:$0x7f]  ;;  %v6473_v39 = vor.u32 %v7108_v29, %v6472_v27 }
 0x31a   :  { %4149 = vmatpush.bf16.msrb.mxu3 %v5741_v17  ;;  %v2696_v40 = vperm.slane %v10473_v30, 0  ;;  %v5800_v17 = vld [vmem:[%s10609_s8 + $0x88] sm:$0xf] }
 0x31b   :  { %4177 = vmatpush.bf16.msrb.mxu2 %v6189_v49  ;;  %v5997_v49 = vor.u32 %v6989_v44, %v5996_v41  ;;  %v5801_v61 = vor.u32 %v6940_v48, %v5800_v17 }
 0x31c   :  { %4213 = vmatpush.bf16.msra.mxu1 %v6137_v60  ;;  %v5829_v60 = vor.u32 %v6947_v34, %v5828_v33  ;;  %v3887_v4 = vpop.f32.mrf.mxu1 }
 0x31d   :  { %4241 = vmatpush.bf16.msra.mxu0 %v6585_v47  ;;  %4150 = vmatmul.bf16.vlgmr.msrb.gmra.mxu3 %v9604_v28  ;;  %v6277_v47 = vor.u32 %v7059_v38, %v6276_v54  ;;  %v3915_v16 = vpop.f32.mrf.mxu0 }
 0x31e   :  { %4198 = vmatpush.bf16.msra.mxu3 %v5941_v51  ;;  %4178 = vmatmul.bf16.vlgmr.msrb.gmra.mxu2 %v9612_v32  ;;  %v6248_v51 = vld [vmem:[%s10609_s8 + $0x408] sm:$0xf] }
 0x31f   :  { %4226 = vmatpush.bf16.msra.mxu2 %v6389_v56  ;;  %v6249_v1 = vor.u32 %v7052_v52, %v6248_v51 }
 0x320   :  { %4214 = vmatpush.bf16.msra.mxu1 %v6109_v59  ;;  %v3871_v46 = vpop.f32.mrf.mxu3  ;;  %v6982_v59 = vld [vmem:[%s10609_s8 + $0x1f0] sm:$0xf0] }
 0x321   :  { %4242 = vmatpush.bf16.msra.mxu0 %v6557_v63  ;;  %v3872_v53 = vadd.f32 %v3871_v46, %v2696_v40  ;;  %v3899_v56 = vpop.f32.mrf.mxu2  ;;  %v7094_v63 = vld [vmem:[%s10609_s8 + $0x570] sm:$0xf0] }
 0x322   :  { %4199 = vmatpush.bf16.msra.mxu3 %v5913_v43  ;;  %v5772_v43 = vld [vmem:[%s10609_s8 + $0x50] sm:$0xf]  ;;  %v6417_v9 = vor.u32 %v7094_v63, %v6416_v62 }
 0x323   :  { %4227 = vmatpush.bf16.msra.mxu2 %v6361_v5  ;;  %v3886_v0 = vadd.f32 %v3885_v25, %v3872_v53  ;;  %v5969_v5 = vor.u32 %v6982_v59, %v5968_v58  ;;  %v5773_v10 = vor.u32 %v6933_v2, %v5772_v43  ;;  %v2697_v25 = vperm.slane %v10473_v30, 1 }
 0x324   :  { %4215 = vmatpush.bf16.msra.mxu1 %v6081_v7 }
 0x325   :  { %4243 = vmatpush.bf16.msra.mxu0 %v6529_v12  ;;  %v3900_v7 = vadd.f32 %v3899_v56, %v3886_v0  ;;  %v3969_v38 = vpop.f32.mrf.mxu0 }
 0x326   :  { %4200 = vmatpush.bf16.msra.mxu3 %v5885_v15  ;;  %v6926_v15 = vld [vmem:[%s10609_s8 + $0x30] sm:$0xf0] }
 0x327   :  { %4228 = vmatpush.bf16.msra.mxu2 %v6333_v55  ;;  %v3914_v12 = vadd.f32 %v3913_v45, %v3900_v7  ;;  %v6192_v55 = vld [vmem:[%s10609_s8 + $0x398] sm:$0xf]  ;;  %v5745_v22 = vor.u32 %v6926_v15, %v5744_v14 }
 0x328   :  { %4216 = vmatpush.bf16.msra.mxu1 %v6053_v20  ;;  %v3873_v50 = vpop.f32.mrf.mxu3  ;;  %v6193_v8 = vor.u32 %v7038_v18, %v6192_v55 }
 0x329   :  { %4244 = vmatpush.bf16.msra.mxu0 %v6501_v23  ;;  %v6614_v19 = vmul.f32 -1.442695, %v3914_v12  ;;  %v3874_v20 = vadd.f32 %v3873_v50, %v2696_v40  ;;  %v3901_v21 = vpop.f32.mrf.mxu2 }
 0x32a   :  { %4201 = vmatpush.bf16.msra.mxu3 %v5857_v26  ;;  %v3941_v26 = vpop.f32.mrf.mxu1 }
 0x32b   :  { %4229 = vmatpush.bf16.msra.mxu2 %v6305_v31  ;;  %7148 = vpow2.f32 %v6614_v19  ;;  %v3888_v23 = vadd.f32 %v3887_v4, %v3874_v20 }
 0x32c   :  { %4217 = vmatpush.bf16.msra.mxu1 %v6025_v35 }
 0x32d   :  { %4245 = vmatpush.bf16.msra.mxu0 %v6473_v39  ;;  %v3902_v24 = vadd.f32 %v3901_v21, %v3888_v23  ;;  %v3971_v48 = vpop.f32.mrf.mxu0 }
 0x32e   :  { %4202 = vmatpush.bf16.msra.mxu3 %v5829_v60 }
 0x32f   :  { %4230 = vmatpush.bf16.msra.mxu2 %v6277_v47  ;;  %v3916_v27 = vadd.f32 %v3915_v16, %v3902_v24 }
 0x330   :  { %4218 = vmatpush.bf16.msra.mxu1 %v5997_v49  ;;  %v3927_v29 = vpop.f32.mrf.mxu3  ;;  %v2698_v49 = vperm.slane %v10473_v30, 2 }
 0x331   :  { %4246 = vmatpush.bf16.msra.mxu0 %v6445_v57  ;;  %v7149_v31 = vpop.eup %7148  ;;  %v6621_v33 = vmul.f32 -1.442695, %v3916_v27  ;;  %v3928_v34 = vadd.f32 %v3927_v29, %v2697_v25  ;;  %v3955_v35 = vpop.f32.mrf.mxu2 }
 0x332   :  { %4203 = vmatpush.bf16.msra.mxu3 %v5801_v61  ;;  %v4296_v54 = vadd.f32 1.0, %v7149_v31  ;;  %v3943_v40 = vpop.f32.mrf.mxu1 }
 0x333   :  { %4231 = vmatpush.bf16.msra.mxu2 %v6249_v1  ;;  %7150 = vpow2.f32 %v6621_v33 }
 0x334   :  { %4219 = vmatpush.bf16.msra.mxu1 %v5969_v5  ;;  %7152 = vrcp.f32 %v4296_v54  ;;  %v4321_v51 = vand.u32 2147483648, %v4296_v54  ;;  %v4319_v53 = vand.u32 2147483647, %v4296_v54  ;;  %vm4315_vm2 = vweird.f32 %v4296_v54 }
 0x335   :  { %4247 = vmatpush.bf16.msra.mxu0 %v6417_v9 }
 0x336   :  { %4204 = vmatpush.bf16.msra.mxu3 %v5773_v10  ;;  %v4322_v0 = vor.u32 1.1754944e-38, %v4321_v51  ;;  %vm4320_vm4 = vcmp.eq.f32.partialorder %v4319_v53, 8.507059e+37  ;;  %v4025_v10 = vpop.f32.mrf.mxu0  ;;  %v2699_v51 = vperm.slane %v10473_v30, 3 }
 0x337   :  { %4232 = vmatpush.bf16.msra.mxu2 %v6221_v13  ;;  %4220 = vmatmul.bf16.vlgmr.msra.gmra.mxu1 %v9562_v3  ;;  %v3942_v3 = vadd.f32 %v3941_v26, %v3928_v34 }
 0x338   :  { %4248 = vmatmul.bf16.vlgmr.msra.gmra.mxu0 %v9570_v11  ;;  %v3929_v41 = vpop.f32.mrf.mxu3 }
 0x339   :  { %v3956_v11 = vadd.f32 %v3955_v35, %v3942_v3  ;;  %v7151_v44 = vpop.eup %7150  ;;  %v3930_v60 = vadd.f32 %v3929_v41, %v2697_v25  ;;  %v3957_v47 = vpop.f32.mrf.mxu2 }
 0x33a   :  { %4205 = vmatpush.bf16.msra.mxu3 %v5745_v22  ;;  %v7153_v37 = vpop.eup %7152  ;;  %v4303_v42 = vadd.f32 1.0, %v7151_v44  ;;  %v3997_v43 = vpop.f32.mrf.mxu1 }
 0x33b   :  { %4233 = vmatpush.bf16.msra.mxu2 %v6193_v8  ;;  %v3970_v39 = vadd.f32 %v3969_v38, %v3956_v11  ;;  %v4311_v17 = vmul.f32 %v7153_v37, %v4296_v54  ;;  %vm4316_vm1 = vweird.f32 %v7153_v37 }
 0x33c   :  { %vm4317_vm3 = vmor %vm4315_vm2, %vm4316_vm1  ;;  %v4426_v9 = vand.u32 2147483648, %v4303_v42  ;;  %v4424_v13 = vand.u32 2147483647, %v4303_v42  ;;  %vm4420_vm6 = vweird.f32 %v4303_v42 }
 0x33d   :  { %4206 = vmatmul.bf16.vlgmr.msra.gmra.mxu3 %v9604_v28  ;;  %v6615_v45 = vmul.f32 -1.442695, %v3970_v39  ;;  %v3944_v28 = vadd.f32 %v3943_v40, %v3930_v60  ;;  %v4312_v46 = vsub.f32 1.0, %v4311_v17 }
 0x33e   :  { %4234 = vmatmul.bf16.vlgmr.msra.gmra.mxu2 %v9612_v32  ;;  %v4427_v20 = vor.u32 1.1754944e-38, %v4426_v9  ;;  %vm4425_vm8 = vcmp.eq.f32.partialorder %v4424_v13, 8.507059e+37  ;;  %v4027_v54 = vpop.f32.mrf.mxu0 }
 0x33f   :  { %7154 = vpow2.f32 %v6615_v45  ;;  %v3958_v32 = vadd.f32 %v3957_v47, %v3944_v28  ;;  %v4313_v52 = vmul.f32 %v7153_v37, %v4312_v46 }
 0x340   :  { %7156 = vrcp.f32 %v4303_v42  ;;  %v3983_v57 = vpop.f32.mrf.mxu3 }
 0x341   :  { %v3972_v56 = vadd.f32 %v3971_v48, %v3958_v32  ;;  %v4314_v59 = vadd.f32 %v7153_v37, %v4313_v52  ;;  %v3984_v62 = vadd.f32 %v3983_v57, %v2698_v49  ;;  %v4011_v6 = vpop.f32.mrf.mxu2 }
 0x342   :  { %v3999_v25 = vpop.f32.mrf.mxu1 }
 0x343   :  { %v6622_v61 = vmul.f32 -1.442695, %v3972_v56  ;;  %v4318_v2 = vsel %vm4317_vm3, %v7153_v37, %v4314_v59  ;;  %v3998_v7 = vadd.f32 %v3997_v43, %v3984_v62 }
 0x344   :  { %v4323_v5 = vsel %vm4320_vm4, %v4322_v0, %v4318_v2 }
 0x345   :  { %v7155_v58 = vpop.eup %7154  ;;  %7158 = vpow2.f32 %v6622_v61  ;;  %4520 = vst [vmem:[%s10613_s10] sm:$0xff] %v4323_v5  ;;  %v4012_v14 = vadd.f32 %v4011_v6, %v3998_v7 }
 0x346   :  { %v7157_v63 = vpop.eup %7156  ;;  %v4297_v1 = vadd.f32 1.0, %v7155_v58 }
 0x347   :  { %v4416_v4 = vmul.f32 %v7157_v63, %v4303_v42  ;;  %vm4421_vm5 = vweird.f32 %v7157_v63  ;;  %v4026_v55 = vadd.f32 %v4025_v10, %v4012_v14 }
 0x348   :  { %7160 = vrcp.f32 %v4297_v1  ;;  %v3985_v15 = vpop.f32.mrf.mxu3  ;;  %vm4422_vm7 = vmor %vm4420_vm6, %vm4421_vm5  ;;  %v4336_v29 = vand.u32 2147483648, %v4297_v1  ;;  %v4334_v34 = vand.u32 2147483647, %v4297_v1  ;;  %vm4330_vm10 = vweird.f32 %v4297_v1 }
 0x349   :  { %v4417_v36 = vsub.f32 1.0, %v4416_v4  ;;  %v3986_v18 = vadd.f32 %v3985_v15, %v2698_v49  ;;  %v6616_v8 = vmul.f32 -1.442695, %v4026_v55  ;;  %v4013_v31 = vpop.f32.mrf.mxu2 }
 0x34a   :  { %v4337_v39 = vor.u32 1.1754944e-38, %v4336_v29  ;;  %vm4335_vm12 = vcmp.eq.f32.partialorder %v4334_v34, 8.507059e+37 }
 0x34b   :  { %v4418_v12 = vmul.f32 %v7157_v63, %v4417_v36  ;;  %v7159_v16 = vpop.eup %7158  ;;  %v4000_v27 = vadd.f32 %v3999_v25, %v3986_v18 }
 0x34c   :  { %v4304_v21 = vadd.f32 1.0, %v7159_v16 }
 0x34d   :  { %v4419_v50 = vadd.f32 %v7157_v63, %v4418_v12  ;;  %v4014_v35 = vadd.f32 %v4013_v31, %v4000_v27 }
 0x34e   :  { %v7161_v19 = vpop.eup %7160  ;;  %7162 = vrcp.f32 %v4304_v21  ;;  %v4441_v47 = vand.u32 2147483648, %v4304_v21  ;;  %v4439_v28 = vand.u32 2147483647, %v4304_v21  ;;  %vm4435_vm14 = vweird.f32 %v4304_v21 }
 0x34f   :  { %v4423_v22 = vsel %vm4422_vm7, %v7157_v63, %v4419_v50  ;;  %v4326_v23 = vmul.f32 %v7161_v19, %v4297_v1  ;;  %7164 = vpow2.f32 %v6616_v8  ;;  %vm4331_vm9 = vweird.f32 %v7161_v19 }
 0x350   :  { %v4428_v24 = vsel %vm4425_vm8, %v4427_v20, %v4423_v22  ;;  %v4028_v3 = vadd.f32 %v4027_v54, %v4014_v35  ;;  %vm4332_vm11 = vmor %vm4330_vm10, %vm4331_vm9  ;;  %v4442_v46 = vor.u32 1.1754944e-38, %v4441_v47  ;;  %vm4440_vm1 = vcmp.eq.f32.partialorder %v4439_v28, 8.507059e+37 }
 0x351   :  { %4527 = vst [vmem:[%s10613_s10 + $0x38] sm:$0xff] %v4428_v24  ;;  %v4327_v26 = vsub.f32 1.0, %v4326_v23 }
 0x352   :  { %v6623_v45 = vmul.f32 -1.442695, %v4028_v3 }
 0x353   :  { %v4328_v33 = vmul.f32 %v7161_v19, %v4327_v26 }
 0x354   :  { %v7163_v11 = vpop.eup %7162  ;;  %7166 = vpow2.f32 %v6623_v45  ;;  %v4053_v58 = vpop.f32.mrf.mxu1 }
 0x355   :  { %v4329_v38 = vadd.f32 %v7161_v19, %v4328_v33  ;;  %v7165_v40 = vpop.eup %7164  ;;  %v4431_v44 = vmul.f32 %v7163_v11, %v4304_v21  ;;  %vm4436_vm13 = vweird.f32 %v7163_v11  ;;  %v4081_v2 = vpop.f32.mrf.mxu0 }
 0x356   :  { %v4298_v37 = vadd.f32 1.0, %v7165_v40  ;;  %vm4437_vm15 = vmor %vm4435_vm14, %vm4436_vm13 }
 0x357   :  { %v4333_v41 = vsel %vm4332_vm11, %v7161_v19, %v4329_v38  ;;  %v4432_v42 = vsub.f32 1.0, %v4431_v44  ;;  %v2700_v38 = vperm.slane %v10473_v30, 4 }
 0x358   :  { %v4338_v60 = vsel %vm4335_vm12, %v4337_v39, %v4333_v41  ;;  %7168 = vrcp.f32 %v4298_v37  ;;  %v4351_v0 = vand.u32 2147483648, %v4298_v37  ;;  %v4349_v43 = vand.u32 2147483647, %v4298_v37 }
 0x359   :  { %4521 = vst [vmem:[%s10613_s10 + $0x8] sm:$0xff] %v4338_v60  ;;  %v4433_v17 = vmul.f32 %v7163_v11, %v4432_v42  ;;  %vm4345_vm3 = vweird.f32 %v4298_v37 }
 0x35a   :  { %v7167_v32 = vpop.eup %7166  ;;  %v4352_v7 = vor.u32 1.1754944e-38, %v4351_v0  ;;  %vm4350_vm5 = vcmp.eq.f32.partialorder %v4349_v43, 8.507059e+37 }
 0x35b   :  { %v4434_v48 = vadd.f32 %v7163_v11, %v4433_v17  ;;  %v4305_v56 = vadd.f32 1.0, %v7167_v32 }
 0x35c   :  { %v4055_v50 = vpop.f32.mrf.mxu1 }
 0x35d   :  { %v4438_v49 = vsel %vm4437_vm15, %v7163_v11, %v4434_v48  ;;  %7170 = vrcp.f32 %v4305_v56  ;;  %v4456_v18 = vand.u32 2147483648, %v4305_v56  ;;  %v4454_v21 = vand.u32 2147483647, %v4305_v56  ;;  %v4083_v24 = vpop.f32.mrf.mxu0 }
 0x35e   :  { %v7169_v52 = vpop.eup %7168  ;;  %v4443_v53 = vsel %vm4440_vm1, %v4442_v46, %v4438_v49  ;;  %vm4450_vm7 = vweird.f32 %v4305_v56 }
 0x35f   :  { %4528 = vst [vmem:[%s10613_s10 + $0x40] sm:$0xff] %v4443_v53  ;;  %v4341_v57 = vmul.f32 %v7169_v52, %v4298_v37  ;;  %vm4346_vm2 = vweird.f32 %v7169_v52  ;;  %v4457_v25 = vor.u32 1.1754944e-38, %v4456_v18  ;;  %vm4455_vm9 = vcmp.eq.f32.partialorder %v4454_v21, 8.507059e+37 }
 0x360   :  { %v4039_v59 = vpop.f32.mrf.mxu3  ;;  %vm4347_vm4 = vmor %vm4345_vm3, %vm4346_vm2 }
 0x361   :  { %v4342_v61 = vsub.f32 1.0, %v4341_v57  ;;  %v4040_v62 = vadd.f32 %v4039_v59, %v2699_v51  ;;  %v4067_v63 = vpop.f32.mrf.mxu2 }
 0x363   :  { %v4343_v1 = vmul.f32 %v7169_v52, %v4342_v61  ;;  %v4054_v4 = vadd.f32 %v4053_v58, %v4040_v62  ;;  %v7171_v36 = vpop.eup %7170 }
 0x364   :  { %v4446_v10 = vmul.f32 %v7171_v36, %v4305_v56  ;;  %vm4451_vm6 = vweird.f32 %v7171_v36 }
 0x365   :  { %v4344_v5 = vadd.f32 %v7169_v52, %v4343_v1  ;;  %v4068_v6 = vadd.f32 %v4067_v63, %v4054_v4  ;;  %vm4452_vm8 = vmor %vm4450_vm7, %vm4451_vm6 }
 0x366   :  { %v4447_v16 = vsub.f32 1.0, %v4446_v10 }
 0x367   :  { %v4348_v9 = vsel %vm4347_vm4, %v7169_v52, %v4344_v5  ;;  %v4082_v12 = vadd.f32 %v4081_v2, %v4068_v6 }
 0x368   :  { %v4041_v13 = vpop.f32.mrf.mxu3  ;;  %v4353_v14 = vsel %vm4350_vm5, %v4352_v7, %v4348_v9  ;;  %v4448_v20 = vmul.f32 %v7171_v36, %v4447_v16 }
 0x369   :  { %v4042_v15 = vadd.f32 %v4041_v13, %v2699_v51  ;;  %4522 = vst [vmem:[%s10613_s10 + $0x10] sm:$0xff] %v4353_v14  ;;  %v6617_v55 = vmul.f32 -1.442695, %v4082_v12  ;;  %v4069_v22 = vpop.f32.mrf.mxu2 }
 0x36a   :  { %v4449_v8 = vadd.f32 %v7171_v36, %v4448_v20 }
 0x36b   :  { %v4056_v19 = vadd.f32 %v4055_v50, %v4042_v15  ;;  %7172 = vpow2.f32 %v6617_v55  ;;  %v2701_v50 = vperm.slane %v10473_v30, 5 }
 0x36c   :  { %v4453_v27 = vsel %vm4452_vm8, %v7171_v36, %v4449_v8 }
 0x36d   :  { %v4070_v23 = vadd.f32 %v4069_v22, %v4056_v19  ;;  %v4458_v29 = vsel %vm4455_vm9, %v4457_v25, %v4453_v27 }
 0x36e   :  { %4529 = vst [vmem:[%s10613_s10 + $0x48] sm:$0xff] %v4458_v29 }
 0x36f   :  { %v4084_v26 = vadd.f32 %v4083_v24, %v4070_v23 }
 0x371   :  { %v6624_v31 = vmul.f32 -1.442695, %v4084_v26  ;;  %v7173_v33 = vpop.eup %7172 }
 0x372   :  { %v4299_v34 = vadd.f32 1.0, %v7173_v33 }
 0x373   :  { %7174 = vpow2.f32 %v6624_v31 }
 0x374   :  { %7176 = vrcp.f32 %v4299_v34  ;;  %v4109_v39 = vpop.f32.mrf.mxu1  ;;  %v4366_v45 = vand.u32 2147483648, %v4299_v34  ;;  %v4364_v42 = vand.u32 2147483647, %v4299_v34  ;;  %vm4360_vm11 = vweird.f32 %v4299_v34 }
 0x375   :  { %v4137_v17 = vpop.f32.mrf.mxu0 }
 0x376   :  { %v4367_v32 = vor.u32 1.1754944e-38, %v4366_v45  ;;  %vm4365_vm13 = vcmp.eq.f32.partialorder %v4364_v42, 8.507059e+37 }
 0x379   :  { %v7175_v35 = vpop.eup %7174 }
 0x37a   :  { %v4306_v54 = vadd.f32 1.0, %v7175_v35  ;;  %v7177_v3 = vpop.eup %7176 }
 0x37b   :  { %v4356_v11 = vmul.f32 %v7177_v3, %v4299_v34  ;;  %vm4361_vm10 = vweird.f32 %v7177_v3 }
 0x37c   :  { %7178 = vrcp.f32 %v4306_v54  ;;  %vm4362_vm12 = vmor %vm4360_vm11, %vm4361_vm10  ;;  %v4471_v58 = vand.u32 2147483648, %v4306_v54  ;;  %v4469_v63 = vand.u32 2147483647, %v4306_v54  ;;  %v4111_v0 = vpop.f32.mrf.mxu1  ;;  %vm4465_vm15 = vweird.f32 %v4306_v54 }
 0x37d   :  { %v4357_v41 = vsub.f32 1.0, %v4356_v11  ;;  %v4139_v36 = vpop.f32.mrf.mxu0 }
 0x37e   :  { %v4472_v4 = vor.u32 1.1754944e-38, %v4471_v58  ;;  %vm4470_vm2 = vcmp.eq.f32.partialorder %v4469_v63, 8.507059e+37 }
 0x37f   :  { %v4358_v37 = vmul.f32 %v7177_v3, %v4357_v41 }
 0x380   :  { %v4095_v40 = vpop.f32.mrf.mxu3 }
 0x381   :  { %v4096_v44 = vadd.f32 %v4095_v40, %v2700_v38  ;;  %v4123_v60 = vpop.f32.mrf.mxu2  ;;  %v4359_v48 = vadd.f32 %v7177_v3, %v4358_v37 }
 0x382   :  { %v7179_v28 = vpop.eup %7178 }
 0x383   :  { %v4110_v47 = vadd.f32 %v4109_v39, %v4096_v44  ;;  %v4461_v49 = vmul.f32 %v7179_v28, %v4306_v54  ;;  %v4363_v51 = vsel %vm4362_vm12, %v7177_v3, %v4359_v48  ;;  %vm4466_vm14 = vweird.f32 %v7179_v28 }
 0x384   :  { %v4368_v53 = vsel %vm4365_vm13, %v4367_v32, %v4363_v51  ;;  %vm4467_vm1 = vmor %vm4465_vm15, %vm4466_vm14 }
 0x385   :  { %v4124_v46 = vadd.f32 %v4123_v60, %v4110_v47  ;;  %v4462_v56 = vsub.f32 1.0, %v4461_v49  ;;  %4523 = vst [vmem:[%s10613_s10 + $0x18] sm:$0xff] %v4368_v53 }
 0x387   :  { %v4138_v52 = vadd.f32 %v4137_v17, %v4124_v46  ;;  %v4463_v62 = vmul.f32 %v7179_v28, %v4462_v56 }
 0x388   :  { %v4097_v57 = vpop.f32.mrf.mxu3 }
 0x389   :  { %v6618_v59 = vmul.f32 -1.442695, %v4138_v52  ;;  %v4098_v61 = vadd.f32 %v4097_v57, %v2700_v38  ;;  %v4464_v43 = vadd.f32 %v7179_v28, %v4463_v62  ;;  %v4125_v2 = vpop.f32.mrf.mxu2 }
 0x38b   :  { %7180 = vpow2.f32 %v6618_v59  ;;  %v4112_v1 = vadd.f32 %v4111_v0, %v4098_v61  ;;  %v4468_v6 = vsel %vm4467_vm1, %v7179_v28, %v4464_v43  ;;  %v2702_v59 = vperm.slane %v10473_v30, 6 }
 0x38c   :  { %v4473_v7 = vsel %vm4470_vm2, %v4472_v4, %v4468_v6 }
 0x38d   :  { %v4126_v5 = vadd.f32 %v4125_v2, %v4112_v1  ;;  %4530 = vst [vmem:[%s10613_s10 + $0x50] sm:$0xff] %v4473_v7 }
 0x38f   :  { %v4140_v9 = vadd.f32 %v4139_v36, %v4126_v5 }
 0x391   :  { %v7181_v10 = vpop.eup %7180  ;;  %v6625_v12 = vmul.f32 -1.442695, %v4140_v9 }
 0x392   :  { %v4300_v13 = vadd.f32 1.0, %v7181_v10 }
 0x393   :  { %7182 = vpow2.f32 %v6625_v12 }
 0x394   :  { %7184 = vrcp.f32 %v4300_v13  ;;  %v4165_v19 = vpop.f32.mrf.mxu1  ;;  %v4381_v21 = vand.u32 2147483648, %v4300_v13  ;;  %v4379_v8 = vand.u32 2147483647, %v4300_v13  ;;  %vm4375_vm4 = vweird.f32 %v4300_v13 }
 0x395   :  { %v4193_v27 = vpop.f32.mrf.mxu0 }
 0x396   :  { %v4382_v31 = vor.u32 1.1754944e-38, %v4381_v21  ;;  %vm4380_vm6 = vcmp.eq.f32.partialorder %v4379_v8, 8.507059e+37 }
 0x399   :  { %v7183_v14 = vpop.eup %7182 }
 0x39a   :  { %v7185_v15 = vpop.eup %7184  ;;  %v4307_v16 = vadd.f32 1.0, %v7183_v14 }
 0x39b   :  { %v4371_v55 = vmul.f32 %v7185_v15, %v4300_v13  ;;  %vm4376_vm3 = vweird.f32 %v7185_v15 }
 0x39c   :  { %7186 = vrcp.f32 %v4307_v16  ;;  %vm4377_vm5 = vmor %vm4375_vm4, %vm4376_vm3  ;;  %v4486_v39 = vand.u32 2147483648, %v4307_v16  ;;  %v4484_v45 = vand.u32 2147483647, %v4307_v16  ;;  %v4167_v60 = vpop.f32.mrf.mxu1  ;;  %vm4480_vm8 = vweird.f32 %v4307_v16 }
 0x39d   :  { %v4372_v18 = vsub.f32 1.0, %v4371_v55  ;;  %v4195_v46 = vpop.f32.mrf.mxu0 }
 0x39e   :  { %v4487_v17 = vor.u32 1.1754944e-38, %v4486_v39  ;;  %vm4485_vm10 = vcmp.eq.f32.partialorder %v4484_v45, 8.507059e+37 }
 0x39f   :  { %v4373_v23 = vmul.f32 %v7185_v15, %v4372_v18 }
 0x3a0   :  { %v4151_v20 = vpop.f32.mrf.mxu3 }
 0x3a1   :  { %v4152_v22 = vadd.f32 %v4151_v20, %v2701_v50  ;;  %v4179_v24 = vpop.f32.mrf.mxu2  ;;  %v4374_v26 = vadd.f32 %v7185_v15, %v4373_v23 }
 0x3a2   :  { %v7187_v29 = vpop.eup %7186 }
 0x3a3   :  { %v4166_v25 = vadd.f32 %v4165_v19, %v4152_v22  ;;  %v4378_v34 = vsel %vm4377_vm5, %v7185_v15, %v4374_v26  ;;  %v4476_v35 = vmul.f32 %v7187_v29, %v4307_v16  ;;  %vm4481_vm7 = vweird.f32 %v7187_v29 }
 0x3a4   :  { %v4383_v54 = vsel %vm4380_vm6, %v4382_v31, %v4378_v34  ;;  %vm4482_vm9 = vmor %vm4480_vm8, %vm4481_vm7 }
 0x3a5   :  { %v4180_v33 = vadd.f32 %v4179_v24, %v4166_v25  ;;  %4524 = vst [vmem:[%s10613_s10 + $0x20] sm:$0xff] %v4383_v54  ;;  %v4477_v3 = vsub.f32 1.0, %v4476_v35 }
 0x3a7   :  { %v4194_v38 = vadd.f32 %v4193_v27, %v4180_v33  ;;  %v4478_v44 = vmul.f32 %v7187_v29, %v4477_v3 }
 0x3a8   :  { %v4153_v11 = vpop.f32.mrf.mxu3 }
 0x3a9   :  { %v6619_v40 = vmul.f32 -1.442695, %v4194_v38  ;;  %v4154_v41 = vadd.f32 %v4153_v11, %v2701_v50  ;;  %v4479_v42 = vadd.f32 %v7187_v29, %v4478_v44  ;;  %v4181_v47 = vpop.f32.mrf.mxu2 }
 0x3ab   :  { %7188 = vpow2.f32 %v6619_v40  ;;  %v4168_v37 = vadd.f32 %v4167_v60, %v4154_v41  ;;  %v4483_v48 = vsel %vm4482_vm9, %v7187_v29, %v4479_v42 }
 0x3ac   :  { %v4488_v32 = vsel %vm4485_vm10, %v4487_v17, %v4483_v48 }
 0x3ad   :  { %v4182_v28 = vadd.f32 %v4181_v47, %v4168_v37  ;;  %4531 = vst [vmem:[%s10613_s10 + $0x58] sm:$0xff] %v4488_v32 }
 0x3af   :  { %v4196_v49 = vadd.f32 %v4195_v46, %v4182_v28 }
 0x3b1   :  { %v7189_v51 = vpop.eup %7188  ;;  %v6626_v52 = vmul.f32 -1.442695, %v4196_v49 }
 0x3b2   :  { %v4301_v53 = vadd.f32 1.0, %v7189_v51 }
 0x3b3   :  { %7190 = vpow2.f32 %v6626_v52 }
 0x3b4   :  { %7192 = vrcp.f32 %v4301_v53  ;;  %v4221_v63 = vpop.f32.mrf.mxu1  ;;  %v4396_v1 = vand.u32 2147483648, %v4301_v53  ;;  %v4394_v4 = vand.u32 2147483647, %v4301_v53  ;;  %vm4390_vm12 = vweird.f32 %v4301_v53 }
 0x3b5   :  { %v4249_v7 = vpop.f32.mrf.mxu0 }
 0x3b6   :  { %v4397_v10 = vor.u32 1.1754944e-38, %v4396_v1  ;;  %vm4395_vm14 = vcmp.eq.f32.partialorder %v4394_v4, 8.507059e+37 }
 0x3b9   :  { %v7191_v56 = vpop.eup %7190 }
 0x3ba   :  { %v7193_v57 = vpop.eup %7192  ;;  %v4308_v58 = vadd.f32 1.0, %v7191_v56 }
 0x3bb   :  { %v4386_v61 = vmul.f32 %v7193_v57, %v4301_v53  ;;  %vm4391_vm11 = vweird.f32 %v7193_v57 }
 0x3bc   :  { %7194 = vrcp.f32 %v4308_v58  ;;  %vm4392_vm13 = vmor %vm4390_vm12, %vm4391_vm11  ;;  %v4501_v55 = vand.u32 2147483648, %v4308_v58  ;;  %v4499_v21 = vand.u32 2147483647, %v4308_v58  ;;  %v4223_v22 = vpop.f32.mrf.mxu1  ;;  %vm4495_vm1 = vweird.f32 %v4308_v58 }
 0x3bd   :  { %v4387_v62 = vsub.f32 1.0, %v4386_v61  ;;  %v4251_v29 = vpop.f32.mrf.mxu0 }
 0x3be   :  { %v4502_v25 = vor.u32 1.1754944e-38, %v4501_v55  ;;  %vm4500_vm3 = vcmp.eq.f32.partialorder %v4499_v21, 8.507059e+37 }
 0x3bf   :  { %v4388_v2 = vmul.f32 %v7193_v57, %v4387_v62 }
 0x3c0   :  { %v4207_v0 = vpop.f32.mrf.mxu3 }
 0x3c1   :  { %v4208_v43 = vadd.f32 %v4207_v0, %v2702_v59  ;;  %v4235_v5 = vpop.f32.mrf.mxu2  ;;  %v4389_v36 = vadd.f32 %v7193_v57, %v4388_v2 }
 0x3c2   :  { %v7195_v9 = vpop.eup %7194 }
 0x3c3   :  { %v4222_v6 = vadd.f32 %v4221_v63, %v4208_v43  ;;  %v4393_v30 = vsel %vm4392_vm13, %v7193_v57, %v4389_v36  ;;  %v4491_v13 = vmul.f32 %v7195_v9, %v4308_v58  ;;  %vm4496_vm15 = vweird.f32 %v7195_v9 }
 0x3c4   :  { %v4398_v14 = vsel %vm4395_vm14, %v4397_v10, %v4393_v30  ;;  %vm4497_vm2 = vmor %vm4495_vm1, %vm4496_vm15 }
 0x3c5   :  { %v4236_v12 = vadd.f32 %v4235_v5, %v4222_v6  ;;  %4525 = vst [vmem:[%s10613_s10 + $0x28] sm:$0xff] %v4398_v14  ;;  %v4492_v16 = vsub.f32 1.0, %v4491_v13 }
 0x3c7   :  { %v4250_v15 = vadd.f32 %v4249_v7, %v4236_v12  ;;  %v4493_v20 = vmul.f32 %v7195_v9, %v4492_v16 }
 0x3c8   :  { %v4209_v50 = vpop.f32.mrf.mxu3 }
 0x3c9   :  { %v6620_v18 = vmul.f32 -1.442695, %v4250_v15  ;;  %v4210_v19 = vadd.f32 %v4209_v50, %v2702_v59  ;;  %v4494_v8 = vadd.f32 %v7195_v9, %v4493_v20  ;;  %v4237_v24 = vpop.f32.mrf.mxu2 }
 0x3cb   :  { %7196 = vpow2.f32 %v6620_v18  ;;  %v4224_v23 = vadd.f32 %v4223_v22, %v4210_v19  ;;  %v4498_v27 = vsel %vm4497_vm2, %v7195_v9, %v4494_v8 }
 0x3cc   :  { %v4503_v31 = vsel %vm4500_vm3, %v4502_v25, %v4498_v27 }
 0x3cd   :  { %v4238_v26 = vadd.f32 %v4237_v24, %v4224_v23  ;;  %4532 = vst [vmem:[%s10613_s10 + $0x60] sm:$0xff] %v4503_v31 }
 0x3cf   :  { %v4252_v33 = vadd.f32 %v4251_v29, %v4238_v26 }
 0x3d1   :  { %v7197_v34 = vpop.eup %7196  ;;  %v6627_v35 = vmul.f32 -1.442695, %v4252_v33 }
 0x3d2   :  { %v4302_v54 = vadd.f32 1.0, %v7197_v34 }
 0x3d3   :  { %7198 = vpow2.f32 %v6627_v35 }
 0x3d4   :  { %7200 = vrcp.f32 %v4302_v54  ;;  %v4411_v41 = vand.u32 2147483648, %v4302_v54  ;;  %v4409_v45 = vand.u32 2147483647, %v4302_v54  ;;  %vm4405_vm5 = vweird.f32 %v4302_v54 }
 0x3d6   :  { %v4412_v42 = vor.u32 1.1754944e-38, %v4411_v41  ;;  %vm4410_vm7 = vcmp.eq.f32.partialorder %v4409_v45, 8.507059e+37 }
 0x3d9   :  { %v7199_v38 = vpop.eup %7198 }
 0x3da   :  { %v7201_v3 = vpop.eup %7200  ;;  %v4309_v11 = vadd.f32 1.0, %v7199_v38 }
 0x3db   :  { %v4401_v39 = vmul.f32 %v7201_v3, %v4302_v54  ;;  %vm4406_vm4 = vweird.f32 %v7201_v3 }
 0x3dc   :  { %7202 = vrcp.f32 %v4309_v11  ;;  %vm4407_vm6 = vmor %vm4405_vm5, %vm4406_vm4  ;;  %v4516_v46 = vand.u32 2147483648, %v4309_v11  ;;  %v4514_v49 = vand.u32 2147483647, %v4309_v11  ;;  %vm4510_vm9 = vweird.f32 %v4309_v11 }
 0x3dd   :  { %v4402_v40 = vsub.f32 1.0, %v4401_v39 }
 0x3de   :  { %v4517_v52 = vor.u32 1.1754944e-38, %v4516_v46  ;;  %vm4515_vm11 = vcmp.eq.f32.partialorder %v4514_v49, 8.507059e+37 }
 0x3df   :  { %v4403_v44 = vmul.f32 %v7201_v3, %v4402_v40 }
 0x3e1   :  { %v4404_v60 = vadd.f32 %v7201_v3, %v4403_v44 }
 0x3e2   :  { %v7203_v37 = vpop.eup %7202 }
 0x3e3   :  { %v4408_v47 = vsel %vm4407_vm6, %v7201_v3, %v4404_v60  ;;  %v4506_v17 = vmul.f32 %v7203_v37, %v4309_v11  ;;  %vm4511_vm8 = vweird.f32 %v7203_v37 }
 0x3e4   :  { %v4413_v28 = vsel %vm4410_vm7, %v4412_v42, %v4408_v47  ;;  %vm4512_vm10 = vmor %vm4510_vm9, %vm4511_vm8 }
 0x3e5   :  { %4526 = vst.msk [vmem:[%s10613_s10 + $0x30] sm:$0xff] %vm1245_vm0, %v4413_v28  ;;  %v4507_v48 = vsub.f32 1.0, %v4506_v17 }
 0x3e7   :  { %v4508_v32 = vmul.f32 %v7203_v37, %v4507_v48 }
 0x3e9   :  { %v4509_v51 = vadd.f32 %v7203_v37, %v4508_v32 }
 0x3eb   :  { %v4513_v53 = vsel %vm4512_vm10, %v7203_v37, %v4509_v51 }
 0x3ec   :  { %v4518_v56 = vsel %vm4515_vm11, %v4517_v52, %v4513_v53 }
 0x3ed   :  { %4533 = vst.msk [vmem:[%s10613_s10 + $0x68] sm:$0xff] %vm1245_vm0, %v4518_v56 }

</bundles_post_ra>
